<compile_context>
chip_gen: v7x
topology: tpu7x:2x2x1
jax: 0.10.0
libtpu: 0.0.40
codegen_flags: <defaults>
</compile_context>

<pallas_src>
import functools

import jax
import jax.numpy as jnp
from jax import lax
from jax.experimental import pallas as pl
from jax.experimental.pallas import tpu as pltpu

HIGHEST = jax.lax.Precision.HIGHEST   # pure-JAX reference only


def _round_up(x, m):
    return ((x + m - 1) // m) * m


def _vmem_limit_bytes():
    # ~75% of the chip's physical VMEM (v5e/v6e: 128 MiB, v7x: 64 MiB), clamped
    # to a range that is safe to request everywhere.
    try:
        cap = int(pltpu.get_tpu_info().vmem_capacity_bytes)
    except Exception:
        cap = 64 << 20
    return max(32 << 20, min(cap * 3 // 4, 112 << 20))


def _pick_row_tile(hout, s, P, cpack, epad, coutpad, budget_bytes):
    """Largest divisor of `hout` whose per-step VMEM working set fits the budget."""
    cap = 8 if s > 1 else (1 << 30)     # bound the unrolled per-output-row loop
    best = 1
    for cand in range(1, hout + 1):
        if hout % cand or cand > cap:
            continue
        L = (s * cand + 2) * P
        M = cand * P
        need = (
            2 * L * cpack * 2                                   # banded input (2 slots, bf16)
            + 2 * M * coutpad * 4                               # output block (double-buffered, f32)
            + 2 * 2 * (cpack * epad + epad * coutpad + cpack * coutpad)   # bf16 weights (2 bufs)
            + 2 * 4 * (16 * epad + 2 * epad + 2 * coutpad)                # f32 taps + shifts
            + 4 * (3 * L + 3 * M) * epad                        # y + 2 rolled copies + z temporaries
            + 4 * 2 * M * coutpad                               # projection temporaries
        )
        if need <= budget_bytes:
            best = cand
    return best


# -----------------------------------------------------------------------------
# Fused kernel factory.
#   Flat layout: padded image positions (row, col) are flattened row-major with
#   row pitch P (multiple of 8, >= W+2); channels (padded to 128) on lanes.
#   Depthwise tap (ki, kj) is then the P-aligned slice [ki*P : ki*P + M] of the
#   kj-rolled expansion.  Padding validity mask lives in channel `mask_ch`.
# -----------------------------------------------------------------------------
def _make_fused_kernel(P, THo, s, mask_ch, coutpad, skip_mode):
    M = THo * P                 # flat output rows produced per tile
    L = (s * THo + 2) * P       # flat input-band rows per tile
    step = s * THo * P          # flat band-start advance between tiles

    def kernel(*refs):
        if skip_mode == "conv":
            (x_hbm, w1_ref, sh1_ref, wd_ref, sh2_ref, w3_ref, b3_ref,
             ws_ref, shs_ref, o_ref, xbuf, sem) = refs
        else:
            (x_hbm, w1_ref, sh1_ref, wd_ref, sh2_ref, w3_ref, b3_ref,
             o_ref, xbuf, sem) = refs

        n = pl.program_id(0)
        j = pl.program_id(1)
        n_j = pl.num_programs(1)
        slot = j % 2

        def band_copy(jj, sl):
            return pltpu.make_async_copy(
                x_hbm.at[n, pl.ds(jj * step, L), :], xbuf.at[sl], sem.at[sl])

        @pl.when(j == 0)                       # prime the first band of this image
        def _():
            band_copy(0, 0).start()

        @pl.when(j + 1 < n_j)                  # prefetch the next band (double buffer)
        def _():
            band_copy(j + 1, (j + 1) % 2).start()

        band_copy(j, slot).wait()

        xb = xbuf[slot]                                      # (L, Cpack) bf16
        mb = xb[:, mask_ch:mask_ch + 1].astype(jnp.float32)  # (L, 1) validity mask

        # ---- 1x1 expansion (bf16 MXU, f32 acc) + folded BN + ReLU6 + pad mask ----
        y = jnp.dot(xb, w1_ref[...], preferred_element_type=jnp.float32)
        y = jnp.clip(y + sh1_ref[...], 0.0, 6.0) * mb        # (L, Epad) f32

        # +1 / +2 column tap offsets as XLU sublane rotations; every tap slice
        # below then starts at a multiple of P (P % 8 == 0 -> no relayouts).
        ys = (y, pltpu.roll(y, L - 1, 0), pltpu.roll(y, L - 2, 0))
        wd = wd_ref[...]                                     # (9, Epad) f32

        # ---- depthwise 3x3 + folded BN + ReLU6 (f32 VPU) ----
        if s == 1:
            acc = None
            for ki in range(3):
                for kj in range(3):
                    t = ys[kj][ki * P: ki * P + M, :] * wd[ki * 3 + kj: ki * 3 + kj + 1, :]
                    acc = t if acc is None else acc + t
            z = jnp.clip(acc + sh2_ref[...], 0.0, 6.0)       # (M, Epad)
        else:
            # in-kernel stride path: compute only the s-strided output rows.
            rows = []
            for r in range(THo):
                accr = None
                for ki in range(3):
                    base = (s * r + ki) * P
                    for kj in range(3):
                        t = ys[kj][base: base + P, :] * wd[ki * 3 + kj: ki * 3 + kj + 1, :]
                        accr = t if accr is None else accr + t
                rows.append(jnp.clip(accr + sh2_ref[...], 0.0, 6.0))
            z = jnp.concatenate(rows, axis=0)                # (M, Epad)

        # ---- 1x1 projection (bf16 MXU, f32 acc) + fused residual branch ----
        o = jnp.dot(z.astype(jnp.bfloat16), w3_ref[...],
                    preferred_element_type=jnp.float32) + b3_ref[...]
        if skip_mode == "identity":
            o = o + xb[P + 1: P + 1 + M, :coutpad].astype(jnp.float32)
        elif skip_mode == "conv":
            xc = xb[P + 1: P + 1 + M, :]
            o = o + (jnp.dot(xc, ws_ref[...], preferred_element_type=jnp.float32)
                     + shs_ref[...])
        o_ref[0] = o                                         # lane-dense (M, Coutpad) store

    return kernel


def bottleneck_fused(x_nhwc, params, stride, row_tile=None):
    N, H, W, Cin = x_nhwc.shape
    E = params["w1f"].shape[1]
    Cout = params["w3"].shape[1]
    s = int(stride)

    P = _round_up(W + 2, 8)                 # sublane-aligned flat row pitch
    Hout = (H - 1) // s + 1
    Wout = (W - 1) // s + 1
    Hp = max(H, s * Hout)                   # extra zero rows keep the band DMAs in bounds
    flat_len = (Hp + 2) * P

    Cpack = _round_up(Cin + 1, 128)         # +1: validity mask packed as an extra channel
    Epad = _round_up(E, 128)
    Coutpad = _round_up(Cout, 128)

    # zero-padded, lane-padded NHWC canvas flattened row-major; the validity
    # mask rides along as channel `Cin` so it shares the banded input DMA.
    canvas = jnp.zeros((N, Hp + 2, P, Cpack), jnp.bfloat16)
    canvas = canvas.at[:, 1:H + 1, 1:W + 1, :Cin].set(x_nhwc.astype(jnp.bfloat16))
    canvas = canvas.at[:, 1:H + 1, 1:W + 1, Cin].set(1.0)
    xflat = canvas.reshape(N, flat_len, Cpack)

    def pad2(a, r, c, dtype):
        return jnp.pad(a, ((0, r - a.shape[0]), (0, c - a.shape[1]))).astype(dtype)

    w1p = pad2(params["w1f"], Cpack, Epad, jnp.bfloat16)
    sh1p = pad2(params["shift1"], 1, Epad, jnp.float32)
    wdp = pad2(params["wd9f"], 9, Epad, jnp.float32)
    sh2p = pad2(params["shift2"], 1, Epad, jnp.float32)
    w3p = pad2(params["w3"], Epad, Coutpad, jnp.bfloat16)
    b3p = pad2(params["b3"], 1, Coutpad, jnp.float32)

    skip_mode = "none"
    if s == 1:
        skip_mode = "identity" if Cin == Cout else "conv"

    vmem_limit = _vmem_limit_bytes()
    if row_tile is not None:
        assert Hout % row_tile == 0
        THo = int(row_tile)
    else:
        THo = _pick_row_tile(Hout, s, P, Cpack, Epad, Coutpad,
                             budget_bytes=vmem_limit // 2)
    n_tiles = Hout // THo
    M = THo * P
    L = (s * THo + 2) * P

    kernel = _make_fused_kernel(P, THo, s, Cin, Coutpad, skip_mode)

    in_specs = [
        pl.BlockSpec(memory_space=pl.ANY),                     # x stays in HBM; manual band DMA
        pl.BlockSpec((Cpack, Epad), lambda n, j: (0, 0)),      # folded expansion weight (bf16)
        pl.BlockSpec((1, Epad), lambda n, j: (0, 0)),          # expansion shift
        pl.BlockSpec((9, Epad), lambda n, j: (0, 0)),          # folded depthwise taps (f32)
        pl.BlockSpec((1, Epad), lambda n, j: (0, 0)),          # depthwise shift
        pl.BlockSpec((Epad, Coutpad), lambda n, j: (0, 0)),    # projection weight (bf16)
        pl.BlockSpec((1, Coutpad), lambda n, j: (0, 0)),       # projection bias
    ]
    args = [xflat, w1p, sh1p, wdp, sh2p, w3p, b3p]
    if skip_mode == "conv":
        wsp = pad2(params["wsf"], Cpack, Coutpad, jnp.bfloat16)
        shsp = pad2(params["sshift"], 1, Coutpad, jnp.float32)
        in_specs += [pl.BlockSpec((Cpack, Coutpad), lambda n, j: (0, 0)),
                     pl.BlockSpec((1, Coutpad), lambda n, j: (0, 0))]
        args += [wsp, shsp]

    flops = 2 * N * (flat_len * Cpack * Epad
                     + Hout * P * 9 * Epad
                     + Hout * P * Epad * Coutpad)
    if skip_mode == "conv":
        flops += 2 * N * Hout * P * Cpack * Coutpad
    bytes_accessed = (2 * xflat.size + 4 * N * Hout * P * Coutpad
                      + 2 * (Cpack * Epad + Epad * Coutpad + Cpack * Coutpad)
                      + 4 * (9 * Epad + 2 * Epad + 2 * Coutpad))

    o_flat = pl.pallas_call(
        kernel,
        out_shape=jax.ShapeDtypeStruct((N, Hout * P, Coutpad), jnp.float32),
        grid=(N, n_tiles),
        in_specs=in_specs,
        out_specs=pl.BlockSpec((1, M, Coutpad), lambda n, j: (n, j, 0)),
        scratch_shapes=[pltpu.VMEM((2, L, Cpack), jnp.bfloat16),
                        pltpu.SemaphoreType.DMA((2,))],
        compiler_params=pltpu.CompilerParams(
            dimension_semantics=("parallel", "arbitrary"),
            vmem_limit_bytes=int(vmem_limit)),
        cost_estimate=pl.CostEstimate(flops=int(flops), transcendentals=0,
                                      bytes_accessed=int(bytes_accessed)),
    )(*args)

    o = o_flat.reshape(N, Hout, P, Coutpad)
    return o[:, :, 0:s * Wout:s, :Cout]     # drop pad columns / strided cols / lane padding


# -----------------------------------------------------------------------------
# Parameters: mirrors shared_weight_init (conv weight ~ N(0,1), bias=0;
# BN gamma=1, beta=0, running mean=0, var=1) with the BN scale folded into the
# conv weights and only the additive shift kept (inference-mode fold).
# -----------------------------------------------------------------------------
def init_params(key, t, cin, cout):
    E = cin * t
    eps = 1e-5
    k1, k2, k3, k4 = jax.random.split(key, 4)
    w1 = jax.random.normal(k1, (cin, E), jnp.float32)      # 1x1 expand
    wd = jax.random.normal(k2, (3, 3, E), jnp.float32)     # depthwise 3x3
    w3 = jax.random.normal(k3, (E, cout), jnp.float32)     # 1x1 project
    ws = jax.random.normal(k4, (cin, cout), jnp.float32)   # skip 1x1
    b1 = jnp.zeros((E,)); bd = jnp.zeros((E,)); b3 = jnp.zeros((cout,)); bs = jnp.zeros((cout,))

    def fold(n, bias):
        scale = jnp.ones((n,)) / jnp.sqrt(jnp.ones((n,)) + eps)        # gamma/sqrt(var+eps)
        shift = (bias - jnp.zeros((n,))) * scale + jnp.zeros((n,))     # (b-mean)*scale+beta
        return scale, shift

    s1, sh1 = fold(E, b1)
    s2, sh2 = fold(E, bd)
    ss, shs = fold(cout, bs)

    return dict(
        w1f=(w1 * s1[None, :]).astype(jnp.float32),
        shift1=sh1[None, :].astype(jnp.float32),
        wd9f=(wd * s2[None, None, :]).reshape(9, E).astype(jnp.float32),
        shift2=sh2[None, :].astype(jnp.float32),
        w3=w3, b3=b3[None, :].astype(jnp.float32),
        wsf=(ws * ss[None, :]).astype(jnp.float32),
        sshift=shs[None, :].astype(jnp.float32),
    )


@functools.partial(jax.jit, static_argnames=("stride", "row_tile"))
def bottleneck_forward(x_nchw, params, stride, row_tile=None):
    x_nhwc = jnp.transpose(x_nchw, (0, 2, 3, 1)).astype(jnp.float32)
    o = bottleneck_fused(x_nhwc, params, stride, row_tile=row_tile)
    return jnp.transpose(o, (0, 3, 1, 2))


# -----------------------------------------------------------------------------
# Pure-JAX reference (HIGHEST precision) for the correctness check.
# -----------------------------------------------------------------------------
def reference_forward(x_nchw, params, stride):
    x = jnp.transpose(x_nchw, (0, 2, 3, 1)).astype(jnp.float32)
    dn = ("NHWC", "HWIO", "NHWC")
    cin = x.shape[-1]
    E = params["w1f"].shape[1]
    cout = params["w3"].shape[1]
    y = lax.conv_general_dilated(x, params["w1f"].reshape(1, 1, cin, E), (1, 1), "VALID",
                                 dimension_numbers=dn, precision=HIGHEST) + params["shift1"]
    y = jnp.clip(y, 0.0, 6.0)
    z = lax.conv_general_dilated(y, params["wd9f"].reshape(3, 3, 1, E), (stride, stride),
                                 ((1, 1), (1, 1)), dimension_numbers=dn,
                                 feature_group_count=E, precision=HIGHEST) + params["shift2"]
    z = jnp.clip(z, 0.0, 6.0)
    o = lax.conv_general_dilated(z, params["w3"].reshape(1, 1, E, cout), (1, 1), "VALID",
                                 dimension_numbers=dn, precision=HIGHEST) + params["b3"]
    if stride == 1:
        if cin == cout:
            o = o + x
        else:
            xs = lax.conv_general_dilated(x, params["wsf"].reshape(1, 1, cin, cout), (1, 1),
                                          "VALID", dimension_numbers=dn,
                                          precision=HIGHEST) + params["sshift"]
            o = o + xs
    return jnp.transpose(o, (0, 3, 1, 2))


if __name__ == "__main__":
    t, cin, cout = 2, 4, 8
    N, H, W = 2, 16, 16

    key = jax.random.PRNGKey(0)
    kx, kp = jax.random.split(key)
    x = jax.random.normal(kx, (N, cin, H, W), jnp.float32)     # NCHW, like PyTorch
    params = init_params(kp, t, cin, cout)

    def check(out, ref, name):
        assert out.shape == ref.shape, (name, out.shape, ref.shape)
        err = float(jnp.max(jnp.abs(out - ref)))
        # bf16 MXU operands in the kernel vs f32 HIGHEST reference.
        tol = 5e-2 * float(jnp.max(jnp.abs(ref))) + 0.3
        assert err < tol, f"{name}: max abs err {err} > tol {tol}"

    # stride=1 (conv-skip branch) and stride=2 (in-kernel strided-row branch)
    for stride in (1, 2):
        out = jax.block_until_ready(bottleneck_forward(x, params, stride))
        check(out, reference_forward(x, params, stride), f"stride{stride}")

    # forced multi-row-tile run exercises the banded double-buffered input DMA
    out = jax.block_until_ready(bottleneck_forward(x, params, 1, row_tile=4))
    check(out, reference_forward(x, params, 1), "stride1_tiled")

    # identity-skip branch (cin == cout, stride 1)
    params_id = init_params(kp, t, cin, cin)
    out = jax.block_until_ready(bottleneck_forward(x, params_id, 1))
    check(out, reference_forward(x, params_id, 1), "identity")

    # odd spatial size with stride 2 (extra bottom DMA-pad row, odd Wout)
    x_odd = jax.random.normal(kx, (N, cin, 15, 15), jnp.float32)
    out = jax.block_until_ready(bottleneck_forward(x_odd, params, 2))
    check(out, reference_forward(x_odd, params, 2), "stride2_odd")

    print("KERNEL_OK")
</pallas_src>

<mosaic_0001>
module attributes {stable_mosaic.version = 11 : i64} {
  func.func @kernel(%arg0: i32, %arg1: i32, %arg2: memref<2x432x128xbf16, #tpu.memory_space<any>>, %arg3: memref<128x128xbf16, #tpu.memory_space<vmem>>, %arg4: memref<1x128xf32, #tpu.memory_space<vmem>>, %arg5: memref<9x128xf32, #tpu.memory_space<vmem>>, %arg6: memref<1x128xf32, #tpu.memory_space<vmem>>, %arg7: memref<128x128xbf16, #tpu.memory_space<vmem>>, %arg8: memref<1x128xf32, #tpu.memory_space<vmem>>, %arg9: memref<128x128xbf16, #tpu.memory_space<vmem>>, %arg10: memref<1x128xf32, #tpu.memory_space<vmem>>, %arg11: memref<1x384x128xf32, #tpu.memory_space<vmem>>, %arg12: memref<2x432x128xbf16, #tpu.memory_space<vmem>>, %arg13: memref<2x!tpu.dma_semaphore, #tpu.memory_space<semaphore_mem>>) attributes {dimension_semantics = [#tpu.dimension_semantics<parallel>, #tpu.dimension_semantics<arbitrary>], iteration_bounds = array<i64: 2, 1>, scalar_prefetch = 0 : i64, scratch_operands = 2 : i64, tpu.core_type = #tpu.core_type<tc>, window_params = [{}, {pipeline_mode = #tpu.pipeline_mode<synchronous>, transform_indices = @transform_1, window_bounds = array<i64: 128, 128>}, {pipeline_mode = #tpu.pipeline_mode<synchronous>, transform_indices = @transform_2, window_bounds = array<i64: 1, 128>}, {pipeline_mode = #tpu.pipeline_mode<synchronous>, transform_indices = @transform_3, window_bounds = array<i64: 9, 128>}, {pipeline_mode = #tpu.pipeline_mode<synchronous>, transform_indices = @transform_4, window_bounds = array<i64: 1, 128>}, {pipeline_mode = #tpu.pipeline_mode<synchronous>, transform_indices = @transform_5, window_bounds = array<i64: 128, 128>}, {pipeline_mode = #tpu.pipeline_mode<synchronous>, transform_indices = @transform_6, window_bounds = array<i64: 1, 128>}, {pipeline_mode = #tpu.pipeline_mode<synchronous>, transform_indices = @transform_7, window_bounds = array<i64: 128, 128>}, {pipeline_mode = #tpu.pipeline_mode<synchronous>, transform_indices = @transform_8, window_bounds = array<i64: 1, 128>}, {transform_indices = @transform_9, window_bounds = array<i64: 1, 384, 128>}]} {
    %c2_i32 = arith.constant 2 : i32
    %c0_i32 = arith.constant 0 : i32
    %0 = arith.cmpi eq, %c2_i32, %c0_i32 : i32
    %c1_i32 = arith.constant 1 : i32
    %1 = arith.select %0, %c1_i32, %c2_i32 : i32
    %2 = arith.remsi %arg1, %1 : i32
    %c0_i32_0 = arith.constant 0 : i32
    %3 = arith.cmpi ne, %2, %c0_i32_0 : i32
    %c0_i32_1 = arith.constant 0 : i32
    %4 = arith.cmpi slt, %2, %c0_i32_1 : i32
    %c0_i32_2 = arith.constant 0 : i32
    %5 = arith.cmpi slt, %1, %c0_i32_2 : i32
    %6 = arith.xori %4, %5 : i1
    %7 = arith.andi %6, %3 : i1
    %8 = arith.addi %2, %1 : i32
    %9 = arith.select %7, %8, %2 : i32
    %c0_i32_3 = arith.constant 0 : i32
    %10 = arith.cmpi eq, %arg1, %c0_i32_3 : i32
    %11 = arith.extui %10 : i1 to i32
    %c0_i32_4 = arith.constant 0 : i32
    %12 = arith.cmpi ne, %11, %c0_i32_4 : i32
    scf.if %12 {
      %c0_i32_37 = arith.constant 0 : i32
      %c0_i32_38 = arith.constant 0 : i32
      %c0_i32_39 = arith.constant 0 : i32
      %c0_i32_40 = arith.constant 0 : i32
      %110 = tpu.memref_slice %arg2[%arg0, %c0_i32_39, %c0_i32_40] : memref<2x432x128xbf16, #tpu.memory_space<any>> -> memref<1x432x128xbf16, #tpu.memory_space<any>>
      %111 = tpu.memref_squeeze %110 : memref<1x432x128xbf16, #tpu.memory_space<any>> -> memref<432x128xbf16, #tpu.memory_space<any>>
      %c0_i32_41 = arith.constant 0 : i32
      %c0_i32_42 = arith.constant 0 : i32
      %112 = tpu.memref_slice %arg12[%c0_i32_37, %c0_i32_41, %c0_i32_42] : memref<2x432x128xbf16, #tpu.memory_space<vmem>> -> memref<1x432x128xbf16, #tpu.memory_space<vmem>>
      %113 = tpu.memref_squeeze %112 : memref<1x432x128xbf16, #tpu.memory_space<vmem>> -> memref<432x128xbf16, #tpu.memory_space<vmem>>
      %114 = tpu.memref_slice %arg13[%c0_i32_38] : memref<2x!tpu.dma_semaphore, #tpu.memory_space<semaphore_mem>> -> memref<1x!tpu.dma_semaphore, #tpu.memory_space<semaphore_mem>>
      %115 = tpu.memref_squeeze %114 : memref<1x!tpu.dma_semaphore, #tpu.memory_space<semaphore_mem>> -> memref<!tpu.dma_semaphore, #tpu.memory_space<semaphore_mem>>
      tpu.enqueue_dma source(%111 : memref<432x128xbf16, #tpu.memory_space<any>>) target(%113 : memref<432x128xbf16, #tpu.memory_space<vmem>>) target_semaphore(%115 : memref<!tpu.dma_semaphore, #tpu.memory_space<semaphore_mem>>)
    } else {
    }
    %c1_i32_5 = arith.constant 1 : i32
    %13 = arith.addi %arg1, %c1_i32_5 : i32
    %c1_i32_6 = arith.constant 1 : i32
    %14 = arith.cmpi slt, %13, %c1_i32_6 : i32
    %15 = arith.extui %14 : i1 to i32
    %c0_i32_7 = arith.constant 0 : i32
    %16 = arith.cmpi ne, %15, %c0_i32_7 : i32
    scf.if %16 {
      %c1_i32_37 = arith.constant 1 : i32
      %110 = arith.addi %arg1, %c1_i32_37 : i32
      %c1_i32_38 = arith.constant 1 : i32
      %111 = arith.addi %arg1, %c1_i32_38 : i32
      %c2_i32_39 = arith.constant 2 : i32
      %c0_i32_40 = arith.constant 0 : i32
      %112 = arith.cmpi eq, %c2_i32_39, %c0_i32_40 : i32
      %c1_i32_41 = arith.constant 1 : i32
      %113 = arith.select %112, %c1_i32_41, %c2_i32_39 : i32
      %114 = arith.remsi %111, %113 : i32
      %c0_i32_42 = arith.constant 0 : i32
      %115 = arith.cmpi ne, %114, %c0_i32_42 : i32
      %c0_i32_43 = arith.constant 0 : i32
      %116 = arith.cmpi slt, %114, %c0_i32_43 : i32
      %c0_i32_44 = arith.constant 0 : i32
      %117 = arith.cmpi slt, %113, %c0_i32_44 : i32
      %118 = arith.xori %116, %117 : i1
      %119 = arith.andi %118, %115 : i1
      %120 = arith.addi %114, %113 : i32
      %121 = arith.select %119, %120, %114 : i32
      %c384_i32_45 = arith.constant 384 : i32
      %122 = arith.muli %110, %c384_i32_45 : i32
      %c0_i32_46 = arith.constant 0 : i32
      %123 = tpu.memref_slice %arg2[%arg0, %122, %c0_i32_46] : memref<2x432x128xbf16, #tpu.memory_space<any>> -> memref<1x432x128xbf16, #tpu.memory_space<any>>
      %124 = tpu.memref_squeeze %123 : memref<1x432x128xbf16, #tpu.memory_space<any>> -> memref<432x128xbf16, #tpu.memory_space<any>>
      %c0_i32_47 = arith.constant 0 : i32
      %c0_i32_48 = arith.constant 0 : i32
      %125 = tpu.memref_slice %arg12[%121, %c0_i32_47, %c0_i32_48] : memref<2x432x128xbf16, #tpu.memory_space<vmem>> -> memref<1x432x128xbf16, #tpu.memory_space<vmem>>
      %126 = tpu.memref_squeeze %125 : memref<1x432x128xbf16, #tpu.memory_space<vmem>> -> memref<432x128xbf16, #tpu.memory_space<vmem>>
      %127 = tpu.memref_slice %arg13[%121] : memref<2x!tpu.dma_semaphore, #tpu.memory_space<semaphore_mem>> -> memref<1x!tpu.dma_semaphore, #tpu.memory_space<semaphore_mem>>
      %128 = tpu.memref_squeeze %127 : memref<1x!tpu.dma_semaphore, #tpu.memory_space<semaphore_mem>> -> memref<!tpu.dma_semaphore, #tpu.memory_space<semaphore_mem>>
      tpu.enqueue_dma source(%124 : memref<432x128xbf16, #tpu.memory_space<any>>) target(%126 : memref<432x128xbf16, #tpu.memory_space<vmem>>) target_semaphore(%128 : memref<!tpu.dma_semaphore, #tpu.memory_space<semaphore_mem>>)
    } else {
    }
    %c384_i32 = arith.constant 384 : i32
    %17 = arith.muli %arg1, %c384_i32 : i32
    %c0_i32_8 = arith.constant 0 : i32
    %18 = tpu.memref_slice %arg2[%arg0, %17, %c0_i32_8] : memref<2x432x128xbf16, #tpu.memory_space<any>> -> memref<1x432x128xbf16, #tpu.memory_space<any>>
    %19 = tpu.memref_squeeze %18 : memref<1x432x128xbf16, #tpu.memory_space<any>> -> memref<432x128xbf16, #tpu.memory_space<any>>
    %c0_i32_9 = arith.constant 0 : i32
    %c0_i32_10 = arith.constant 0 : i32
    %20 = tpu.memref_slice %arg12[%9, %c0_i32_9, %c0_i32_10] : memref<2x432x128xbf16, #tpu.memory_space<vmem>> -> memref<1x432x128xbf16, #tpu.memory_space<vmem>>
    %21 = tpu.memref_squeeze %20 : memref<1x432x128xbf16, #tpu.memory_space<vmem>> -> memref<432x128xbf16, #tpu.memory_space<vmem>>
    %22 = tpu.memref_slice %arg13[%9] : memref<2x!tpu.dma_semaphore, #tpu.memory_space<semaphore_mem>> -> memref<1x!tpu.dma_semaphore, #tpu.memory_space<semaphore_mem>>
    %23 = tpu.memref_squeeze %22 : memref<1x!tpu.dma_semaphore, #tpu.memory_space<semaphore_mem>> -> memref<!tpu.dma_semaphore, #tpu.memory_space<semaphore_mem>>
    tpu.wait_dma2 semaphore(%23 : memref<!tpu.dma_semaphore, #tpu.memory_space<semaphore_mem>>) src(%19 : memref<432x128xbf16, #tpu.memory_space<any>>) dst(%21 : memref<432x128xbf16, #tpu.memory_space<vmem>>)
    %24 = arith.index_cast %9 : i32 to index
    %c0 = arith.constant 0 : index
    %c0_11 = arith.constant 0 : index
    %25 = vector.load %arg12[%24, %c0, %c0_11] : memref<2x432x128xbf16, #tpu.memory_space<vmem>>, vector<1x432x128xbf16>
    %26 = vector.shape_cast %25 : vector<1x432x128xbf16> to vector<432x128xbf16>
    %27 = vector.extract_strided_slice %26 {offsets = [0, 4], sizes = [432, 1], strides = [1, 1]} : vector<432x128xbf16> to vector<432x1xbf16>
    %28 = arith.extf %27 : vector<432x1xbf16> to vector<432x1xf32>
    %c0_12 = arith.constant 0 : index
    %c0_13 = arith.constant 0 : index
    %29 = vector.load %arg3[%c0_12, %c0_13] : memref<128x128xbf16, #tpu.memory_space<vmem>>, vector<128x128xbf16>
    %cst = arith.constant dense<0.000000e+00> : vector<432x128xf32>
    %30 = tpu.matmul %26, %29, %cst {dimension_numbers = #tpu.dot_dimension_numbers<[1], [0], [0], [1], [0, 0, 1, 1], [], []>} : vector<432x128xbf16>, vector<128x128xbf16>, vector<432x128xf32> -> vector<432x128xf32>
    %c0_14 = arith.constant 0 : index
    %c0_15 = arith.constant 0 : index
    %31 = vector.load %arg4[%c0_14, %c0_15] : memref<1x128xf32, #tpu.memory_space<vmem>>, vector<1x128xf32>
    %32 = vector.broadcast %31 : vector<1x128xf32> to vector<432x128xf32>
    %33 = arith.addf %30, %32 : vector<432x128xf32>
    %cst_16 = arith.constant 0.000000e+00 : f32
    %cst_17 = arith.constant 6.000000e+00 : f32
    %34 = vector.broadcast %cst_16 : f32 to vector<432x128xf32>
    %35 = arith.maximumf %34, %33 : vector<432x128xf32>
    %36 = vector.broadcast %cst_17 : f32 to vector<432x128xf32>
    %37 = arith.minimumf %36, %35 : vector<432x128xf32>
    %38 = vector.broadcast %28 : vector<432x1xf32> to vector<432x128xf32>
    %39 = arith.mulf %37, %38 : vector<432x128xf32>
    %c431_i32 = arith.constant 431 : i32
    %40 = tpu.dynamic_rotate %39 by %c431_i32 dim 0 : vector<432x128xf32>, i32 -> vector<432x128xf32>
    %c430_i32 = arith.constant 430 : i32
    %41 = tpu.dynamic_rotate %39 by %c430_i32 dim 0 : vector<432x128xf32>, i32 -> vector<432x128xf32>
    %c0_18 = arith.constant 0 : index
    %c0_19 = arith.constant 0 : index
    %42 = vector.load %arg5[%c0_18, %c0_19] : memref<9x128xf32, #tpu.memory_space<vmem>>, vector<9x128xf32>
    %43 = vector.extract_strided_slice %39 {offsets = [0, 0], sizes = [384, 128], strides = [1, 1]} : vector<432x128xf32> to vector<384x128xf32>
    %44 = vector.extract_strided_slice %42 {offsets = [0, 0], sizes = [1, 128], strides = [1, 1]} : vector<9x128xf32> to vector<1x128xf32>
    %45 = vector.broadcast %44 : vector<1x128xf32> to vector<384x128xf32>
    %46 = arith.mulf %43, %45 : vector<384x128xf32>
    %47 = vector.extract_strided_slice %40 {offsets = [0, 0], sizes = [384, 128], strides = [1, 1]} : vector<432x128xf32> to vector<384x128xf32>
    %48 = vector.extract_strided_slice %42 {offsets = [1, 0], sizes = [1, 128], strides = [1, 1]} : vector<9x128xf32> to vector<1x128xf32>
    %49 = vector.broadcast %48 : vector<1x128xf32> to vector<384x128xf32>
    %50 = arith.mulf %47, %49 : vector<384x128xf32>
    %51 = arith.addf %46, %50 : vector<384x128xf32>
    %52 = vector.extract_strided_slice %41 {offsets = [0, 0], sizes = [384, 128], strides = [1, 1]} : vector<432x128xf32> to vector<384x128xf32>
    %53 = vector.extract_strided_slice %42 {offsets = [2, 0], sizes = [1, 128], strides = [1, 1]} : vector<9x128xf32> to vector<1x128xf32>
    %54 = vector.broadcast %53 : vector<1x128xf32> to vector<384x128xf32>
    %55 = arith.mulf %52, %54 : vector<384x128xf32>
    %56 = arith.addf %51, %55 : vector<384x128xf32>
    %57 = vector.extract_strided_slice %39 {offsets = [24, 0], sizes = [384, 128], strides = [1, 1]} : vector<432x128xf32> to vector<384x128xf32>
    %58 = vector.extract_strided_slice %42 {offsets = [3, 0], sizes = [1, 128], strides = [1, 1]} : vector<9x128xf32> to vector<1x128xf32>
    %59 = vector.broadcast %58 : vector<1x128xf32> to vector<384x128xf32>
    %60 = arith.mulf %57, %59 : vector<384x128xf32>
    %61 = arith.addf %56, %60 : vector<384x128xf32>
    %62 = vector.extract_strided_slice %40 {offsets = [24, 0], sizes = [384, 128], strides = [1, 1]} : vector<432x128xf32> to vector<384x128xf32>
    %63 = vector.extract_strided_slice %42 {offsets = [4, 0], sizes = [1, 128], strides = [1, 1]} : vector<9x128xf32> to vector<1x128xf32>
    %64 = vector.broadcast %63 : vector<1x128xf32> to vector<384x128xf32>
    %65 = arith.mulf %62, %64 : vector<384x128xf32>
    %66 = arith.addf %61, %65 : vector<384x128xf32>
    %67 = vector.extract_strided_slice %41 {offsets = [24, 0], sizes = [384, 128], strides = [1, 1]} : vector<432x128xf32> to vector<384x128xf32>
    %68 = vector.extract_strided_slice %42 {offsets = [5, 0], sizes = [1, 128], strides = [1, 1]} : vector<9x128xf32> to vector<1x128xf32>
    %69 = vector.broadcast %68 : vector<1x128xf32> to vector<384x128xf32>
    %70 = arith.mulf %67, %69 : vector<384x128xf32>
    %71 = arith.addf %66, %70 : vector<384x128xf32>
    %72 = vector.extract_strided_slice %39 {offsets = [48, 0], sizes = [384, 128], strides = [1, 1]} : vector<432x128xf32> to vector<384x128xf32>
    %73 = vector.extract_strided_slice %42 {offsets = [6, 0], sizes = [1, 128], strides = [1, 1]} : vector<9x128xf32> to vector<1x128xf32>
    %74 = vector.broadcast %73 : vector<1x128xf32> to vector<384x128xf32>
    %75 = arith.mulf %72, %74 : vector<384x128xf32>
    %76 = arith.addf %71, %75 : vector<384x128xf32>
    %77 = vector.extract_strided_slice %40 {offsets = [48, 0], sizes = [384, 128], strides = [1, 1]} : vector<432x128xf32> to vector<384x128xf32>
    %78 = vector.extract_strided_slice %42 {offsets = [7, 0], sizes = [1, 128], strides = [1, 1]} : vector<9x128xf32> to vector<1x128xf32>
    %79 = vector.broadcast %78 : vector<1x128xf32> to vector<384x128xf32>
    %80 = arith.mulf %77, %79 : vector<384x128xf32>
    %81 = arith.addf %76, %80 : vector<384x128xf32>
    %82 = vector.extract_strided_slice %41 {offsets = [48, 0], sizes = [384, 128], strides = [1, 1]} : vector<432x128xf32> to vector<384x128xf32>
    %83 = vector.extract_strided_slice %42 {offsets = [8, 0], sizes = [1, 128], strides = [1, 1]} : vector<9x128xf32> to vector<1x128xf32>
    %84 = vector.broadcast %83 : vector<1x128xf32> to vector<384x128xf32>
    %85 = arith.mulf %82, %84 : vector<384x128xf32>
    %86 = arith.addf %81, %85 : vector<384x128xf32>
    %c0_20 = arith.constant 0 : index
    %c0_21 = arith.constant 0 : index
    %87 = vector.load %arg6[%c0_20, %c0_21] : memref<1x128xf32, #tpu.memory_space<vmem>>, vector<1x128xf32>
    %88 = vector.broadcast %87 : vector<1x128xf32> to vector<384x128xf32>
    %89 = arith.addf %86, %88 : vector<384x128xf32>
    %cst_22 = arith.constant 0.000000e+00 : f32
    %cst_23 = arith.constant 6.000000e+00 : f32
    %90 = vector.broadcast %cst_22 : f32 to vector<384x128xf32>
    %91 = arith.maximumf %90, %89 : vector<384x128xf32>
    %92 = vector.broadcast %cst_23 : f32 to vector<384x128xf32>
    %93 = arith.minimumf %92, %91 : vector<384x128xf32>
    %94 = arith.truncf %93 : vector<384x128xf32> to vector<384x128xbf16>
    %c0_24 = arith.constant 0 : index
    %c0_25 = arith.constant 0 : index
    %95 = vector.load %arg7[%c0_24, %c0_25] : memref<128x128xbf16, #tpu.memory_space<vmem>>, vector<128x128xbf16>
    %cst_26 = arith.constant dense<0.000000e+00> : vector<384x128xf32>
    %96 = tpu.matmul %94, %95, %cst_26 {dimension_numbers = #tpu.dot_dimension_numbers<[1], [0], [0], [1], [0, 0, 1, 1], [], []>} : vector<384x128xbf16>, vector<128x128xbf16>, vector<384x128xf32> -> vector<384x128xf32>
    %c0_27 = arith.constant 0 : index
    %c0_28 = arith.constant 0 : index
    %97 = vector.load %arg8[%c0_27, %c0_28] : memref<1x128xf32, #tpu.memory_space<vmem>>, vector<1x128xf32>
    %98 = vector.broadcast %97 : vector<1x128xf32> to vector<384x128xf32>
    %99 = arith.addf %96, %98 : vector<384x128xf32>
    %100 = vector.extract_strided_slice %26 {offsets = [25, 0], sizes = [384, 128], strides = [1, 1]} : vector<432x128xbf16> to vector<384x128xbf16>
    %c0_29 = arith.constant 0 : index
    %c0_30 = arith.constant 0 : index
    %101 = vector.load %arg9[%c0_29, %c0_30] : memref<128x128xbf16, #tpu.memory_space<vmem>>, vector<128x128xbf16>
    %cst_31 = arith.constant dense<0.000000e+00> : vector<384x128xf32>
    %102 = tpu.matmul %100, %101, %cst_31 {dimension_numbers = #tpu.dot_dimension_numbers<[1], [0], [0], [1], [0, 0, 1, 1], [], []>} : vector<384x128xbf16>, vector<128x128xbf16>, vector<384x128xf32> -> vector<384x128xf32>
    %c0_32 = arith.constant 0 : index
    %c0_33 = arith.constant 0 : index
    %103 = vector.load %arg10[%c0_32, %c0_33] : memref<1x128xf32, #tpu.memory_space<vmem>>, vector<1x128xf32>
    %104 = vector.broadcast %103 : vector<1x128xf32> to vector<384x128xf32>
    %105 = arith.addf %102, %104 : vector<384x128xf32>
    %106 = arith.addf %99, %105 : vector<384x128xf32>
    %c0_34 = arith.constant 0 : index
    %c0_35 = arith.constant 0 : index
    %c0_36 = arith.constant 0 : index
    %107 = vector.load %arg11[%c0_34, %c0_35, %c0_36] : memref<1x384x128xf32, #tpu.memory_space<vmem>>, vector<1x384x128xf32>
    %108 = vector.shape_cast %107 : vector<1x384x128xf32> to vector<384x128xf32>
    %109 = vector.shape_cast %106 : vector<384x128xf32> to vector<1x384x128xf32>
    tpu.vector_store %arg11[%c0_34, %c0_35, %c0_36], %109 {strides = array<i32>} : memref<1x384x128xf32, #tpu.memory_space<vmem>>, vector<1x384x128xf32>,
    return
  }
  func.func @transform_1(%arg0: i32, %arg1: i32) -> (i32, i32) {
    %c0_i32 = arith.constant 0 : i32
    %c0_i32_0 = arith.constant 0 : i32
    %c0_i32_1 = arith.constant 0 : i32
    return %c0_i32, %c0_i32_0 : i32, i32
  }
  func.func @transform_2(%arg0: i32, %arg1: i32) -> (i32, i32) {
    %c0_i32 = arith.constant 0 : i32
    %c0_i32_0 = arith.constant 0 : i32
    %c0_i32_1 = arith.constant 0 : i32
    return %c0_i32, %c0_i32_0 : i32, i32
  }
  func.func @transform_3(%arg0: i32, %arg1: i32) -> (i32, i32) {
    %c0_i32 = arith.constant 0 : i32
    %c0_i32_0 = arith.constant 0 : i32
    %c0_i32_1 = arith.constant 0 : i32
    return %c0_i32, %c0_i32_0 : i32, i32
  }
  func.func @transform_4(%arg0: i32, %arg1: i32) -> (i32, i32) {
    %c0_i32 = arith.constant 0 : i32
    %c0_i32_0 = arith.constant 0 : i32
    %c0_i32_1 = arith.constant 0 : i32
    return %c0_i32, %c0_i32_0 : i32, i32
  }
  func.func @transform_5(%arg0: i32, %arg1: i32) -> (i32, i32) {
    %c0_i32 = arith.constant 0 : i32
    %c0_i32_0 = arith.constant 0 : i32
    %c0_i32_1 = arith.constant 0 : i32
    return %c0_i32, %c0_i32_0 : i32, i32
  }
  func.func @transform_6(%arg0: i32, %arg1: i32) -> (i32, i32) {
    %c0_i32 = arith.constant 0 : i32
    %c0_i32_0 = arith.constant 0 : i32
    %c0_i32_1 = arith.constant 0 : i32
    return %c0_i32, %c0_i32_0 : i32, i32
  }
  func.func @transform_7(%arg0: i32, %arg1: i32) -> (i32, i32) {
    %c0_i32 = arith.constant 0 : i32
    %c0_i32_0 = arith.constant 0 : i32
    %c0_i32_1 = arith.constant 0 : i32
    return %c0_i32, %c0_i32_0 : i32, i32
  }
  func.func @transform_8(%arg0: i32, %arg1: i32) -> (i32, i32) {
    %c0_i32 = arith.constant 0 : i32
    %c0_i32_0 = arith.constant 0 : i32
    %c0_i32_1 = arith.constant 0 : i32
    return %c0_i32, %c0_i32_0 : i32, i32
  }
  func.func @transform_9(%arg0: i32, %arg1: i32) -> (i32, i32, i32) {
    %c0_i32 = arith.constant 0 : i32
    %c0_i32_0 = arith.constant 0 : i32
    return %arg0, %arg1, %c0_i32 : i32, i32, i32
  }
}

</mosaic_0001>

<bundles_post_ra>
// kernel: bottleneck_forward.1
= control target key start
LH: loop header
LB: loop body
LE: loop exit
PB: predicated region body
PF: predicated region fallthrough
CT: control target
= control target key end

     0   :  { %s4463_s30 = smov 0   ;;  %s4465_s10 = smov 0   ;;  %s7509_s0 = inlined_call_operand.vmem [shape: bf16[2,432,128], index: 0, kind: input, shape index: {}]   ;;  %s7510_s1 = inlined_call_operand.vmem [shape: bf16[128,128], index: 1, kind: input, shape index: {}]   ;;  %s7511_s2 = inlined_call_operand.vmem [shape: f32[1,128], index: 2, kind: input, shape index: {}]   ;;  %s7512_s3 = inlined_call_operand.vmem [shape: f32[9,128], index: 3, kind: input, shape index: {}]   ;;  %s7513_s4 = inlined_call_operand.vmem [shape: f32[1,128], index: 4, kind: input, shape index: {}]   ;;  %s7514_s5 = inlined_call_operand.vmem [shape: bf16[128,128], index: 5, kind: input, shape index: {}]   ;;  %s7515_s6 = inlined_call_operand.vmem [shape: f32[1,128], index: 6, kind: input, shape index: {}]   ;;  %s7516_s7 = inlined_call_operand.vmem [shape: bf16[128,128], index: 7, kind: input, shape index: {}]   ;;  %s7517_s8 = inlined_call_operand.vmem [shape: f32[1,128], index: 8, kind: input, shape index: {}]   ;;  %s7518_s9 = inlined_call_operand.vmem [shape: f32[2,384,128], index: 9, kind: output, shape index: {}]  }
   0x1   :  { %s4467_s11 = smov 0  }
   0x2 LB: > { %s31_s12 = sadd.s32 1, %s4404_s10  ;;  %p3686_p0 = scmp.ge.s32.totalorder %s4408_s11, 1  ;;  %s4408_s11 = sphi %s4467_s11, %s19_s11   ;;  %s4404_s10 = sphi %s4465_s10, %s8093_s10   ;;  %s4400_s30 = sphi %s4463_s30, %s8092_s30  }
   0x3   : > { %p33_p1 = scmp.ge.s32.totalorder %s31_s12, 2  ;;  %p267_p2 = scmp.lt.s32.totalorder %s4408_s11, 3 }
   0x5   : > { %s8095_s12 = smov (%p33_p1, %s31_s12), 0  ;;  %p268_p3 = pnand %p3686_p0, %p267_p2 }
   0x7   : > { %271 = sbr.rel (%p268_p3) target bundleno = 996 (0x3e4), region = 52 }
   0xe   : > { %p301_p4 = scmp.lt.s32.totalorder %s4400_s30, 1  ;;  %s3751_s13 = smul.u32 216, %s4400_s30 }
  0x10   : > { %s8097_s30 = smov (!%p301_p4, %s4400_s30), 1  ;;  %s329_s16 = scalar_lea.vmem %s7509_s0, %s3751_s13 }
  0x11   : > { %s4249_s17 = smul.u32 384, %s8097_s30  ;;  %v4484_v0 = vld [vmem:[%s329_s16] sm:$0xff]  ;;  %v4486_v1 = vld [vmem:[%s329_s16 + $0x8] sm:$0xff]  ;;  %v4488_v2 = vld [vmem:[%s329_s16 + $0x10] sm:$0xff] }
  0x12   : > { %7620 = vst [vmem:[#allocation7_spill] sm:$0xff] %v4486_v1  ;;  %7621 = vst [vmem:[#allocation8_spill] sm:$0xff] %v4488_v2  ;;  %v4490_v3 = vld [vmem:[%s329_s16 + $0x18] sm:$0xff]  ;;  %v4492_v4 = vld [vmem:[%s329_s16 + $0x20] sm:$0xff] }
  0x13   : > { %7622 = vst [vmem:[#allocation9_spill] sm:$0xff] %v4490_v3  ;;  %7623 = vst [vmem:[#allocation10_spill] sm:$0xff] %v4492_v4  ;;  %v4494_v5 = vld [vmem:[%s329_s16 + $0x28] sm:$0xff]  ;;  %s4499_s20 = scalar_lea.vmem %s7518_s9, %s4249_s17  ;;  %v4501_v6 = vld [vmem:[%s329_s16 + $0x30] sm:$0xff] }
  0x14   : > { %7624 = vst [vmem:[#allocation11_spill] sm:$0xff] %v4494_v5  ;;  %7625 = vst [vmem:[#allocation12_spill] sm:$0xff] %v4501_v6  ;;  %v4503_v7 = vld [vmem:[%s329_s16 + $0x38] sm:$0xff]  ;;  %v4505_v8 = vld [vmem:[%s329_s16 + $0x40] sm:$0xff] }
  0x15   : > { %7626 = vst [vmem:[#allocation13_spill] sm:$0xff] %v4503_v7  ;;  %7627 = vst [vmem:[#allocation14_spill] sm:$0xff] %v4505_v8  ;;  %v4507_v9 = vld [vmem:[%s329_s16 + $0x48] sm:$0xff]  ;;  %v4509_v10 = vld [vmem:[%s329_s16 + $0x50] sm:$0xff] }
  0x16   : > { %7628 = vst [vmem:[#allocation15_spill] sm:$0xff] %v4507_v9  ;;  %7629 = vst [vmem:[#allocation16_spill] sm:$0xff] %v4509_v10  ;;  %v4511_v11 = vld [vmem:[%s329_s16 + $0x58] sm:$0xff]  ;;  %v4513_v12 = vld [vmem:[%s329_s16 + $0x60] sm:$0xff] }
  0x17   : > { %7630 = vst [vmem:[#allocation17_spill] sm:$0xff] %v4511_v11  ;;  %7631 = vst [vmem:[#allocation18_spill] sm:$0xff] %v4513_v12  ;;  %v4515_v13 = vld [vmem:[%s329_s16 + $0x68] sm:$0xff]  ;;  %v4517_v14 = vld [vmem:[%s329_s16 + $0x70] sm:$0xff] }
  0x18   : > { %7632 = vst [vmem:[#allocation19_spill] sm:$0xff] %v4515_v13  ;;  %7633 = vst [vmem:[#allocation20_spill] sm:$0xff] %v4517_v14  ;;  %v4519_v15 = vld [vmem:[%s329_s16 + $0x78] sm:$0xff]  ;;  %v4521_v16 = vld [vmem:[%s329_s16 + $0x80] sm:$0xff] }
  0x19   : > { %7634 = vst [vmem:[#allocation21_spill] sm:$0xff] %v4519_v15  ;;  %7635 = vst [vmem:[#allocation22_spill] sm:$0xff] %v4521_v16  ;;  %v4523_v17 = vld [vmem:[%s329_s16 + $0x88] sm:$0xff]  ;;  %v4525_v18 = vld [vmem:[%s329_s16 + $0x90] sm:$0xff] }
  0x1a   : > { %7636 = vst [vmem:[#allocation23_spill] sm:$0xff] %v4523_v17  ;;  %7637 = vst [vmem:[#allocation24_spill] sm:$0xff] %v4525_v18  ;;  %v4527_v19 = vld [vmem:[%s329_s16 + $0x98] sm:$0xff]  ;;  %v4529_v20 = vld [vmem:[%s329_s16 + $0xa0] sm:$0xff] }
  0x1b   : > { %7638 = vst [vmem:[#allocation25_spill] sm:$0xff] %v4527_v19  ;;  %7639 = vst [vmem:[#allocation26_spill] sm:$0xff] %v4529_v20  ;;  %v4531_v21 = vld [vmem:[%s329_s16 + $0xa8] sm:$0xff]  ;;  %v4533_v22 = vld [vmem:[%s329_s16 + $0xb0] sm:$0xff] }
  0x1c   : > { %7640 = vst [vmem:[#allocation27_spill] sm:$0xff] %v4531_v21  ;;  %7641 = vst [vmem:[#allocation28_spill] sm:$0xff] %v4533_v22  ;;  %v4535_v23 = vld [vmem:[%s329_s16 + $0xb8] sm:$0xff]  ;;  %v4537_v24 = vld [vmem:[%s329_s16 + $0xc0] sm:$0xff] }
  0x1d   : > { %7642 = vst [vmem:[#allocation29_spill] sm:$0xff] %v4535_v23  ;;  %7643 = vst [vmem:[#allocation30_spill] sm:$0xff] %v4537_v24  ;;  %v4539_v25 = vld [vmem:[%s329_s16 + $0xc8] sm:$0xff]  ;;  %v4541_v26 = vld [vmem:[%s329_s16 + $0xd0] sm:$0xff] }
  0x1e   : > { %7644 = vst [vmem:[#allocation31_spill] sm:$0xff] %v4539_v25 }
  0x1f   : > { %423 = vsyncadd [#allocation3], 3456 }
  0x20   : > { %4396 = dma.done.wait [#allocation3], 3456 }
  0x21   : > { %4397 = vsyncadd [#allocation3], 4294963840  ;;  %v581_v27 = vunpack.c.l.bf16 %v4484_v0  ;;  %v4410_v28 = vmov 0.0   ;;  %vm4411_vm0 = vmmov 0   ;;  %v582_v29 = vunpack.c.h.bf16 %v4484_v0  ;;  %v4354_v35 = vld [vmem:[%s7510_s1] sm:$0xff]   ;;  %v4355_v37 = vld [vmem:[%s7510_s1 + $0x8] sm:$0xff]  }
  0x22   : > { %3853 = vmatprep.subr.bf16.mxu0 %v4410_v28  ;;  %3869 = vmatprep.mubr.msk.bf16.mxu0 %vm4411_vm0, %v4410_v28  ;;  %v583_v30 = vunpack.c.l.bf16 %v4486_v1  ;;  %v584_v31 = vunpack.c.h.bf16 %v4486_v1  ;;  %v4412_v32 = vmov 4   ;;  %v585_v36 = vunpack.c.l.bf16 %v4488_v2  ;;  %v4356_v38 = vld [vmem:[%s7510_s1 + $0x10] sm:$0xff]   ;;  %v4357_v41 = vld [vmem:[%s7510_s1 + $0x18] sm:$0xff]   ;;  %v4358_v43 = vld [vmem:[%s7510_s1 + $0x20] sm:$0xff]  }
  0x23   : > { %4277 = vset.pattern.permute.xlu0 %v4412_v32  ;;  %4288 = vset.pattern.permute.xlu1 %v4412_v32  ;;  %v4278_v33 = vpack.i.bf16 %v582_v29, %v581_v27  ;;  %v586_v39 = vunpack.c.h.bf16 %v4488_v2  ;;  %v587_v40 = vunpack.c.l.bf16 %v4490_v3  ;;  %v588_v44 = vunpack.c.h.bf16 %v4490_v3  ;;  %v4359_v45 = vld [vmem:[%s7510_s1 + $0x28] sm:$0xff]   ;;  %v4360_v46 = vld [vmem:[%s7510_s1 + $0x30] sm:$0xff]   ;;  %v4361_v51 = vld [vmem:[%s7510_s1 + $0x38] sm:$0xff]  }
  0x24   : > { %v4283_v34 = vpack.i.bf16 %v584_v31, %v583_v30  ;;  %3854 = vmatpush3.bf16.msra.mxu0 %v4354_v35  ;;  %1085 = vperm.xlu1 %4288, %v585_v36   ;;  %v590_v47 = vunpack.c.h.bf16 %v4492_v4  ;;  %v591_v48 = vunpack.c.l.bf16 %v4494_v5  ;;  %v589_v49 = vunpack.c.l.bf16 %v4492_v4 }
  0x25   : > { %4279 = vperm.xlu0 %4277, %v4278_v33   ;;  %3855 = vmatprep.subr.bf16.mxu0 %v4410_v28  ;;  %v4289_v42 = vpack.i.bf16 %v587_v40, %v586_v39  ;;  %v592_v52 = vunpack.c.h.bf16 %v4494_v5  ;;  %v593_v53 = vunpack.c.l.bf16 %v4501_v6  ;;  %v594_v54 = vunpack.c.h.bf16 %v4501_v6 }
  0x26   : > { %v4294_v50 = vpack.i.bf16 %v591_v48, %v590_v47  ;;  %v595_v55 = vunpack.c.l.bf16 %v4503_v7  ;;  %v596_v56 = vunpack.c.h.bf16 %v4503_v7  ;;  %v598_v58 = vunpack.c.h.bf16 %v4505_v8 }
  0x27   : > { %v599_v59 = vunpack.c.l.bf16 %v4507_v9  ;;  %v601_v61 = vunpack.c.l.bf16 %v4509_v10  ;;  %v597_v62 = vunpack.c.l.bf16 %v4505_v8  ;;  %v604_v63 = vunpack.c.h.bf16 %v4511_v11 }
  0x28   : > { %3856 = vmatpush3.bf16.msra.mxu0 %v4355_v37  ;;  %4290 = vperm.xlu1 %4288, %v4289_v42   ;;  %v4299_v57 = vpack.i.bf16 %v595_v55, %v594_v54  ;;  %v606_v27 = vunpack.c.h.bf16 %v4513_v12  ;;  %v607_v29 = vunpack.c.l.bf16 %v4515_v13  ;;  %v602_v31 = vunpack.c.h.bf16 %v4509_v10 }
  0x29   : > { %4284 = vperm.xlu0 %4277, %v4283_v34   ;;  %3857 = vmatprep.subr.bf16.mxu0 %v4410_v28  ;;  %v4304_v60 = vpack.i.bf16 %v599_v59, %v598_v58  ;;  %v603_v32 = vunpack.c.l.bf16 %v4511_v11  ;;  %v609_v34 = vunpack.c.l.bf16 %v4517_v14  ;;  %v605_v35 = vunpack.c.l.bf16 %v4513_v12 }
  0x2a   : > { %v4314_v30 = vpack.i.bf16 %v607_v29, %v606_v27  ;;  %v612_v36 = vunpack.c.h.bf16 %v4519_v15  ;;  %v608_v37 = vunpack.c.h.bf16 %v4515_v13  ;;  %v615_v39 = vunpack.c.l.bf16 %v4523_v17 }
  0x2b   : > { %v4309_v33 = vpack.i.bf16 %v603_v32, %v602_v31  ;;  %v610_v40 = vunpack.c.h.bf16 %v4517_v14  ;;  %v616_v47 = vunpack.c.h.bf16 %v4523_v17  ;;  %v622_v48 = vunpack.c.h.bf16 %v4529_v20  ;;  %v4362_v32 = vld [vmem:[%s7514_s5] sm:$0xff]  }
  0x2c   : > { %3858 = vmatpush3.bf16.msra.mxu0 %v4356_v38  ;;  %1105 = vperm.xlu1 %4288, %v589_v49   ;;  %v614_v38 = vunpack.c.h.bf16 %v4521_v16  ;;  %v623_v49 = vunpack.c.l.bf16 %v4531_v21  ;;  %v625_v54 = vunpack.c.l.bf16 %v4533_v22  ;;  %v621_v55 = vunpack.c.l.bf16 %v4529_v20 }
  0x2d   : > { %3859 = vmatprep.subr.bf16.mxu0 %v4410_v28  ;;  %1100 = vperm.xlu0 %4277, %v588_v44   ;;  %v617_v44 = vunpack.c.l.bf16 %v4525_v18  ;;  %v630_v58 = vunpack.c.h.bf16 %v4537_v24  ;;  %v631_v59 = vunpack.c.l.bf16 %v4539_v25  ;;  %v634_v27 = vunpack.c.h.bf16 %v4541_v26 }
  0x2e   : > { %v4324_v42 = vpack.i.bf16 %v615_v39, %v614_v38  ;;  %v632_v31 = vunpack.c.h.bf16 %v4539_v25  ;;  %3977 = vmatprep.subr.bf16.mxu1 %v4362_v32  ;;  %v4367_v38 = vld [vmem:[%s7514_s5 + $0x28] sm:$0xff]   ;;  %vm2955_vm3 = vsmask.f32 3328 }
  0x2f   : > { %3978 = vmatpush3.bf16.msra.mxu1 %v4362_v32 }
  0x30   : > { %3860 = vmatpush3.bf16.msra.mxu0 %v4357_v41  ;;  %1120 = vperm.xlu1 %4288, %v592_v52   ;;  %v611_v41 = vunpack.c.l.bf16 %v4519_v15  ;;  %v619_v52 = vunpack.c.l.bf16 %v4527_v19 }
  0x31   : > { %3861 = vmatprep.subr.bf16.mxu0 %v4410_v28  ;;  %4295 = vperm.xlu0 %4277, %v4294_v50   ;;  %v4334_v50 = vpack.i.bf16 %v623_v49, %v622_v48 }
  0x34   : > { %3862 = vmatpush3.bf16.msra.mxu0 %v4358_v43  ;;  %4300 = vperm.xlu1 %4288, %v4299_v57   ;;  %v4319_v43 = vpack.i.bf16 %v611_v41, %v610_v40  ;;  %v624_v57 = vunpack.c.h.bf16 %v4531_v21  ;;  %v4368_v40 = vld [vmem:[%s7514_s5 + $0x30] sm:$0xff]  }
  0x35   : > { %3863 = vmatprep.subr.bf16.mxu0 %v4410_v28  ;;  %1125 = vperm.xlu0 %4277, %v593_v53  }
  0x38   : > { %3864 = vmatpush3.bf16.msra.mxu0 %v4359_v45  ;;  %1145 = vperm.xlu1 %4288, %v597_v62   ;;  %v613_v45 = vunpack.c.l.bf16 %v4521_v16  ;;  %v4344_v62 = vpack.i.bf16 %v631_v59, %v630_v58 }
  0x39   : > { %3865 = vmatprep.subr.bf16.mxu0 %v4410_v28  ;;  %1140 = vperm.xlu0 %4277, %v596_v56   ;;  %v628_v56 = vunpack.c.h.bf16 %v4535_v23 }
  0x3c   : > { %3866 = vmatpush3.bf16.msra.mxu0 %v4360_v46  ;;  %v620_v46 = vunpack.c.h.bf16 %v4527_v19 }
  0x3d   : > { %3867 = vmatprep.subr.bf16.mxu0 %v4410_v28  ;;  %4305 = vperm.xlu0 %4277, %v4304_v60   ;;  %v626_v60 = vunpack.c.h.bf16 %v4533_v22 }
  0x40   : > { %3868 = vmatpush3.bf16.msra.mxu0 %v4361_v51  ;;  %v618_v51 = vunpack.c.h.bf16 %v4525_v18 }
  0x41   : > { %1165 = vperm.xlu0 %4277, %v601_v61   ;;  %v627_v61 = vunpack.c.l.bf16 %v4535_v23 }
  0x42   : > { %v4329_v53 = vpack.i.bf16 %v619_v52, %v618_v51 }
  0x43   : > { %3870 = vmatmul.mubr.bf16.vlgmr.msra.gmra.mrb[0].mxu0 %v4484_v0  ;;  %v600_v0 = vunpack.c.h.bf16 %v4507_v9 }
  0x44   : > { %3873 = vmatprep.mubr.msk.bf16.mxu0 %vm4411_vm0, %v4410_v28 }
  0x45   : > { %1180 = vperm.xlu0 %4277, %v604_v63   ;;  %1160 = vperm.xlu1 %4288, %v600_v0   ;;  %v4339_v63 = vpack.i.bf16 %v627_v61, %v626_v60  ;;  %v633_v0 = vunpack.c.l.bf16 %v4541_v26 }
  0x47   : > { %v4349_v29 = vpack.i.bf16 %v634_v27, %v633_v0  ;;  %v4783_v0 = vld [vmem:[%s7511_s2] ss:$0 sm:$0xff] }
  0x49   : > { %4315 = vperm.xlu0 %4277, %v4314_v30   ;;  %4310 = vperm.xlu1 %4288, %v4309_v33   ;;  %v629_v30 = vunpack.c.l.bf16 %v4537_v24  ;;  %v4363_v33 = vld [vmem:[%s7514_s5 + $0x8] sm:$0xff]  }
  0x4a   : > { %3979 = vmatprep.subr.bf16.mxu1 %v4363_v33 }
  0x4b   : > { %3874 = vmatmul.mubr.bf16.gmra.mrb[4].mxu0 %v4486_v1  ;;  %3980 = vmatpush3.bf16.msra.mxu1 %v4363_v33 }
  0x4c   : > { %3877 = vmatprep.mubr.msk.bf16.mxu0 %vm4411_vm0, %v4410_v28 }
  0x4d   : > { %1205 = vperm.xlu0 %4277, %v609_v34   ;;  %1185 = vperm.xlu1 %4288, %v605_v35   ;;  %v4364_v34 = vld [vmem:[%s7514_s5 + $0x10] sm:$0xff]   ;;  %v4365_v35 = vld [vmem:[%s7514_s5 + $0x18] sm:$0xff]  }
  0x4e   : > { %3981 = vmatprep.subr.bf16.mxu1 %v4364_v34 }
  0x4f   : > { %3982 = vmatpush3.bf16.msra.mxu1 %v4364_v34 }
  0x50   : > { %3983 = vmatprep.subr.bf16.mxu1 %v4365_v35 }
  0x51   : > { %1220 = vperm.xlu0 %4277, %v612_v36   ;;  %1200 = vperm.xlu1 %4288, %v608_v37   ;;  %v4366_v36 = vld [vmem:[%s7514_s5 + $0x20] sm:$0xff]  }
  0x53   : > { %3878 = vmatmul.mubr.bf16.gmra.mrb[8].mxu0 %v4488_v2  ;;  %3984 = vmatpush3.bf16.msra.mxu1 %v4365_v35 }
  0x54   : > { %3881 = vmatprep.mubr.msk.bf16.mxu0 %vm4411_vm0, %v4410_v28  ;;  %3985 = vmatprep.subr.bf16.mxu1 %v4366_v36 }
  0x55   : > { %4325 = vperm.xlu0 %4277, %v4324_v42   ;;  %4320 = vperm.xlu1 %4288, %v4319_v43  }
  0x57   : > { %3986 = vmatpush3.bf16.msra.mxu1 %v4366_v36 }
  0x58   : > { %3987 = vmatprep.subr.bf16.mxu1 %v4367_v38 }
  0x59   : > { %1245 = vperm.xlu0 %4277, %v617_v44   ;;  %1225 = vperm.xlu1 %4288, %v613_v45   ;;  %v4369_v44 = vld [vmem:[%s7514_s5 + $0x38] sm:$0xff]  }
  0x5b   : > { %3882 = vmatmul.mubr.bf16.gmra.mrb[12].mxu0 %v4490_v3  ;;  %3988 = vmatpush3.bf16.msra.mxu1 %v4367_v38 }
  0x5c   : > { %3885 = vmatprep.mubr.msk.bf16.mxu0 %vm4411_vm0, %v4410_v28  ;;  %3989 = vmatprep.subr.bf16.mxu1 %v4368_v40 }
  0x5d   : > { %1260 = vperm.xlu0 %4277, %v620_v46   ;;  %1240 = vperm.xlu1 %4288, %v616_v47  }
  0x5f   : > { %3990 = vmatpush3.bf16.msra.mxu1 %v4368_v40 }
  0x60   : > { %3991 = vmatprep.subr.bf16.mxu1 %v4369_v44 }
  0x61   : > { %4335 = vperm.xlu0 %4277, %v4334_v50   ;;  %4330 = vperm.xlu1 %4288, %v4329_v53  }
  0x63   : > { %3886 = vmatmul.mubr.bf16.gmra.mrb[16].mxu0 %v4492_v4  ;;  %3992 = vmatpush3.bf16.msra.mxu1 %v4369_v44  ;;  %v1607_v44 = vld [vmem:[%s7512_s3] sm:$0xff] }
  0x64   : > { %3889 = vmatprep.mubr.msk.bf16.mxu0 %vm4411_vm0, %v4410_v28 }
  0x65   : > { %1285 = vperm.xlu0 %4277, %v625_v54   ;;  %1265 = vperm.xlu1 %4288, %v621_v55  }
  0x69   : > { %1300 = vperm.xlu0 %4277, %v628_v56   ;;  %1280 = vperm.xlu1 %4288, %v624_v57  }
  0x6b   : > { %3890 = vmatmul.mubr.bf16.gmra.mrb[20].mxu0 %v4494_v5 }
  0x6c   : > { %3893 = vmatprep.mubr.msk.bf16.mxu0 %vm4411_vm0, %v4410_v28 }
  0x6d   : > { %4345 = vperm.xlu0 %4277, %v4344_v62   ;;  %4340 = vperm.xlu1 %4288, %v4339_v63   ;;  %v1441_v62 = vlaneseq }
  0x6f   : > { %v4785_v27 = vshrl.u32 %v1441_v62, 7 }
  0x71   : > { %4350 = vperm.xlu0 %4277, %v4349_v29   ;;  %1305 = vperm.xlu1 %4288, %v629_v30   ;;  %v1611_v33 = vsub.s32 0, %v4785_v27  ;;  %v1763_v34 = vsub.s32 2, %v4785_v27  ;;  %vm1443_vm1 = vcmp.lt.s32.totalorder %v4785_v27, 7  ;;  %vm1552_vm2 = vcmp.lt.s32.totalorder %v4785_v27, 6 }
  0x73   : > { %3894 = vmatmul.mubr.bf16.gmra.mrb[24].mxu0 %v4501_v6 }
  0x74   : > { %3897 = vmatprep.mubr.msk.bf16.mxu0 %vm4411_vm0, %v4410_v28 }
  0x75   : > { %1320 = vperm.xlu1 %4288, %v632_v31  }
  0x7b   : > { %3898 = vmatmul.mubr.bf16.gmra.mrb[28].mxu0 %v4503_v7 }
  0x7c   : > { %3901 = vmatprep.mubr.msk.bf16.mxu0 %vm4411_vm0, %v4410_v28 }
  0x83   : > { %3902 = vmatmul.mubr.bf16.gmra.mrb[32].mxu0 %v4505_v8 }
  0x84   : > { %3905 = vmatprep.mubr.msk.bf16.mxu0 %vm4411_vm0, %v4410_v28 }
  0x8b   : > { %3906 = vmatmul.mubr.bf16.gmra.mrb[36].mxu0 %v4507_v9 }
  0x8c   : > { %3909 = vmatprep.mubr.msk.bf16.mxu0 %vm4411_vm0, %v4410_v28 }
  0x93   : > { %3910 = vmatmul.mubr.bf16.gmra.mrb[40].mxu0 %v4509_v10 }
  0x94   : > { %3913 = vmatprep.mubr.msk.bf16.mxu0 %vm4411_vm0, %v4410_v28 }
  0x9b   : > { %3914 = vmatmul.mubr.bf16.gmra.mrb[44].mxu0 %v4511_v11 }
  0x9c   : > { %3917 = vmatprep.mubr.msk.bf16.mxu0 %vm4411_vm0, %v4410_v28 }
  0xa3   : > { %3918 = vmatmul.mubr.bf16.gmra.mrb[48].mxu0 %v4513_v12  ;;  %v4730_v46 = vpop.permute.xlu1 %1085 }
  0xa4   : > { %3921 = vmatprep.mubr.msk.bf16.mxu0 %vm4411_vm0, %v4410_v28  ;;  %v4700_v37 = vpop.permute.xlu0 %4279 }
  0xa5   : > { %v4281_v40 = vunpack.i.l.bf16 %v4700_v37 }
  0xa7   : > { %v4737_v48 = vpop.permute.xlu1 %4290 }
  0xa8   : > { %v4705_v39 = vpop.permute.xlu0 %4284 }
  0xab   : > { %3922 = vmatmul.mubr.bf16.gmra.mrb[52].mxu0 %v4515_v13  ;;  %v4741_v50 = vpop.permute.xlu1 %1105 }
  0xac   : > { %3925 = vmatprep.mubr.msk.bf16.mxu0 %vm4411_vm0, %v4410_v28  ;;  %v4713_v41 = vpop.permute.xlu0 %1100 }
  0xaf   : > { %v4746_v51 = vpop.permute.xlu1 %1120 }
  0xb0   : > { %v4715_v42 = vpop.permute.xlu0 %4295 }
  0xb3   : > { %3926 = vmatmul.mubr.bf16.gmra.mrb[56].mxu0 %v4517_v14  ;;  %v4750_v53 = vpop.permute.xlu1 %4300 }
  0xb4   : > { %3929 = vmatprep.mubr.msk.bf16.mxu0 %vm4411_vm0, %v4410_v28  ;;  %v4720_v43 = vpop.permute.xlu0 %1125 }
  0xb7   : > { %v4757_v55 = vpop.permute.xlu1 %1145 }
  0xb8   : > { %v4726_v45 = vpop.permute.xlu0 %1140 }
  0xbb   : > { %3930 = vmatmul.mubr.bf16.gmra.mrb[60].mxu0 %v4519_v15 }
  0xbc   : > { %3933 = vmatprep.mubr.msk.bf16.mxu0 %vm4411_vm0, %v4410_v28  ;;  %v4732_v47 = vpop.permute.xlu0 %4305 }
  0xc0   : > { %v4739_v49 = vpop.permute.xlu0 %1165 }
  0xc3   : > { %3934 = vmatmul.mubr.bf16.gmra.mrb[64].mxu0 %v4521_v16 }
  0xc4   : > { %3937 = vmatprep.mubr.msk.bf16.mxu0 %vm4411_vm0, %v4410_v28  ;;  %v4748_v52 = vpop.permute.xlu0 %1180  ;;  %v4762_v57 = vpop.permute.xlu1 %1160 }
  0xc5   : > { %7645 = vst [vmem:[#allocation32_spill] sm:$0xff] %v4748_v52 }
  0xc8   : > { %v4753_v54 = vpop.permute.xlu0 %4315  ;;  %v4768_v59 = vpop.permute.xlu1 %4310 }
  0xc9   : > { %7646 = vst [vmem:[#allocation33_spill] sm:$0xff] %v4753_v54 }
  0xcb   : > { %3938 = vmatmul.mubr.bf16.gmra.mrb[68].mxu0 %v4523_v17 }
  0xcc   : > { %3941 = vmatprep.mubr.msk.bf16.mxu0 %vm4411_vm0, %v4410_v28  ;;  %v4759_v56 = vpop.permute.xlu0 %1205  ;;  %v4775_v61 = vpop.permute.xlu1 %1185 }
  0xcd   : > { %7647 = vst [vmem:[#allocation34_spill] sm:$0xff] %v4759_v56  ;;  %7650 = vst [vmem:[#allocation37_spill] sm:$0xff] %v4775_v61 }
  0xd0   : > { %v4766_v58 = vpop.permute.xlu0 %1220  ;;  %v4787_v29 = vpop.permute.xlu1 %1200 }
  0xd1   : > { %7648 = vst [vmem:[#allocation35_spill] sm:$0xff] %v4766_v58  ;;  %7652 = vst [vmem:[#allocation39_spill] sm:$0xff] %v4787_v29 }
  0xd3   : > { %3942 = vmatmul.mubr.bf16.gmra.mrb[72].mxu0 %v4525_v18 }
  0xd4   : > { %3945 = vmatprep.mubr.msk.bf16.mxu0 %vm4411_vm0, %v4410_v28  ;;  %v4773_v60 = vpop.permute.xlu0 %4325 }
  0xd5   : > { %7649 = vst [vmem:[#allocation36_spill] sm:$0xff] %v4773_v60 }
  0xd8   : > { %v4778_v63 = vpop.permute.xlu0 %1245 }
  0xd9   : > { %7651 = vst [vmem:[#allocation38_spill] sm:$0xff] %v4778_v63 }
  0xdb   : > { %3946 = vmatmul.mubr.bf16.gmra.mrb[76].mxu0 %v4527_v19 }
  0xdc   : > { %3949 = vmatprep.mubr.msk.bf16.mxu0 %vm4411_vm0, %v4410_v28  ;;  %v4799_v62 = vpop.permute.xlu0 %1260 }
  0xdd   : > { %7653 = vst [vmem:[#allocation40_spill] sm:$0xff] %v4799_v62 }
  0xe3   : > { %3950 = vmatmul.mubr.bf16.gmra.mrb[80].mxu0 %v4529_v20  ;;  %v4813_v20 = vrot.slane %v1607_v44, %v1763_v34 }
  0xe4   : > { %3953 = vmatprep.mubr.msk.bf16.mxu0 %vm4411_vm0, %v4410_v28 }
  0xeb   : > { %3954 = vmatmul.mubr.bf16.gmra.mrb[84].mxu0 %v4531_v21 }
  0xec   : > { %3957 = vmatprep.mubr.msk.bf16.mxu0 %vm4411_vm0, %v4410_v28 }
  0xf3   : > { %3958 = vmatmul.mubr.bf16.gmra.mrb[88].mxu0 %v4533_v22  ;;  %v4809_v22 = vrot.slane %v1607_v44, %v1611_v33 }
  0xf4   : > { %3961 = vmatprep.mubr.msk.bf16.mxu0 %vm4411_vm0, %v4410_v28 }
  0xfb   : > { %3962 = vmatmul.mubr.bf16.gmra.mrb[92].mxu0 %v4535_v23  ;;  %v4807_v23 = vpop.permute.xlu1 %4320 }
  0xfc   : > { %3965 = vmatprep.mubr.msk.bf16.mxu0 %vm4411_vm0, %v4410_v28  ;;  %7654 = vst [vmem:[#allocation41_spill] sm:$0xff] %v4807_v23 }
 0x103   : > { %3966 = vmatmul.mubr.bf16.gmra.mrb[96].mxu0 %v4537_v24  ;;  %v2063_v24 = vsub.s32 5, %v4785_v27 }
 0x104   : > { %3969 = vmatprep.mubr.msk.bf16.mxu0 %vm4411_vm0, %v4410_v28 }
 0x10b   : > { %3970 = vmatmul.mubr.bf16.gmra.mrb[100].mxu0 %v4539_v25  ;;  %v2163_v25 = vsub.s32 6, %v4785_v27 }
 0x10c   : > { %3973 = vmatprep.mubr.msk.bf16.mxu0 %vm4411_vm0, %v4410_v28 }
 0x10d   : > { %v4826_v13 = vrot.slane %v1607_v44, %v2163_v25 }
 0x113   : > { %3974 = vmatmul.mubr.bf16.gmra.mrb[104].mxu0 %v4541_v26  ;;  %v1663_v26 = vsub.s32 1, %v4785_v27 }
 0x115   : > { %v4811_v21 = vrot.slane %v1607_v44, %v1663_v26 }
 0x116   : > { %v740_v30 = vpop.f32.mrb[0].mxu0 }
 0x117   : > { %v741_v28 = vadd.f32 %v4783_v0, %v740_v30  ;;  %v3871_v31 = vpop.f32.mrb[1].mxu0  ;;  %v4282_v30 = vunpack.i.h.bf16 %v4700_v37  ;;  %v2263_v37 = vsub.s32 7, %v4785_v27 }
 0x118   : > { %v743_v32 = vpop.f32.mrb[2].mxu0  ;;  %v1863_v31 = vsub.s32 3, %v4785_v27 }
 0x119   : > { %v955_v35 = vmax.f32 %v741_v28, 0.0  ;;  %v744_v36 = vadd.f32 %v4783_v0, %v743_v32  ;;  %v3872_v38 = vpop.f32.mrb[3].mxu0  ;;  %v1963_v28 = vsub.s32 4, %v4785_v27  ;;  %v4836_v33 = vrot.slane %v1607_v44, %v2263_v37 }
 0x11a   : > { %v4820_v16 = vrot.slane %v1607_v44, %v1863_v31 }
 0x11b   : > { %v1009_v32 = vmin.f32 %v955_v35, 6.0  ;;  %v956_v38 = vmax.f32 %v744_v36, 0.0  ;;  %v4287_v35 = vunpack.i.h.bf16 %v4705_v39  ;;  %v4286_v36 = vunpack.i.l.bf16 %v4705_v39 }
 0x11c   : > { %v4822_v15 = vrot.slane %v1607_v44, %v1963_v28 }
 0x11d   : > { %v1010_v19 = vmin.f32 %v956_v38, 6.0  ;;  %v4816_v18 = vmul.f32 %v4281_v40, %v1009_v32  ;;  %v4829_v32 = vrot.slane %v1607_v44, %v2063_v24  ;;  %v4831_v38 = vpop.permute.xlu0 %4335  ;;  %v4840_v24 = vpop.permute.xlu1 %1225 }
 0x11e   : > { %v748_v17 = vpop.f32.mrb[4].mxu0  ;;  %7656 = vst [vmem:[#allocation43_spill] sm:$0xff] %v4831_v38  ;;  %7657 = vst [vmem:[#allocation44_spill] sm:$0xff] %v4840_v24 }
 0x11f   : > { %7655 = vst [vmem:[#allocation42_spill] sm:$0xff] %v4816_v18  ;;  %v1334_v34 = vmul.f32 %v4282_v30, %v1010_v19  ;;  %v3875_v14 = vpop.f32.mrb[5].mxu0  ;;  %v749_v31 = vadd.f32 %v4783_v0, %v748_v17  ;;  %v7658_v12 = vrot.slane %v4816_v18, 1 }
 0x120   : > { %v751_v28 = vpop.f32.mrb[6].mxu0  ;;  %v7557_v14 = vrot.slane %v4816_v18, 2 }
 0x121   : > { %v1388_v26 = vrot.slane %v1334_v34, 1  ;;  %v1499_v19 = vrot.slane %v1334_v34, 2  ;;  %v752_v25 = vadd.f32 %v4783_v0, %v751_v28  ;;  %v3876_v30 = vpop.f32.mrb[7].mxu0  ;;  %v957_v40 = vmax.f32 %v749_v31, 0.0  ;;  %v4861_v7 = vpop.permute.xlu0 %1285 }
 0x122   : > { %v1613_v31 = vmul.f32 %v4809_v22, %v4816_v18  ;;  %7659 = vst [vmem:[#allocation45_spill] sm:$0xff] %v4861_v7 }
 0x123   : > { %v1496_v44 = vsel %vm1443_vm1, %v7658_v12, %v1388_v26  ;;  %v1605_v37 = vsel %vm1552_vm2, %v7557_v14, %v1499_v19  ;;  %v958_v28 = vmax.f32 %v752_v25, 0.0  ;;  %v1011_v39 = vmin.f32 %v957_v40, 6.0  ;;  %v4868_v12 = vpop.permute.xlu1 %1240 }
 0x124   : > { %v1665_v11 = vmul.f32 %v4811_v21, %v1496_v44  ;;  %v1765_v14 = vmul.f32 %v4813_v20, %v1605_v37  ;;  %7660 = vst [vmem:[#allocation46_spill] sm:$0xff] %v4868_v12 }
 0x125   : > { %v1012_v10 = vmin.f32 %v958_v28, 6.0  ;;  %v1335_v30 = vmul.f32 %v4286_v36, %v1011_v39 }
 0x126   : > { %v1713_v25 = vadd.f32 %v1665_v11, %v1613_v31  ;;  %v756_v6 = vpop.f32.mrb[8].mxu0 }
 0x127   : > { %v1336_v44 = vmul.f32 %v4287_v35, %v1012_v10  ;;  %v757_v40 = vadd.f32 %v4783_v0, %v756_v6  ;;  %v3879_v17 = vpop.f32.mrb[9].mxu0  ;;  %v1389_v4 = vrot.slane %v1335_v30, 1  ;;  %v1500_v3 = vrot.slane %v1335_v30, 2  ;;  %v4884_v6 = vpop.permute.xlu0 %1300 }
 0x128   : > { %v1813_v8 = vadd.f32 %v1765_v14, %v1713_v25  ;;  %v759_v11 = vpop.f32.mrb[10].mxu0  ;;  %v1614_v25 = vmul.f32 %v4809_v22, %v1334_v34  ;;  %7661 = vst [vmem:[#allocation47_spill] sm:$0xff] %v4884_v6 }
 0x129   : > { %v1390_v36 = vrot.slane %v1336_v44, 1  ;;  %v1501_v39 = vrot.slane %v1336_v44, 2  ;;  %v1865_v31 = vmul.f32 %v4820_v16, %v1336_v44  ;;  %v3880_v10 = vpop.f32.mrb[11].mxu0  ;;  %v1495_v35 = vsel %vm1443_vm1, %v1388_v26, %v1389_v4 }
 0x12a   : > { %v1604_v17 = vsel %vm1552_vm2, %v1499_v19, %v1500_v3  ;;  %v959_v5 = vmax.f32 %v757_v40, 0.0  ;;  %v760_v14 = vadd.f32 %v4783_v0, %v759_v11  ;;  %v1666_v10 = vmul.f32 %v4811_v21, %v1495_v35 }
 0x12b   : > { %v1494_v28 = vsel %vm1443_vm1, %v1389_v4, %v1390_v36  ;;  %v1603_v9 = vsel %vm1552_vm2, %v1500_v3, %v1501_v39  ;;  %v1615_v26 = vmul.f32 %v4809_v22, %v1335_v30  ;;  %v1913_v19 = vadd.f32 %v1865_v31, %v1813_v8  ;;  %v4890_v4 = vpop.permute.xlu1 %4330 }
 0x12c   : > { %v1667_v37 = vmul.f32 %v4811_v21, %v1494_v28  ;;  %v1013_v40 = vmin.f32 %v959_v5, 6.0  ;;  %v1766_v11 = vmul.f32 %v4813_v20, %v1604_v17  ;;  %v1714_v2 = vadd.f32 %v1666_v10, %v1614_v25  ;;  %7662 = vst [vmem:[#allocation48_spill] sm:$0xff] %v4890_v4 }
 0x12d   : > { %v960_v34 = vmax.f32 %v760_v14, 0.0  ;;  %v1767_v3 = vmul.f32 %v4813_v20, %v1603_v9  ;;  %v1616_v17 = vmul.f32 %v4809_v22, %v1336_v44 }
 0x12e   : > { %v1715_v18 = vadd.f32 %v1667_v37, %v1615_v26  ;;  %v1337_v35 = vmul.f32 %v4730_v46, %v1013_v40  ;;  %v764_v6 = vpop.f32.mrb[12].mxu0  ;;  %v1814_v7 = vadd.f32 %v1766_v11, %v1714_v2  ;;  %v7663_v46 = vunpack.i.l.bf16 %v4737_v48 }
 0x12f   : > { %v1014_v28 = vmin.f32 %v960_v34, 6.0  ;;  %v765_v5 = vadd.f32 %v4783_v0, %v764_v6  ;;  %v3883_v8 = vpop.f32.mrb[13].mxu0  ;;  %v4904_v6 = vpop.permute.xlu0 %4345 }
 0x130   : > { %v1815_v14 = vadd.f32 %v1767_v3, %v1715_v18  ;;  %v1391_v25 = vrot.slane %v1337_v35, 1  ;;  %v1502_v10 = vrot.slane %v1337_v35, 2  ;;  %v767_v37 = vpop.f32.mrb[14].mxu0  ;;  %v1866_v9 = vmul.f32 %v4820_v16, %v1337_v35  ;;  %7664 = vst [vmem:[#allocation49_spill] sm:$0xff] %v4904_v6 }
 0x131   : > { %v4901_v26 = vmul.f32 %v7663_v46, %v1014_v28  ;;  %v961_v40 = vmax.f32 %v765_v5, 0.0  ;;  %v768_v2 = vadd.f32 %v4783_v0, %v767_v37  ;;  %v3884_v11 = vpop.f32.mrb[15].mxu0  ;;  %v1617_v44 = vmul.f32 %v4809_v22, %v1337_v35 }
 0x132   : > { %v1493_v34 = vsel %vm1443_vm1, %v1390_v36, %v1391_v25  ;;  %v1602_v18 = vsel %vm1552_vm2, %v1501_v39, %v1502_v10  ;;  %v1914_v28 = vadd.f32 %v1866_v9, %v1814_v7 }
 0x133   : > { %v1668_v8 = vmul.f32 %v4811_v21, %v1493_v34  ;;  %v1965_v5 = vmul.f32 %v4822_v15, %v1493_v34  ;;  %v1768_v46 = vmul.f32 %v4813_v20, %v1602_v18  ;;  %v7574_v11 = vrot.slane %v4901_v26, 1 }
 0x134   : > { %v7575_v36 = vrot.slane %v4901_v26, 2  ;;  %v1867_v39 = vmul.f32 %v4820_v16, %v4901_v26  ;;  %v1015_v35 = vmin.f32 %v961_v40, 6.0  ;;  %v962_v30 = vmax.f32 %v768_v2, 0.0 }
 0x135   : > { %v1716_v1 = vadd.f32 %v1668_v8, %v1616_v17  ;;  %v2013_v3 = vadd.f32 %v1965_v5, %v1913_v19  ;;  %v4922_v7 = vmul.f32 %v4809_v22, %v4901_v26  ;;  %v1492_v37 = vsel %vm1443_vm1, %v1391_v25, %v7574_v11 }
 0x136   : > { %v4924_v9 = vadd.f32 %v1867_v39, %v1815_v14  ;;  %v772_v34 = vpop.f32.mrb[16].mxu0  ;;  %v1601_v17 = vsel %vm1552_vm2, %v1502_v10, %v7575_v36  ;;  %v7665_v19 = vunpack.i.h.bf16 %v4737_v48  ;;  %v1016_v8 = vmin.f32 %v962_v30, 6.0 }
 0x137   : > { %v1816_v40 = vadd.f32 %v1768_v46, %v1716_v1  ;;  %v773_v14 = vadd.f32 %v4783_v0, %v772_v34  ;;  %v3887_v5 = vpop.f32.mrb[17].mxu0  ;;  %v1669_v31 = vmul.f32 %v4811_v21, %v1492_v37  ;;  %v1769_v6 = vmul.f32 %v4813_v20, %v1601_v17 }
 0x138   : > { %v4936_v2 = vmul.f32 %v7665_v19, %v1015_v35  ;;  %v775_v39 = vpop.f32.mrb[18].mxu0  ;;  %v1966_v25 = vmul.f32 %v4822_v15, %v1492_v37  ;;  %v2065_v11 = vmul.f32 %v4829_v32, %v1602_v18  ;;  %v4946_v48 = vmul.f32 %v4713_v41, %v1016_v8 }
 0x139   : > { %v963_v10 = vmax.f32 %v773_v14, 0.0  ;;  %v3888_v30 = vpop.f32.mrb[19].mxu0  ;;  %v2066_v46 = vmul.f32 %v4829_v32, %v1601_v17  ;;  %v776_v34 = vadd.f32 %v4783_v0, %v775_v39  ;;  %v1717_v37 = vadd.f32 %v1669_v31, %v1617_v44 }
 0x13a   : > { %v1868_v1 = vmul.f32 %v4820_v16, %v4936_v2  ;;  %v1619_v35 = vmul.f32 %v4809_v22, %v4936_v2  ;;  %v7578_v19 = vrot.slane %v4936_v2, 1  ;;  %v1394_v18 = vrot.slane %v4946_v48, 1 }
 0x13b   : > { %v1505_v5 = vrot.slane %v4946_v48, 2  ;;  %v1869_v41 = vmul.f32 %v4820_v16, %v4946_v48  ;;  %v7579_v8 = vrot.slane %v4936_v2, 2  ;;  %v1017_v14 = vmin.f32 %v963_v10, 6.0 }
 0x13c   : > { %v964_v30 = vmax.f32 %v776_v34, 0.0  ;;  %v1817_v17 = vadd.f32 %v1769_v6, %v1717_v37  ;;  %v1916_v36 = vadd.f32 %v1868_v1, %v1816_v40  ;;  %v4962_v39 = vsel %vm1443_vm1, %v7578_v19, %v1394_v18 }
 0x13d   : > { %v4968_v31 = vsel %vm1552_vm2, %v7579_v8, %v1505_v5  ;;  %v2014_v44 = vadd.f32 %v1966_v25, %v1914_v28  ;;  %v2113_v38 = vadd.f32 %v2065_v11, %v2013_v3  ;;  %v1620_v10 = vmul.f32 %v4809_v22, %v4946_v48 }
 0x13e   : > { %v1018_v34 = vmin.f32 %v964_v30, 6.0  ;;  %v4973_v6 = vmul.f32 %v4741_v50, %v1017_v14  ;;  %v780_v40 = vpop.f32.mrb[20].mxu0  ;;  %v1671_v1 = vmul.f32 %v4811_v21, %v4962_v39  ;;  %v1771_v8 = vmul.f32 %v4813_v20, %v4968_v31 }
 0x13f   : > { %v781_v37 = vadd.f32 %v4783_v0, %v780_v40  ;;  %v3891_v19 = vpop.f32.mrb[21].mxu0  ;;  %v1917_v62 = vadd.f32 %v1869_v41, %v1817_v17  ;;  %v1968_v3 = vmul.f32 %v4822_v15, %v4962_v39  ;;  %v2068_v14 = vmul.f32 %v4829_v32, %v4968_v31 }
 0x140   : > { %v7584_v28 = vrot.slane %v4973_v6, 1  ;;  %v4986_v50 = vmul.f32 %v4809_v22, %v4973_v6  ;;  %v783_v25 = vpop.f32.mrb[22].mxu0  ;;  %v4992_v19 = vmul.f32 %v4820_v16, %v4973_v6  ;;  %v7666_v41 = vunpack.i.l.bf16 %v4715_v42 }
 0x141   : > { %v965_v17 = vmax.f32 %v781_v37, 0.0  ;;  %v784_v40 = vadd.f32 %v4783_v0, %v783_v25  ;;  %v3892_v11 = vpop.f32.mrb[23].mxu0  ;;  %v7667_v63 = vrot.slane %v4973_v6, 2  ;;  %v1719_v60 = vadd.f32 %v1671_v1, %v1619_v35 }
 0x142   : > { %v4996_v30 = vmul.f32 %v7666_v41, %v1018_v34  ;;  %v1489_v4 = vsel %vm1443_vm1, %v1394_v18, %v7584_v28  ;;  %v2016_v24 = vadd.f32 %v1968_v3, %v1916_v36  ;;  %v5011_v34 = vmul.f32 %v4826_v13, %v4973_v6 }
 0x143   : > { %v5007_v12 = vsel %vm1552_vm2, %v1505_v5, %v7667_v63  ;;  %v1019_v41 = vmin.f32 %v965_v17, 6.0  ;;  %v966_v63 = vmax.f32 %v784_v40, 0.0  ;;  %v1672_v35 = vmul.f32 %v4811_v21, %v1489_v4 }
 0x144   : > { %v1396_v37 = vrot.slane %v4996_v30, 1  ;;  %v1871_v25 = vmul.f32 %v4820_v16, %v4996_v30  ;;  %v5019_v18 = vmul.f32 %v4809_v22, %v4996_v30  ;;  %v1772_v36 = vmul.f32 %v4813_v20, %v5007_v12 }
 0x145   : > { %v1819_v5 = vadd.f32 %v1771_v8, %v1719_v60  ;;  %v1969_v1 = vmul.f32 %v4822_v15, %v1489_v4  ;;  %v2114_v3 = vadd.f32 %v2066_v46, %v2014_v44  ;;  %v7668_v11 = vunpack.i.h.bf16 %v4715_v42 }
 0x146   : > { %v1020_v58 = vmin.f32 %v966_v63, 6.0  ;;  %v788_v23 = vpop.f32.mrb[24].mxu0  ;;  %v1720_v56 = vadd.f32 %v1672_v35, %v1620_v10  ;;  %v5029_v29 = vadd.f32 %v2068_v14, %v2016_v24  ;;  %v2165_v60 = vmul.f32 %v4826_v13, %v4936_v2 }
 0x147   : > { %v5027_v28 = vmul.f32 %v7668_v11, %v1019_v41  ;;  %v789_v17 = vadd.f32 %v4783_v0, %v788_v23  ;;  %v3895_v40 = vpop.f32.mrb[25].mxu0  ;;  %v5032_v54 = vadd.f32 %v1871_v25, %v1819_v5  ;;  %v2017_v61 = vadd.f32 %v1969_v1, %v1917_v62  ;;  %v5049_v25 = vld [vmem:[%s7512_s3 + $0x8] ss:$0 sm:$0xff] }
 0x148   : > { %v791_v44 = vpop.f32.mrb[26].mxu0  ;;  %v2069_v24 = vmul.f32 %v4829_v32, %v5007_v12  ;;  %v5043_v23 = vmul.f32 %v4746_v51, %v1020_v58  ;;  %v1820_v11 = vadd.f32 %v1772_v36, %v1720_v56  ;;  %v2166_v63 = vmul.f32 %v4826_v13, %v4946_v48 }
 0x149   : > { %v7589_v46 = vrot.slane %v5027_v28, 1  ;;  %v7590_v42 = vrot.slane %v5027_v28, 2  ;;  %v1872_v8 = vmul.f32 %v4820_v16, %v5027_v28  ;;  %v967_v10 = vmax.f32 %v789_v17, 0.0  ;;  %v3896_v14 = vpop.f32.mrb[27].mxu0 }
 0x14a   : > { %v792_v62 = vadd.f32 %v4783_v0, %v791_v44  ;;  %v5051_v41 = vadd.f32 %v2069_v24, %v2017_v61  ;;  %v2213_v35 = vadd.f32 %v2165_v60, %v2113_v38  ;;  %v2265_v51 = vmul.f32 %v4836_v33, %v4962_v39 }
 0x14b   : > { %v5059_v58 = vmul.f32 %v4809_v22, %v5027_v28  ;;  %v5065_v5 = vmul.f32 %v4809_v22, %v5043_v23  ;;  %v5069_v61 = vmul.f32 %v4820_v16, %v5043_v23  ;;  %v1021_v38 = vmin.f32 %v967_v10, 6.0 }
 0x14c   : > { %v968_v48 = vmax.f32 %v792_v62, 0.0  ;;  %v5071_v1 = vadd.f32 %v1872_v8, %v1820_v11  ;;  %v2214_v39 = vadd.f32 %v2166_v63, %v2114_v3  ;;  %v2266_v17 = vmul.f32 %v4836_v33, %v1489_v4  ;;  %v5093_v62 = vld [vmem:[%s7513_s4] ss:$0 sm:$0xff] }
 0x14d   : > { %7669 = vst [vmem:[#allocation50_spill] sm:$0xff] %v5069_v61  ;;  %v2313_v40 = vadd.f32 %v2265_v51, %v2213_v35  ;;  %v2365_v60 = vmul.f32 %v5049_v25, %v4968_v31  ;;  %v5078_v44 = vmul.f32 %v4826_v13, %v5043_v23  ;;  %v5081_v24 = vmul.f32 %v4720_v43, %v1021_v38 }
 0x14e   : > { %v1022_v14 = vmin.f32 %v968_v48, 6.0  ;;  %v796_v36 = vpop.f32.mrb[28].mxu0  ;;  %v5087_v3 = vsel %vm1443_vm1, %v1396_v37, %v7589_v46  ;;  %v2314_v10 = vadd.f32 %v2266_v17, %v2214_v39  ;;  %v7670_v43 = vrot.slane %v4973_v6, 1 }
 0x14f   : > { %v797_v4 = vadd.f32 %v4783_v0, %v796_v36  ;;  %v3899_v8 = vpop.f32.mrb[29].mxu0  ;;  %v2413_v31 = vadd.f32 %v2365_v60, %v2313_v40  ;;  %v5105_v51 = vmul.f32 %v4809_v22, %v5081_v24  ;;  %v2366_v38 = vmul.f32 %v5049_v25, %v5007_v12 }
 0x150   : > { %v5099_v11 = vsel %vm1443_vm1, %v7670_v43, %v1396_v37  ;;  %v799_v36 = vpop.f32.mrb[30].mxu0  ;;  %v5111_v48 = vmul.f32 %v4820_v16, %v5081_v24  ;;  %v7672_v39 = vunpack.i.l.bf16 %v4750_v53  ;;  %v7673_v35 = vrot.slane %v4936_v2, 1 }
 0x151   : > { %v969_v17 = vmax.f32 %v797_v4, 0.0  ;;  %v800_v40 = vadd.f32 %v4783_v0, %v799_v36  ;;  %v3900_v60 = vpop.f32.mrb[31].mxu0  ;;  %v2414_v8 = vadd.f32 %v2366_v38, %v2314_v10  ;;  %v2468_v43 = vadd.f32 %v5093_v62, %v2413_v31 }
 0x152   : > { %7671 = vst [vmem:[#allocation51_spill] sm:$0xff] %v5111_v48  ;;  %v5115_v37 = vmul.f32 %v7672_v39, %v1022_v14  ;;  %v7674_v46 = vrot.slane %v4901_v26, 1  ;;  %v7675_v56 = vrot.slane %v4996_v30, 2  ;;  %v5135_v4 = vmul.f32 %v4826_v13, %v5081_v24 }
 0x153   : > { %v2469_v38 = vadd.f32 %v5093_v62, %v2414_v8  ;;  %v2516_v39 = vmax.f32 %v2468_v43, 0.0  ;;  %v7677_v60 = vrot.slane %v4996_v30, 2  ;;  %v7679_v10 = vrot.slane %v4936_v2, 2 }
 0x154   : > { %v1491_v12 = vsel %vm1443_vm1, %v7674_v46, %v7673_v35  ;;  %v5131_v14 = vsel %vm1552_vm2, %v7675_v56, %v7590_v42  ;;  %v5141_v36 = vmul.f32 %v4809_v22, %v5115_v37  ;;  %v1023_v46 = vmin.f32 %v969_v17, 6.0 }
 0x155   : > { %v970_v35 = vmax.f32 %v800_v40, 0.0  ;;  %v5146_v56 = vmul.f32 %v4820_v16, %v5115_v37  ;;  %v7678_v42 = vrot.slane %v4973_v6, 2  ;;  %v7680_v63 = vrot.slane %v4901_v26, 2 }
 0x156   : > { %v1673_v40 = vmul.f32 %v4811_v21, %v5099_v11  ;;  %v7681_v8 = vunpack.i.h.bf16 %v4750_v53  ;;  %v2517_v48 = vmax.f32 %v2469_v38, 0.0  ;;  %v804_v6 = vpop.f32.mrb[32].mxu0  ;;  %v5167_v52 = vmul.f32 %v4811_v21, %v1491_v12 }
 0x157   : > { %7676 = vst [vmem:[#allocation52_spill] sm:$0xff] %v5146_v56  ;;  %v1597_v31 = vsel %vm1552_vm2, %v7678_v42, %v7677_v60  ;;  %v1600_v17 = vsel %vm1552_vm2, %v7680_v63, %v7679_v10  ;;  %v1024_v56 = vmin.f32 %v970_v35, 6.0  ;;  %v2564_v42 = vmin.f32 %v2516_v39, 6.0  ;;  %v3903_v26 = vpop.f32.mrb[33].mxu0 }
 0x158   : > { %v5164_v43 = vmul.f32 %v7681_v8, %v1023_v46  ;;  %v805_v2 = vadd.f32 %v4783_v0, %v804_v6  ;;  %v1674_v63 = vmul.f32 %v4811_v21, %v5087_v3  ;;  %v1721_v10 = vadd.f32 %v1673_v40, %v4986_v50  ;;  %v807_v35 = vpop.f32.mrb[34].mxu0 }
 0x159   : > { %v5180_v38 = vmul.f32 %v4813_v20, %v1600_v17  ;;  %v5183_v39 = vmul.f32 %v4726_v45, %v1024_v56  ;;  %v2565_v8 = vmin.f32 %v2517_v48, 6.0  ;;  %v808_v26 = vadd.f32 %v4783_v0, %v807_v35  ;;  %v3904_v50 = vpop.f32.mrb[35].mxu0 }
 0x15a   : > { %v5177_v46 = vmul.f32 %v4809_v22, %v5164_v43  ;;  %v971_v6 = vmax.f32 %v805_v2, 0.0  ;;  %v5188_v40 = vmul.f32 %v4820_v16, %v5164_v43  ;;  %v1722_v53 = vadd.f32 %v1674_v63, %v5019_v18 }
 0x15b   : > { %v1773_v60 = vmul.f32 %v4813_v20, %v1597_v31  ;;  %v1967_v61 = vmul.f32 %v4822_v15, %v1491_v12  ;;  %v5197_v48 = vmul.f32 %v4809_v22, %v5183_v39  ;;  %v1774_v56 = vmul.f32 %v4813_v20, %v5131_v14 }
 0x15c   : > { %7682 = vst [vmem:[#allocation53_spill] sm:$0xff] %v5177_v46  ;;  %7683 = vst [vmem:[#allocation54_spill] sm:$0xff] %v5188_v40  ;;  %v2612_v2 = vpack.c.bf16 %v2565_v8, %v2564_v42  ;;  %v1025_v35 = vmin.f32 %v971_v6, 6.0  ;;  %v972_v50 = vmax.f32 %v808_v26, 0.0  ;;  %v5205_v18 = vmul.f32 %v4820_v16, %v5183_v39 }
 0x15d   : > { %7684 = vst [vmem:[#allocation55_spill] sm:$0xff] %v5197_v48  ;;  %v5201_v40 = vadd.f32 %v1773_v60, %v1721_v10  ;;  %v5207_v12 = vadd.f32 %v1774_v56, %v1722_v53  ;;  %v5211_v63 = vmul.f32 %v4822_v15, %v5099_v11  ;;  %v2015_v45 = vadd.f32 %v1967_v61, %v4924_v9 }
 0x15e   : > { %7686 = vst [vmem:[#allocation57_spill] sm:$0xff] %v5205_v18  ;;  %3993 = vmatprep.mubr.bf16.mxu1 %v2612_v2  ;;  %v5215_v46 = vmul.f32 %v4757_v55, %v1025_v35  ;;  %v1026_v42 = vmin.f32 %v972_v50, 6.0  ;;  %v5219_v10 = vmul.f32 %v4822_v15, %v5087_v3  ;;  %v2067_v60 = vmul.f32 %v4829_v32, %v1600_v17  ;;  %v812_v8 = vpop.f32.mrb[36].mxu0 }
 0x15f   : > { %7685 = vst [vmem:[#allocation56_spill] sm:$0xff] %v5201_v40  ;;  %7687 = vst [vmem:[#allocation58_spill] sm:$0xff] %v5207_v12  ;;  %v5223_v53 = vmul.f32 %v4829_v32, %v1597_v31  ;;  %v5227_v6 = vmul.f32 %v4829_v32, %v5131_v14  ;;  %v2168_v9 = vmul.f32 %v4826_v13, %v4996_v30  ;;  %v3907_v61 = vpop.f32.mrb[37].mxu0  ;;  %v7690_v30 = vunpack.i.l.bf16 %v4732_v47 }
 0x160   : > { %v2267_v55 = vmul.f32 %v4836_v33, %v5099_v11  ;;  %v5237_v17 = vmul.f32 %v4809_v22, %v5215_v46  ;;  %v2268_v2 = vmul.f32 %v4836_v33, %v5087_v3  ;;  %v815_v35 = vpop.f32.mrb[38].mxu0  ;;  %v5243_v50 = vmul.f32 %v4820_v16, %v5215_v46 }
 0x161   : > { %v5247_v11 = vmul.f32 %v7690_v30, %v1026_v42  ;;  %v2115_v61 = vadd.f32 %v2067_v60, %v2015_v45  ;;  %v2216_v26 = vadd.f32 %v2168_v9, %v5029_v29  ;;  %v3908_v56 = vpop.f32.mrb[39].mxu0  ;;  %v2367_v18 = vmul.f32 %v5049_v25, %v1597_v31 }
 0x162   : > { %7688 = vst [vmem:[#allocation59_spill] sm:$0xff] %v5237_v17  ;;  %7689 = vst [vmem:[#allocation60_spill] sm:$0xff] %v5243_v50  ;;  %v813_v17 = vadd.f32 %v4783_v0, %v812_v8  ;;  %v816_v12 = vadd.f32 %v4783_v0, %v815_v35  ;;  %v7691_v3 = vrot.slane %v5081_v24, 1  ;;  %v7692_v40 = vrot.slane %v5043_v23, 1 }
 0x163   : > { %v5263_v29 = vmul.f32 %v4809_v22, %v5247_v11  ;;  %v2368_v31 = vmul.f32 %v5049_v25, %v5131_v14  ;;  %v2215_v60 = vadd.f32 %v5011_v34, %v2115_v61  ;;  %v2316_v8 = vadd.f32 %v2268_v2, %v2216_v26 }
 0x164   : > { %v1485_v50 = vsel %vm1443_vm1, %v7692_v40, %v7691_v3  ;;  %v973_v9 = vmax.f32 %v813_v17, 0.0  ;;  %v974_v56 = vmax.f32 %v816_v12, 0.0  ;;  %v7694_v35 = vmov %v7692_v40 }
 0x165   : > { %7693 = vst [vmem:[#allocation61_spill] sm:$0xff] %v5263_v29  ;;  %v7695_v40 = vrot.slane %v5027_v28, 1  ;;  %v7696_v3 = vrot.slane %v5081_v24, 2  ;;  %v7697_v45 = vrot.slane %v5043_v23, 2  ;;  %v7699_v14 = vrot.slane %v5027_v28, 2 }
 0x166   : > { %v1676_v26 = vmul.f32 %v4811_v21, %v1485_v50  ;;  %v2315_v17 = vadd.f32 %v2267_v55, %v2215_v60  ;;  %v2416_v2 = vadd.f32 %v2368_v31, %v2316_v8  ;;  %v1027_v61 = vmin.f32 %v973_v9, 6.0 }
 0x167   : > { %v1486_v30 = vsel %vm1443_vm1, %v7695_v40, %v7694_v35  ;;  %v5280_v42 = vsel %vm1552_vm2, %v7697_v45, %v7696_v3  ;;  %v7698_v34 = vmov %v7697_v45  ;;  %v1028_v35 = vmin.f32 %v974_v56, 6.0  ;;  %v820_v40 = vpop.f32.mrb[40].mxu0 }
 0x168   : > { %v1595_v12 = vsel %vm1552_vm2, %v7699_v14, %v7698_v34  ;;  %v5291_v29 = vmul.f32 %v4820_v16, %v5247_v11  ;;  %v1675_v45 = vmul.f32 %v4811_v21, %v1486_v30  ;;  %v1718_v23 = vadd.f32 %v5167_v52, %v4922_v7  ;;  %v3911_v48 = vpop.f32.mrb[41].mxu0 }
 0x169   : > { %v1724_v3 = vadd.f32 %v1676_v26, %v5065_v5  ;;  %v2415_v34 = vadd.f32 %v2367_v18, %v2315_v17  ;;  %v2471_v14 = vadd.f32 %v5093_v62, %v2416_v2  ;;  %v7701_v55 = vunpack.i.h.bf16 %v4732_v47  ;;  %v823_v8 = vpop.f32.mrb[42].mxu0 }
 0x16a   : > { %7700 = vst [vmem:[#allocation62_spill] sm:$0xff] %v5291_v29  ;;  %v5303_v60 = vmul.f32 %v4762_v57, %v1028_v35  ;;  %v1723_v9 = vadd.f32 %v1675_v45, %v5059_v58  ;;  %v1775_v56 = vmul.f32 %v4813_v20, %v1595_v12  ;;  %v1776_v52 = vmul.f32 %v4813_v20, %v5280_v42  ;;  %v3912_v5 = vpop.f32.mrb[43].mxu0  ;;  %v7729_v29 = vld [vmem:[#allocation50_spill] sm:$0xff] }
 0x16b   : > { %v5300_v31 = vmul.f32 %v7701_v55, %v1027_v61  ;;  %v1818_v7 = vadd.f32 %v5180_v38, %v1718_v23  ;;  %v2470_v48 = vadd.f32 %v5093_v62, %v2415_v34  ;;  %v2519_v18 = vmax.f32 %v2471_v14, 0.0 }
 0x16c   : > { %v5313_v26 = vmul.f32 %v4822_v15, %v1486_v30  ;;  %v5328_v45 = vmul.f32 %v4809_v22, %v5303_v60  ;;  %v5332_v23 = vmul.f32 %v4820_v16, %v5303_v60  ;;  %v5334_v34 = vadd.f32 %v1775_v56, %v1723_v9 }
 0x16d   : > { %v5318_v58 = vmul.f32 %v4809_v22, %v5300_v31  ;;  %v5322_v17 = vmul.f32 %v4820_v16, %v5300_v31  ;;  %v2518_v2 = vmax.f32 %v2470_v48, 0.0  ;;  %v2567_v61 = vmin.f32 %v2519_v18, 6.0 }
 0x16e   : > { %7703 = vst [vmem:[#allocation64_spill] sm:$0xff] %v5332_v23  ;;  %v5336_v14 = vadd.f32 %v1776_v52, %v1724_v3  ;;  %v1918_v55 = vadd.f32 %v4992_v19, %v1818_v7  ;;  %v5340_v48 = vmul.f32 %v4822_v15, %v1485_v50  ;;  %v5343_v18 = vmul.f32 %v4829_v32, %v1595_v12  ;;  %v5347_v38 = vpop.f32.mrb[44].mxu0 }
 0x16f   : > { %7702 = vst [vmem:[#allocation63_spill] sm:$0xff] %v5322_v17  ;;  %v2566_v5 = vmin.f32 %v2518_v2, 6.0  ;;  %v2169_v35 = vmul.f32 %v4826_v13, %v5027_v28  ;;  %v2269_v9 = vmul.f32 %v4836_v33, %v1486_v30  ;;  %v2270_v3 = vmul.f32 %v4836_v33, %v1485_v50  ;;  %v3915_v56 = vpop.f32.mrb[45].mxu0 }
 0x170   : > { %v2018_v57 = vadd.f32 %v5211_v63, %v1918_v55  ;;  %v2369_v19 = vmul.f32 %v5049_v25, %v1595_v12  ;;  %v2370_v2 = vmul.f32 %v5049_v25, %v5280_v42  ;;  %v821_v47 = vadd.f32 %v4783_v0, %v820_v40  ;;  %v831_v28 = vpop.f32.mrb[46].mxu0 }
 0x171   : > { %v2613_v52 = vpack.c.bf16 %v2567_v61, %v2566_v5  ;;  %v2217_v7 = vadd.f32 %v2169_v35, %v5051_v41  ;;  %v824_v63 = vadd.f32 %v4783_v0, %v823_v8  ;;  %v7704_v30 = vrot.slane %v5164_v43, 1  ;;  %v3916_v40 = vpop.f32.mrb[47].mxu0 }
 0x172   : > { %v2118_v23 = vadd.f32 %v5223_v53, %v2018_v57  ;;  %v7705_v50 = vrot.slane %v5115_v37, 1  ;;  %v7707_v41 = vrot.slane %v5081_v24, 1  ;;  %v975_v53 = vmax.f32 %v821_v47, 0.0 }
 0x173   : > { %3994 = vmatmul.mubr.bf16.vlgmr.msra.gmra.mrb[0].mxu1 %v2613_v52  ;;  %v2317_v55 = vadd.f32 %v2269_v9, %v2217_v7  ;;  %v7708_v8 = vrot.slane %v5164_v43, 2  ;;  %v7709_v57 = vrot.slane %v5115_v37, 2  ;;  %v976_v52 = vmax.f32 %v824_v63, 0.0 }
 0x174   : > { %v1483_v12 = vsel %vm1443_vm1, %v7705_v50, %v7704_v30  ;;  %v7706_v61 = vmov %v7705_v50  ;;  %v7711_v30 = vrot.slane %v5081_v24, 2 }
 0x175   : > { %v1484_v35 = vsel %vm1443_vm1, %v7707_v41, %v7706_v61  ;;  %v5377_v5 = vsel %vm1552_vm2, %v7709_v57, %v7708_v8  ;;  %v7710_v56 = vmov %v7709_v57  ;;  %v2218_v61 = vadd.f32 %v5078_v44, %v2118_v23 }
 0x176   : > { %v1593_v50 = vsel %vm1552_vm2, %v7711_v30, %v7710_v56  ;;  %v1677_v47 = vmul.f32 %v4811_v21, %v1484_v35  ;;  %v1678_v9 = vmul.f32 %v4811_v21, %v1483_v12  ;;  %v2417_v7 = vadd.f32 %v2369_v19, %v2317_v55  ;;  %v5404_v55 = vpop.f32.mrb[48].mxu0 }
 0x177   : > { %v1029_v41 = vmin.f32 %v975_v53, 6.0  ;;  %v1777_v40 = vmul.f32 %v4813_v20, %v1593_v50  ;;  %v1778_v8 = vmul.f32 %v4813_v20, %v5377_v5  ;;  %v2318_v57 = vadd.f32 %v2270_v3, %v2218_v61 }
 0x178   : > { %v1030_v17 = vmin.f32 %v976_v52, 6.0  ;;  %v1725_v24 = vadd.f32 %v1677_v47, %v5105_v51  ;;  %v1726_v56 = vadd.f32 %v1678_v9, %v5141_v36  ;;  %v5395_v44 = vmul.f32 %v4829_v32, %v5280_v42  ;;  %v3919_v42 = vpop.f32.mrb[49].mxu0 }
 0x179   : > { %v2472_v23 = vadd.f32 %v5093_v62, %v2417_v7  ;;  %v5399_v19 = vmul.f32 %v4739_v49, %v1029_v41  ;;  %v5402_v63 = vmul.f32 %v4822_v15, %v1484_v35  ;;  %v2418_v3 = vadd.f32 %v2370_v2, %v2318_v57  ;;  %v5419_v9 = vpop.f32.mrb[50].mxu0 }
 0x17a   : > { %v7712_v53 = vunpack.i.l.bf16 %v4768_v59  ;;  %v5410_v36 = vadd.f32 %v1777_v40, %v1725_v24  ;;  %v5412_v30 = vadd.f32 %v1778_v8, %v1726_v56  ;;  %v5417_v47 = vmul.f32 %v4822_v15, %v1483_v12  ;;  %v3920_v40 = vpop.f32.mrb[51].mxu0 }
 0x17b   : > { %v2520_v61 = vmax.f32 %v2472_v23, 0.0  ;;  %v2473_v2 = vadd.f32 %v5093_v62, %v2418_v3  ;;  %v5428_v7 = vmul.f32 %v4820_v16, %v5399_v19  ;;  %v2019_v56 = vadd.f32 %v5219_v10, %v5032_v54 }
 0x17c   : > { %v5408_v51 = vmul.f32 %v7712_v53, %v1030_v17  ;;  %v5424_v17 = vmul.f32 %v4809_v22, %v5399_v19  ;;  %v2020_v53 = vadd.f32 %v5313_v26, %v5071_v1  ;;  %v5445_v42 = vmul.f32 %v4829_v32, %v1593_v50 }
 0x17d   : > { %7715 = vst [vmem:[#allocation67_spill] sm:$0xff] %v5428_v7  ;;  %v2568_v8 = vmin.f32 %v2520_v61, 6.0  ;;  %v2521_v23 = vmax.f32 %v2473_v2, 0.0  ;;  %v2119_v61 = vadd.f32 %v5227_v6, %v2019_v56  ;;  %v2172_v40 = vmul.f32 %v4826_v13, %v5115_v37 }
 0x17e   : > { %7713 = vst [vmem:[#allocation65_spill] sm:$0xff] %v5408_v51  ;;  %7714 = vst [vmem:[#allocation66_spill] sm:$0xff] %v5424_v17  ;;  %v5434_v24 = vmul.f32 %v4809_v22, %v5408_v51  ;;  %v5440_v3 = vmul.f32 %v4820_v16, %v5408_v51  ;;  %v2271_v57 = vmul.f32 %v4836_v33, %v1484_v35  ;;  %v7718_v37 = vrot.slane %v5215_v46, 1  ;;  %v7734_v51 = vld [vmem:[#allocation51_spill] sm:$0xff] }
 0x17f   : > { %v2272_v54 = vmul.f32 %v4836_v33, %v1483_v12  ;;  %v2569_v10 = vmin.f32 %v2521_v23, 6.0  ;;  %v2120_v2 = vadd.f32 %v5343_v18, %v2020_v53  ;;  %v2371_v41 = vmul.f32 %v5049_v25, %v1593_v50  ;;  %v5468_v18 = vpop.f32.mrb[52].mxu0 }
 0x180   : > { %7716 = vst [vmem:[#allocation68_spill] sm:$0xff] %v5434_v24  ;;  %7717 = vst [vmem:[#allocation69_spill] sm:$0xff] %v5440_v3  ;;  %v2372_v1 = vmul.f32 %v5049_v25, %v5377_v5  ;;  %v2219_v26 = vadd.f32 %v5135_v4, %v2119_v61  ;;  %v829_v6 = vadd.f32 %v4783_v0, %v5347_v38  ;;  %v7719_v35 = vrot.slane %v5183_v39, 1  ;;  %v7726_v3 = vld [vmem:[#allocation53_spill] sm:$0xff] }
 0x181   : > { %v832_v56 = vadd.f32 %v4783_v0, %v831_v28  ;;  %v2614_v50 = vpack.c.bf16 %v2569_v10, %v2568_v8  ;;  %v2220_v23 = vadd.f32 %v2172_v40, %v2120_v2  ;;  %v7721_v4 = vrot.slane %v5164_v43, 1 }
 0x182   : > { %v5466_v12 = vsel %vm1443_vm1, %v7719_v35, %v7718_v37  ;;  %v7720_v53 = vmov %v7719_v35  ;;  %v7722_v0 = vrot.slane %v5215_v46, 2  ;;  %v7723_v28 = vrot.slane %v5183_v39, 2  ;;  %v3923_v37 = vpop.f32.mrb[53].mxu0 }
 0x183   : > { %v1482_v38 = vsel %vm1443_vm1, %v7721_v4, %v7720_v53  ;;  %v2319_v35 = vadd.f32 %v2271_v57, %v2219_v26  ;;  %v977_v49 = vmax.f32 %v829_v6, 0.0  ;;  %v978_v8 = vmax.f32 %v832_v56, 0.0  ;;  %v5490_v53 = vpop.f32.mrb[54].mxu0  ;;  %v4370_v4 = vld [vmem:[%s7516_s7] sm:$0xff]   ;;  %3997 = vmatprep.mubr.bf16.mxu1 %v2614_v50 }
 0x184   : > { %v5482_v61 = vsel %vm1552_vm2, %v7723_v28, %v7722_v0  ;;  %v7724_v40 = vmov %v7723_v28  ;;  %v7725_v10 = vrot.slane %v5164_v43, 2  ;;  %v2320_v0 = vadd.f32 %v2272_v54, %v2220_v23  ;;  %v3924_v6 = vpop.f32.mrb[55].mxu0  ;;  %4041 = vmatprep.subr.bf16.mxu1 %v4370_v4  ;;  %v7727_v50 = vld [vmem:[#allocation55_spill] sm:$0xff]  ;;  %v7728_v23 = vld [vmem:[#allocation56_spill] sm:$0xff] }
 0x185   : > { %v1679_v28 = vmul.f32 %v4811_v21, %v1482_v38  ;;  %v1680_v57 = vmul.f32 %v4811_v21, %v5466_v12  ;;  %v2419_v56 = vadd.f32 %v2371_v41, %v2319_v35  ;;  %v1031_v37 = vmin.f32 %v977_v49, 6.0  ;;  %4042 = vmatpush3.bf16.msra.mxu1 %v4370_v4  ;;  %v7731_v49 = vld [vmem:[#allocation32_spill] sm:$0xff] }
 0x186   : > { %v1591_v2 = vsel %vm1552_vm2, %v7725_v10, %v7724_v40  ;;  %v1032_v52 = vmin.f32 %v978_v8, 6.0  ;;  %v1780_v40 = vmul.f32 %v4813_v20, %v5482_v61  ;;  %v2420_v10 = vadd.f32 %v2372_v1, %v2320_v0  ;;  %v7733_v8 = vld [vmem:[#allocation58_spill] sm:$0xff] }
 0x187   : > { %v1779_v26 = vmul.f32 %v4813_v20, %v1591_v2  ;;  %v1727_v7 = vadd.f32 %v1679_v28, %v7726_v3  ;;  %v1728_v54 = vadd.f32 %v1680_v57, %v7727_v50  ;;  %v1921_v24 = vadd.f32 %v7729_v29, %v7728_v23 }
 0x188   : > { %v2474_v17 = vadd.f32 %v5093_v62, %v2419_v56  ;;  %v7730_v6 = vunpack.i.h.bf16 %v4768_v59  ;;  %v5511_v35 = vmul.f32 %v7731_v49, %v1032_v52  ;;  %v1922_v1 = vadd.f32 %v7734_v51, %v7733_v8  ;;  %v5529_v56 = vpop.f32.mrb[56].mxu0 }
 0x189   : > { %v5517_v3 = vmul.f32 %v4829_v32, %v5377_v5  ;;  %v2475_v0 = vadd.f32 %v5093_v62, %v2420_v10  ;;  %v5520_v29 = vadd.f32 %v1779_v26, %v1727_v7  ;;  %v5522_v4 = vadd.f32 %v1780_v40, %v1728_v54  ;;  %v3927_v26 = vpop.f32.mrb[57].mxu0 }
 0x18a   : > { %v5508_v41 = vmul.f32 %v7730_v6, %v1031_v37  ;;  %7732 = vst [vmem:[#allocation53_spill] sm:$0xff] %v5511_v35  ;;  %v2522_v28 = vmax.f32 %v2474_v17, 0.0  ;;  %v5527_v52 = vmul.f32 %v4822_v15, %v1482_v38  ;;  %v5543_v10 = vmul.f32 %v4809_v22, %v5511_v35  ;;  %v5549_v54 = vpop.f32.mrb[58].mxu0 }
 0x18b   : > { %7735 = vst [vmem:[#allocation55_spill] sm:$0xff] %v5520_v29  ;;  %7736 = vst [vmem:[#allocation56_spill] sm:$0xff] %v5522_v4  ;;  %v2523_v51 = vmax.f32 %v2475_v0, 0.0  ;;  %v5547_v50 = vmul.f32 %v4820_v16, %v5511_v35  ;;  %v5553_v6 = vmul.f32 %v4822_v15, %v5466_v12  ;;  %v2021_v49 = vadd.f32 %v5340_v48, %v1921_v24  ;;  %v3928_v0 = vpop.f32.mrb[59].mxu0  ;;  %v7753_v35 = vld [vmem:[#allocation37_spill] sm:$0xff]  ;;  %v7756_v4 = vld [vmem:[#allocation52_spill] sm:$0xff] }
 0x18c   : > { %v5533_v5 = vmul.f32 %v4809_v22, %v5508_v41  ;;  %v5537_v7 = vmul.f32 %v4820_v16, %v5508_v41  ;;  %v2570_v37 = vmin.f32 %v2522_v28, 6.0  ;;  %7739 = vst [vmem:[#allocation58_spill] sm:$0xff] %v5543_v10  ;;  %v2022_v8 = vadd.f32 %v5402_v63, %v1922_v1 }
 0x18d   : > { %7740 = vst [vmem:[#allocation51_spill] sm:$0xff] %v5547_v50  ;;  %v2571_v23 = vmin.f32 %v2523_v51, 6.0  ;;  %v5558_v28 = vmul.f32 %v4829_v32, %v1591_v2  ;;  %v2173_v26 = vmul.f32 %v4826_v13, %v5164_v43  ;;  %v2174_v40 = vmul.f32 %v4826_v13, %v5183_v39  ;;  %v5575_v43 = vld [vmem:[%s7511_s2] ss:$0 sm:$0xff] }
 0x18e   : > { %7737 = vst [vmem:[#allocation50_spill] sm:$0xff] %v5533_v5  ;;  %7738 = vst [vmem:[#allocation32_spill] sm:$0xff] %v5537_v7  ;;  %v2273_v51 = vmul.f32 %v4836_v33, %v1482_v38  ;;  %v2121_v57 = vadd.f32 %v5395_v44, %v2021_v49  ;;  %v2122_v59 = vadd.f32 %v5445_v42, %v2022_v8  ;;  %v7751_v5 = vld [vmem:[#allocation59_spill] sm:$0xff] }
 0x18f   : > { %v2615_v17 = vpack.c.bf16 %v2571_v23, %v2570_v37  ;;  %v2274_v48 = vmul.f32 %v4836_v33, %v5466_v12  ;;  %v2373_v63 = vmul.f32 %v5049_v25, %v1591_v2  ;;  %v2374_v24 = vmul.f32 %v5049_v25, %v5482_v61 }
 0x190   : > { %v837_v39 = vadd.f32 %v5575_v43, %v5404_v55  ;;  %v840_v44 = vadd.f32 %v5575_v43, %v5419_v9  ;;  %v2221_v42 = vadd.f32 %v2173_v26, %v2121_v57  ;;  %v2222_v38 = vadd.f32 %v2174_v40, %v2122_v59  ;;  %v5607_v26 = vpop.f32.mrb[60].mxu0 }
 0x191   : > { %3998 = vmatmul.mubr.bf16.gmra.mrb[4].mxu1 %v2615_v17  ;;  %v7741_v12 = vrot.slane %v5300_v31, 1  ;;  %v7742_v2 = vrot.slane %v5247_v11, 1  ;;  %v7744_v23 = vrot.slane %v5215_v46, 1  ;;  %v7745_v9 = vrot.slane %v5300_v31, 2  ;;  %7749 = vst [vmem:[#allocation70_spill] sm:$0xff] %v5607_v26 }
 0x192   : > { %v979_v49 = vmax.f32 %v837_v39, 0.0  ;;  %v980_v8 = vmax.f32 %v840_v44, 0.0  ;;  %v7746_v59 = vrot.slane %v5247_v11, 2  ;;  %v7748_v40 = vrot.slane %v5215_v46, 2  ;;  %v4371_v39 = vld [vmem:[%s7516_s7 + $0x8] sm:$0xff]  }
 0x193   : > { %v1479_v1 = vsel %vm1443_vm1, %v7742_v2, %v7741_v12  ;;  %v7743_v37 = vmov %v7742_v2  ;;  %v2321_v44 = vadd.f32 %v2273_v51, %v2221_v42  ;;  %v2322_v12 = vadd.f32 %v2274_v48, %v2222_v38  ;;  %4043 = vmatprep.subr.bf16.mxu1 %v4371_v39  ;;  %v7752_v48 = vld [vmem:[#allocation61_spill] sm:$0xff] }
 0x194   : > { %v1480_v55 = vsel %vm1443_vm1, %v7744_v23, %v7743_v37  ;;  %v5599_v57 = vsel %vm1552_vm2, %v7746_v59, %v7745_v9  ;;  %v7747_v17 = vmov %v7746_v59  ;;  %v1682_v37 = vmul.f32 %v4811_v21, %v1479_v1  ;;  %v3931_v23 = vpop.f32.mrb[61].mxu0  ;;  %4044 = vmatpush3.bf16.msra.mxu1 %v4371_v39 }
 0x195   : > { %v1589_v0 = vsel %vm1552_vm2, %v7748_v40, %v7747_v17  ;;  %v1681_v2 = vmul.f32 %v4811_v21, %v1480_v55  ;;  %v1033_v9 = vmin.f32 %v979_v49, 6.0  ;;  %v1034_v59 = vmin.f32 %v980_v8, 6.0  ;;  %v5617_v40 = vpop.f32.mrb[62].mxu0  ;;  %v7754_v49 = vld [vmem:[#allocation33_spill] sm:$0xff] }
 0x196   : > { %v1781_v50 = vmul.f32 %v4813_v20, %v1589_v0  ;;  %v1782_v17 = vmul.f32 %v4813_v20, %v5599_v57  ;;  %7750 = vst [vmem:[#allocation71_spill] sm:$0xff] %v5617_v40  ;;  %v2421_v7 = vadd.f32 %v2373_v63, %v2321_v44  ;;  %v2422_v10 = vadd.f32 %v2374_v24, %v2322_v12  ;;  %v3932_v38 = vpop.f32.mrb[63].mxu0  ;;  %v7757_v40 = vld [vmem:[#allocation54_spill] sm:$0xff] }
 0x197   : > { %v1729_v51 = vadd.f32 %v1681_v2, %v7751_v5  ;;  %v1730_v42 = vadd.f32 %v1682_v37, %v7752_v48  ;;  %v5622_v23 = vmul.f32 %v7753_v35, %v1033_v9  ;;  %v7755_v8 = vunpack.i.l.bf16 %v7754_v49 }
 0x198   : > { %v1923_v29 = vadd.f32 %v7756_v4, %v5334_v34  ;;  %v1924_v63 = vadd.f32 %v7757_v40, %v5336_v14  ;;  %v2476_v24 = vadd.f32 %v5093_v62, %v2421_v7  ;;  %v2477_v5 = vadd.f32 %v5093_v62, %v2422_v10 }
 0x199   : > { %v5626_v26 = vmul.f32 %v7755_v8, %v1034_v59  ;;  %v5634_v44 = vadd.f32 %v1781_v50, %v1729_v51  ;;  %v5636_v39 = vadd.f32 %v1782_v17, %v1730_v42  ;;  %v5640_v35 = vmul.f32 %v4829_v32, %v5482_v61  ;;  %v5665_v59 = vpop.f32.mrb[64].mxu0 }
 0x19a   : > { %v5646_v34 = vmul.f32 %v4809_v22, %v5622_v23  ;;  %v2524_v14 = vmax.f32 %v2476_v24, 0.0  ;;  %v2525_v4 = vmax.f32 %v2477_v5, 0.0  ;;  %v5650_v7 = vmul.f32 %v4820_v16, %v5622_v23  ;;  %v3935_v42 = vpop.f32.mrb[65].mxu0 }
 0x19b   : > { %v5656_v61 = vmul.f32 %v4809_v22, %v5626_v26  ;;  %v5660_v37 = vmul.f32 %v4820_v16, %v5626_v26  ;;  %v5663_v9 = vmul.f32 %v4822_v15, %v1480_v55  ;;  %v2023_v51 = vadd.f32 %v5417_v47, %v1923_v29  ;;  %v5679_v50 = vpop.f32.mrb[66].mxu0 }
 0x19c   : > { %7758 = vst [vmem:[#allocation59_spill] sm:$0xff] %v5650_v7  ;;  %v2572_v17 = vmin.f32 %v2524_v14, 6.0  ;;  %v2573_v40 = vmin.f32 %v2525_v4, 6.0  ;;  %v2024_v48 = vadd.f32 %v5527_v52, %v1924_v63  ;;  %v5670_v38 = vmul.f32 %v4822_v15, %v1479_v1  ;;  %v3936_v63 = vpop.f32.mrb[67].mxu0 }
 0x19d   : > { %7759 = vst [vmem:[#allocation61_spill] sm:$0xff] %v5660_v37  ;;  %v5673_v8 = vmul.f32 %v4829_v32, %v1589_v0  ;;  %v2175_v24 = vmul.f32 %v4826_v13, %v5215_v46  ;;  %v2176_v5 = vmul.f32 %v4826_v13, %v5247_v11  ;;  %v2123_v47 = vadd.f32 %v5517_v3, %v2023_v51 }
 0x19e   : > { %v2616_v14 = vpack.c.bf16 %v2573_v40, %v2572_v17  ;;  %v2124_v29 = vadd.f32 %v5558_v28, %v2024_v48  ;;  %v2275_v52 = vmul.f32 %v4836_v33, %v1480_v55  ;;  %v2276_v4 = vmul.f32 %v4836_v33, %v1479_v1 }
 0x19f   : > { %v2375_v42 = vmul.f32 %v5049_v25, %v1589_v0  ;;  %v2376_v46 = vmul.f32 %v5049_v25, %v5599_v57  ;;  %v845_v11 = vadd.f32 %v5575_v43, %v5468_v18  ;;  %v2223_v10 = vadd.f32 %v2175_v24, %v2123_v47  ;;  %v5698_v0 = vpop.permute.xlu1 %1265 }
 0x1a0   : > { %4001 = vmatprep.mubr.bf16.mxu1 %v2616_v14  ;;  %v2224_v17 = vadd.f32 %v2176_v5, %v2124_v29  ;;  %v848_v3 = vadd.f32 %v5575_v43, %v5490_v53  ;;  %v7760_v28 = vrot.slane %v5399_v19, 1  ;;  %v7761_v55 = vrot.slane %v5303_v60, 1  ;;  %7762 = vst [vmem:[#allocation37_spill] sm:$0xff] %v5698_v0 }
 0x1a1   : > { %v981_v40 = vmax.f32 %v845_v11, 0.0  ;;  %v7764_v18 = vrot.slane %v5300_v31, 1  ;;  %v7765_v24 = vrot.slane %v5399_v19, 2  ;;  %v7766_v53 = vrot.slane %v5303_v60, 2 }
 0x1a2   : > { %v1477_v1 = vsel %vm1443_vm1, %v7761_v55, %v7760_v28  ;;  %v7763_v51 = vmov %v7761_v55  ;;  %v7768_v47 = vrot.slane %v5300_v31, 2  ;;  %v2323_v63 = vadd.f32 %v2275_v52, %v2223_v10 }
 0x1a3   : > { %v1478_v48 = vsel %vm1443_vm1, %v7764_v18, %v7763_v51  ;;  %v1586_v5 = vsel %vm1552_vm2, %v7766_v53, %v7765_v24  ;;  %v7767_v14 = vmov %v7766_v53  ;;  %v2324_v11 = vadd.f32 %v2276_v4, %v2224_v17  ;;  %v5725_v53 = vpop.f32.mrb[68].mxu0 }
 0x1a4   : > { %v1587_v29 = vsel %vm1552_vm2, %v7768_v47, %v7767_v14  ;;  %v982_v28 = vmax.f32 %v848_v3, 0.0  ;;  %v1683_v55 = vmul.f32 %v4811_v21, %v1478_v48  ;;  %v5721_v51 = vmul.f32 %v4829_v32, %v5599_v57  ;;  %v3939_v52 = vpop.f32.mrb[69].mxu0  ;;  %v7770_v3 = vld [vmem:[#allocation57_spill] sm:$0xff]  ;;  %v7771_v14 = vld [vmem:[#allocation60_spill] sm:$0xff] }
 0x1a5   : > { %v1035_v18 = vmin.f32 %v981_v40, 6.0  ;;  %v1684_v2 = vmul.f32 %v4811_v21, %v1477_v1  ;;  %v1783_v24 = vmul.f32 %v4813_v20, %v1587_v29  ;;  %v2423_v12 = vadd.f32 %v2375_v42, %v2323_v63  ;;  %v5737_v7 = vpop.f32.mrb[70].mxu0 }
 0x1a6   : > { %v2424_v0 = vadd.f32 %v2376_v46, %v2324_v11  ;;  %v1036_v37 = vmin.f32 %v982_v28, 6.0  ;;  %v1731_v10 = vadd.f32 %v1683_v55, %v5318_v58  ;;  %v7769_v4 = vunpack.i.h.bf16 %v7754_v49  ;;  %v7772_v58 = vld [vmem:[#allocation39_spill] sm:$0xff]  ;;  %v3940_v11 = vpop.f32.mrb[71].mxu0  ;;  %v5746_v28 = vpop.permute.xlu1 %1280 }
 0x1a7   : > { %v1732_v57 = vadd.f32 %v1684_v2, %v5328_v45  ;;  %v1925_v40 = vadd.f32 %v7770_v3, %v5410_v36  ;;  %v1926_v47 = vadd.f32 %v7771_v14, %v5412_v30  ;;  %v2478_v42 = vadd.f32 %v5093_v62, %v2423_v12  ;;  %7774 = vst [vmem:[#allocation52_spill] sm:$0xff] %v5746_v28 }
 0x1a8   : > { %v5730_v17 = vmul.f32 %v7769_v4, %v1035_v18  ;;  %v2479_v46 = vadd.f32 %v5093_v62, %v2424_v0  ;;  %v5742_v63 = vmul.f32 %v7772_v58, %v1036_v37  ;;  %v5744_v49 = vadd.f32 %v1783_v24, %v1731_v10 }
 0x1a9   : > { %v1784_v12 = vmul.f32 %v4813_v20, %v1586_v5  ;;  %v2526_v2 = vmax.f32 %v2478_v42, 0.0  ;;  %v5772_v14 = vmul.f32 %v4822_v15, %v1478_v48  ;;  %v2025_v42 = vadd.f32 %v5553_v6, %v1925_v40  ;;  %v5790_v40 = vpop.permute.xlu0 %4350 }
 0x1aa   : > { %7773 = vst [vmem:[#allocation33_spill] sm:$0xff] %v5742_v63  ;;  %v5752_v30 = vmul.f32 %v4809_v22, %v5730_v17  ;;  %v2527_v0 = vmax.f32 %v2479_v46, 0.0  ;;  %v5757_v37 = vmul.f32 %v4820_v16, %v5730_v17  ;;  %v5763_v24 = vmul.f32 %v4809_v22, %v5742_v63  ;;  %7780 = vst [vmem:[#allocation73_spill] sm:$0xff] %v5790_v40 }
 0x1ab   : > { %v5767_v10 = vmul.f32 %v4820_v16, %v5742_v63  ;;  %v5769_v52 = vadd.f32 %v1784_v12, %v1732_v57  ;;  %v2574_v4 = vmin.f32 %v2526_v2, 6.0  ;;  %v5776_v46 = vmul.f32 %v4822_v15, %v1477_v1  ;;  %v5784_v57 = vpop.f32.mrb[72].mxu0 }
 0x1ac   : > { %7775 = vst [vmem:[#allocation54_spill] sm:$0xff] %v5752_v30  ;;  %7776 = vst [vmem:[#allocation57_spill] sm:$0xff] %v5757_v37  ;;  %v2575_v3 = vmin.f32 %v2527_v0, 6.0  ;;  %v2026_v58 = vadd.f32 %v5663_v9, %v1926_v47  ;;  %v5780_v11 = vmul.f32 %v4829_v32, %v1587_v29  ;;  %v2177_v18 = vmul.f32 %v4826_v13, %v5300_v31  ;;  %v3943_v55 = vpop.f32.mrb[73].mxu0  ;;  %v7796_v37 = vld [vmem:[#allocation62_spill] sm:$0xff] }
 0x1ad   : > { %7777 = vst [vmem:[#allocation60_spill] sm:$0xff] %v5763_v24  ;;  %7778 = vst [vmem:[#allocation39_spill] sm:$0xff] %v5767_v10  ;;  %v2125_v2 = vadd.f32 %v5640_v35, %v2025_v42  ;;  %v2178_v0 = vmul.f32 %v4826_v13, %v5303_v60  ;;  %v2277_v6 = vmul.f32 %v4836_v33, %v1478_v48  ;;  %v5800_v35 = vpop.f32.mrb[74].mxu0  ;;  %v7795_v10 = vld [vmem:[#allocation55_spill] sm:$0xff] }
 0x1ae   : > { %7779 = vst [vmem:[#allocation72_spill] sm:$0xff] %v5784_v57  ;;  %v2617_v12 = vpack.c.bf16 %v2575_v3, %v2574_v4  ;;  %v5793_v9 = vmul.f32 %v4829_v32, %v1586_v5  ;;  %v2126_v47 = vadd.f32 %v5673_v8, %v2026_v58  ;;  %v2278_v31 = vmul.f32 %v4836_v33, %v1477_v1  ;;  %v5798_v4 = vpop.permute.xlu1 %4340  ;;  %v3944_v42 = vpop.f32.mrb[75].mxu0 }
 0x1af   : > { %v2377_v36 = vmul.f32 %v5049_v25, %v1587_v29  ;;  %7781 = vst [vmem:[#allocation74_spill] sm:$0xff] %v5798_v4  ;;  %7782 = vst [vmem:[#allocation75_spill] sm:$0xff] %v5800_v35  ;;  %v2225_v60 = vadd.f32 %v2177_v18, %v2125_v2  ;;  %v2378_v48 = vmul.f32 %v5049_v25, %v1586_v5  ;;  %v7784_v18 = vld [vmem:[#allocation65_spill] sm:$0xff]  ;;  %v7791_v3 = vrot.slane %v5399_v19, 2 }
 0x1b0   : > { %4002 = vmatmul.mubr.bf16.gmra.mrb[8].mxu1 %v2617_v12  ;;  %v2226_v45 = vadd.f32 %v2178_v0, %v2126_v47  ;;  %v853_v1 = vadd.f32 %v5575_v43, %v5529_v56  ;;  %v856_v29 = vadd.f32 %v5575_v43, %v5549_v54  ;;  %v7783_v12 = vrot.slane %v5508_v41, 1 }
 0x1b1   : > { %v2325_v58 = vadd.f32 %v2277_v6, %v2225_v60  ;;  %v7785_v2 = vrot.slane %v7784_v18, 1  ;;  %v7787_v0 = vrot.slane %v5399_v19, 1  ;;  %v7788_v56 = vrot.slane %v5508_v41, 2  ;;  %v4372_v6 = vld [vmem:[%s7516_s7 + $0x10] sm:$0xff]  }
 0x1b2   : > { %v7789_v42 = vrot.slane %v7784_v18, 2  ;;  %v2326_v60 = vadd.f32 %v2278_v31, %v2226_v45  ;;  %4045 = vmatprep.subr.bf16.mxu1 %v4372_v6  ;;  %v1927_v35 = vadd.f32 %v7796_v37, %v7795_v10 }
 0x1b3   : > { %v1475_v25 = vsel %vm1443_vm1, %v7785_v2, %v7783_v12  ;;  %v7786_v5 = vmov %v7785_v2  ;;  %v983_v12 = vmax.f32 %v853_v1, 0.0  ;;  %v984_v2 = vmax.f32 %v856_v29, 0.0  ;;  %v5844_v1 = vpop.f32.mrb[76].mxu0  ;;  %4046 = vmatpush3.bf16.msra.mxu1 %v4372_v6  ;;  %v7801_v6 = vld [vmem:[#allocation56_spill] sm:$0xff] }
 0x1b4   : > { %v1476_v47 = vsel %vm1443_vm1, %v7787_v0, %v7786_v5  ;;  %v5828_v54 = vsel %vm1552_vm2, %v7789_v42, %v7788_v56  ;;  %v7790_v8 = vmov %v7789_v42  ;;  %v2425_v0 = vadd.f32 %v2377_v36, %v2325_v58  ;;  %7792 = vst [vmem:[#allocation65_spill] sm:$0xff] %v5844_v1  ;;  %v3947_v57 = vpop.f32.mrb[77].mxu0  ;;  %v7802_v1 = vld [vmem:[#allocation63_spill] sm:$0xff] }
 0x1b5   : > { %v1585_v5 = vsel %vm1552_vm2, %v7791_v3, %v7790_v8  ;;  %v1685_v55 = vmul.f32 %v4811_v21, %v1476_v47  ;;  %v1686_v56 = vmul.f32 %v4811_v21, %v1475_v25  ;;  %v2426_v4 = vadd.f32 %v2378_v48, %v2326_v60  ;;  %v7793_v3 = vld [vmem:[#allocation66_spill] sm:$0xff]  ;;  %v7794_v8 = vld [vmem:[#allocation68_spill] sm:$0xff]  ;;  %v5861_v63 = vpop.f32.mrb[78].mxu0 }
 0x1b6   : > { %v1785_v42 = vmul.f32 %v4813_v20, %v1585_v5  ;;  %v1037_v28 = vmin.f32 %v983_v12, 6.0  ;;  %v1038_v45 = vmin.f32 %v984_v2, 6.0  ;;  %v1786_v31 = vmul.f32 %v4813_v20, %v5828_v54  ;;  %v7797_v60 = vld [vmem:[#allocation34_spill] sm:$0xff]  ;;  %v7798_v2 = vld [vmem:[#allocation41_spill] sm:$0xff]  ;;  %7803 = vst [vmem:[#allocation68_spill] sm:$0xff] %v5861_v63 }
 0x1b7   : > { %v2480_v29 = vadd.f32 %v5093_v62, %v2425_v0  ;;  %v1733_v36 = vadd.f32 %v1685_v55, %v7793_v3  ;;  %v1734_v58 = vadd.f32 %v1686_v56, %v7794_v8  ;;  %v2481_v48 = vadd.f32 %v5093_v62, %v2426_v4  ;;  %v3948_v62 = vpop.f32.mrb[79].mxu0 }
 0x1b8   : > { %v5853_v12 = vmul.f32 %v7797_v60, %v1037_v28  ;;  %v7799_v24 = vunpack.i.l.bf16 %v7798_v2  ;;  %v1928_v0 = vadd.f32 %v7802_v1, %v7801_v6  ;;  %v5897_v6 = vmul.f32 %v4829_v32, %v1585_v5 }
 0x1b9   : > { %v2528_v55 = vmax.f32 %v2480_v29, 0.0  ;;  %v5864_v3 = vadd.f32 %v1785_v42, %v1733_v36  ;;  %v5866_v37 = vadd.f32 %v1786_v31, %v1734_v58  ;;  %v2529_v10 = vmax.f32 %v2481_v48, 0.0  ;;  %v5904_v29 = vpop.f32.mrb[80].mxu0 }
 0x1ba   : > { %v5857_v30 = vmul.f32 %v7799_v24, %v1038_v45  ;;  %v5871_v24 = vmul.f32 %v4822_v15, %v1476_v47  ;;  %v5875_v45 = vmul.f32 %v4809_v22, %v5853_v12  ;;  %v5879_v42 = vmul.f32 %v4820_v16, %v5853_v12  ;;  %7808 = vst [vmem:[#allocation56_spill] sm:$0xff] %v5904_v29 }
 0x1bb   : > { %v2576_v4 = vmin.f32 %v2528_v55, 6.0  ;;  %v2577_v1 = vmin.f32 %v2529_v10, 6.0  ;;  %v5892_v58 = vmul.f32 %v4822_v15, %v1475_v25  ;;  %v2027_v48 = vadd.f32 %v5670_v38, %v1927_v35  ;;  %v5912_v35 = vld [vmem:[%s7512_s3 + $0x8] ss:$0 sm:$0xff] }
 0x1bc   : > { %7800 = vst [vmem:[#allocation66_spill] sm:$0xff] %v5857_v30  ;;  %7804 = vst [vmem:[#allocation55_spill] sm:$0xff] %v5875_v45  ;;  %v5885_v36 = vmul.f32 %v4809_v22, %v5857_v30  ;;  %v5889_v8 = vmul.f32 %v4820_v16, %v5857_v30  ;;  %v2028_v60 = vadd.f32 %v5772_v14, %v1928_v0  ;;  %v3951_v0 = vpop.f32.mrb[81].mxu0  ;;  %v7816_v28 = vrot.slane %v5508_v41, 1  ;;  %v7825_v30 = vld [vmem:[#allocation35_spill] sm:$0xff] }
 0x1bd   : > { %7805 = vst [vmem:[#allocation62_spill] sm:$0xff] %v5879_v42  ;;  %v2618_v55 = vpack.c.bf16 %v2577_v1, %v2576_v4  ;;  %v2179_v62 = vmul.f32 %v4826_v13, %v5399_v19  ;;  %v2180_v10 = vmul.f32 %v4826_v13, %v7784_v18  ;;  %v2279_v56 = vmul.f32 %v4836_v33, %v1476_v47  ;;  %v7809_v47 = vld [vmem:[#allocation70_spill] sm:$0xff]  ;;  %v7812_v1 = vld [vmem:[#allocation53_spill] sm:$0xff]  ;;  %v5927_v57 = vpop.f32.mrb[82].mxu0 }
 0x1be   : > { %7806 = vst [vmem:[#allocation34_spill] sm:$0xff] %v5885_v36  ;;  %7807 = vst [vmem:[#allocation41_spill] sm:$0xff] %v5889_v8  ;;  %v2127_v31 = vadd.f32 %v5721_v51, %v2027_v48  ;;  %v2128_v38 = vadd.f32 %v5780_v11, %v2028_v60  ;;  %v2280_v14 = vmul.f32 %v4836_v33, %v1475_v25  ;;  %v7810_v51 = vld [vmem:[#allocation71_spill] sm:$0xff]  ;;  %v7811_v25 = vrot.slane %v5622_v23, 1 }
 0x1bf   : > { %v2379_v19 = vmul.f32 %v5912_v35, %v1585_v5  ;;  %4005 = vmatprep.mubr.bf16.mxu1 %v2618_v55  ;;  %v2380_v18 = vmul.f32 %v5912_v35, %v5828_v54  ;;  %v861_v4 = vadd.f32 %v5575_v43, %v7809_v47  ;;  %v864_v11 = vadd.f32 %v5575_v43, %v7810_v51 }
 0x1c0   : > { %v7813_v48 = vrot.slane %v7812_v1, 1  ;;  %7814 = vst [vmem:[#allocation63_spill] sm:$0xff] %v5927_v57  ;;  %v2227_v5 = vadd.f32 %v2179_v62, %v2127_v31  ;;  %v2228_v55 = vadd.f32 %v2180_v10, %v2128_v38  ;;  %v7817_v51 = vrot.slane %v5622_v23, 2  ;;  %v4373_v31 = vld [vmem:[%s7516_s7 + $0x18] sm:$0xff]  }
 0x1c1   : > { %v7818_v40 = vrot.slane %v7812_v1, 2  ;;  %v985_v62 = vmax.f32 %v861_v4, 0.0  ;;  %v986_v10 = vmax.f32 %v864_v11, 0.0  ;;  %4047 = vmatprep.subr.bf16.mxu1 %v4373_v31  ;;  %v7821_v4 = vld [vmem:[#allocation50_spill] sm:$0xff] }
 0x1c2   : > { %v1473_v60 = vsel %vm1443_vm1, %v7813_v48, %v7811_v25  ;;  %v7815_v0 = vmov %v7813_v48  ;;  %v3952_v25 = vpop.f32.mrb[83].mxu0  ;;  %v7820_v48 = vrot.slane %v5508_v41, 2  ;;  %v2327_v57 = vadd.f32 %v2279_v56, %v2227_v5  ;;  %4048 = vmatpush3.bf16.msra.mxu1 %v4373_v31  ;;  %v7823_v56 = vld [vmem:[#allocation64_spill] sm:$0xff] }
 0x1c3   : > { %v1474_v47 = vsel %vm1443_vm1, %v7816_v28, %v7815_v0  ;;  %v5941_v8 = vsel %vm1552_vm2, %v7818_v40, %v7817_v51  ;;  %v7819_v38 = vmov %v7818_v40  ;;  %v2328_v29 = vadd.f32 %v2280_v14, %v2228_v55  ;;  %v5972_v31 = vpop.f32.mrb[84].mxu0 }
 0x1c4   : > { %v1583_v28 = vsel %vm1552_vm2, %v7820_v48, %v7819_v38  ;;  %v1687_v0 = vmul.f32 %v4811_v21, %v1474_v47  ;;  %v1688_v40 = vmul.f32 %v4811_v21, %v1473_v60  ;;  %v1039_v25 = vmin.f32 %v985_v62, 6.0  ;;  %v7822_v38 = vld [vmem:[#allocation58_spill] sm:$0xff]  ;;  %7827 = vst [vmem:[#allocation70_spill] sm:$0xff] %v5972_v31  ;;  %v7865_v31 = vld [vmem:[#allocation59_spill] sm:$0xff] }
 0x1c5   : > { %v1787_v51 = vmul.f32 %v4813_v20, %v1583_v28  ;;  %v1040_v42 = vmin.f32 %v986_v10, 6.0  ;;  %v1788_v63 = vmul.f32 %v4813_v20, %v5941_v8  ;;  %v2427_v36 = vadd.f32 %v2379_v19, %v2327_v57 }
 0x1c6   : > { %v1735_v11 = vadd.f32 %v1687_v0, %v7821_v4  ;;  %v2428_v45 = vadd.f32 %v2380_v18, %v2328_v29  ;;  %v1736_v48 = vadd.f32 %v1688_v40, %v7822_v38  ;;  %v1929_v14 = vadd.f32 %v7823_v56, %v5634_v44  ;;  %v7826_v0 = vld [vmem:[#allocation67_spill] sm:$0xff]  ;;  %v3955_v29 = vpop.f32.mrb[85].mxu0 }
 0x1c7   : > { %v7824_v5 = vunpack.i.h.bf16 %v7798_v2  ;;  %v5966_v62 = vmul.f32 %v7825_v30, %v1040_v42  ;;  %v1930_v4 = vadd.f32 %v7826_v0, %v5636_v39  ;;  %v5976_v57 = vmul.f32 %v4829_v32, %v5828_v54  ;;  %v5981_v44 = vld [vmem:[%s7513_s4] ss:$0 sm:$0xff]  ;;  %v5996_v40 = vpop.f32.mrb[86].mxu0 }
 0x1c8   : > { %v5968_v10 = vadd.f32 %v1787_v51, %v1735_v11  ;;  %v2482_v2 = vadd.f32 %v5981_v44, %v2427_v36  ;;  %v2483_v30 = vadd.f32 %v5981_v44, %v2428_v45  ;;  %v5985_v42 = vadd.f32 %v1788_v63, %v1736_v48  ;;  %7828 = vst [vmem:[#allocation71_spill] sm:$0xff] %v5996_v40  ;;  %v7844_v40 = vld [vmem:[#allocation36_spill] sm:$0xff] }
 0x1c9   : > { %v5963_v55 = vmul.f32 %v7824_v5, %v1039_v25  ;;  %v5994_v18 = vmul.f32 %v4822_v15, %v1474_v47  ;;  %v3956_v25 = vpop.f32.mrb[87].mxu0  ;;  %v6006_v38 = vmul.f32 %v4809_v22, %v5966_v62  ;;  %v6010_v48 = vmul.f32 %v4820_v16, %v5966_v62 }
 0x1ca   : > { %v2530_v51 = vmax.f32 %v2482_v2, 0.0  ;;  %v2531_v36 = vmax.f32 %v2483_v30, 0.0  ;;  %v2029_v56 = vadd.f32 %v5776_v46, %v1929_v14  ;;  %v6014_v2 = vmul.f32 %v4822_v15, %v1473_v60 }
 0x1cb   : > { %v5991_v54 = vmul.f32 %v4809_v22, %v5963_v55  ;;  %v6000_v63 = vmul.f32 %v4820_v16, %v5963_v55  ;;  %7830 = vst [vmem:[#allocation50_spill] sm:$0xff] %v6010_v48  ;;  %v2030_v30 = vadd.f32 %v5871_v24, %v1930_v4  ;;  %v6018_v29 = vmul.f32 %v4829_v32, %v1583_v28 }
 0x1cc   : > { %v2578_v5 = vmin.f32 %v2530_v51, 6.0  ;;  %v2579_v0 = vmin.f32 %v2531_v36, 6.0  ;;  %v2129_v25 = vadd.f32 %v5793_v9, %v2029_v56  ;;  %v2181_v11 = vmul.f32 %v4826_v13, %v5508_v41  ;;  %v6033_v41 = vpop.f32.mrb[88].mxu0 }
 0x1cd   : > { %7829 = vst [vmem:[#allocation53_spill] sm:$0xff] %v6000_v63  ;;  %v2182_v45 = vmul.f32 %v4826_v13, %v7812_v1  ;;  %v2130_v46 = vadd.f32 %v5897_v6, %v2030_v30  ;;  %v2281_v14 = vmul.f32 %v4836_v33, %v1474_v47  ;;  %v2282_v51 = vmul.f32 %v4836_v33, %v1473_v60 }
 0x1ce   : > { %v2619_v19 = vpack.c.bf16 %v2579_v0, %v2578_v5  ;;  %v2229_v36 = vadd.f32 %v2181_v11, %v2129_v25  ;;  %v2381_v24 = vmul.f32 %v5912_v35, %v1583_v28  ;;  %v2382_v4 = vmul.f32 %v5912_v35, %v5941_v8  ;;  %7831 = vst [vmem:[#allocation58_spill] sm:$0xff] %v6033_v41  ;;  %v3959_v5 = vpop.f32.mrb[89].mxu0 }
 0x1cf   : > { %v869_v9 = vadd.f32 %v5575_v43, %v5665_v59  ;;  %v2230_v1 = vadd.f32 %v2182_v45, %v2130_v46  ;;  %v872_v6 = vadd.f32 %v5575_v43, %v5679_v50  ;;  %v7832_v47 = vrot.slane %v5730_v17, 1 }
 0x1d0   : > { %4006 = vmatmul.mubr.bf16.gmra.mrb[12].mxu1 %v2619_v19  ;;  %v7833_v60 = vrot.slane %v5626_v26, 1  ;;  %v7835_v56 = vrot.slane %v5622_v23, 1  ;;  %v2329_v19 = vadd.f32 %v2281_v14, %v2229_v36  ;;  %v7836_v0 = vrot.slane %v5730_v17, 2 }
 0x1d1   : > { %v987_v45 = vmax.f32 %v869_v9, 0.0  ;;  %v7837_v50 = vrot.slane %v5626_v26, 2  ;;  %v7839_v46 = vrot.slane %v5622_v23, 2  ;;  %v988_v14 = vmax.f32 %v872_v6, 0.0 }
 0x1d2   : > { %v1471_v28 = vsel %vm1443_vm1, %v7833_v60, %v7832_v47  ;;  %v7834_v11 = vmov %v7833_v60  ;;  %v6063_v60 = vpop.f32.mrb[90].mxu0  ;;  %v2429_v5 = vadd.f32 %v2381_v24, %v2329_v19  ;;  %v7843_v19 = vld [vmem:[#allocation32_spill] sm:$0xff]  ;;  %v1934_v63 = vadd.f32 %v7865_v31, %v5866_v37 }
 0x1d3   : > { %v1472_v59 = vsel %vm1443_vm1, %v7835_v56, %v7834_v11  ;;  %v6055_v30 = vsel %vm1552_vm2, %v7837_v50, %v7836_v0  ;;  %v7838_v25 = vmov %v7837_v50  ;;  %7840 = vst [vmem:[#allocation64_spill] sm:$0xff] %v6063_v60  ;;  %v2330_v11 = vadd.f32 %v2282_v51, %v2230_v1  ;;  %v3960_v56 = vpop.f32.mrb[91].mxu0  ;;  %v7841_v1 = vld [vmem:[#allocation44_spill] sm:$0xff] }
 0x1d4   : > { %v1581_v47 = vsel %vm1552_vm2, %v7839_v46, %v7838_v25  ;;  %v1689_v36 = vmul.f32 %v4811_v21, %v1472_v59  ;;  %v1690_v9 = vmul.f32 %v4811_v21, %v1471_v28  ;;  %v1041_v39 = vmin.f32 %v987_v45, 6.0  ;;  %v7842_v56 = vld [vmem:[#allocation69_spill] sm:$0xff] }
 0x1d5   : > { %v1789_v0 = vmul.f32 %v4813_v20, %v1581_v47  ;;  %v1790_v50 = vmul.f32 %v4813_v20, %v6055_v30  ;;  %v2430_v41 = vadd.f32 %v2382_v4, %v2330_v11  ;;  %v1042_v48 = vmin.f32 %v988_v14, 6.0 }
 0x1d6   : > { %v1737_v25 = vadd.f32 %v1689_v36, %v5646_v34  ;;  %v1738_v46 = vadd.f32 %v1690_v9, %v5656_v61  ;;  %v2484_v51 = vadd.f32 %v5981_v44, %v2429_v5  ;;  %v6074_v6 = vmul.f32 %v7841_v1, %v1041_v39 }
 0x1d7   : > { %v1931_v24 = vadd.f32 %v7842_v56, %v5744_v49  ;;  %v1932_v45 = vadd.f32 %v7843_v19, %v5769_v52  ;;  %v2485_v60 = vadd.f32 %v5981_v44, %v2430_v41  ;;  %v7845_v4 = vunpack.i.l.bf16 %v7844_v40  ;;  %v6095_v52 = vpop.f32.mrb[92].mxu0 }
 0x1d8   : > { %v6085_v34 = vadd.f32 %v1789_v0, %v1737_v25  ;;  %v6087_v61 = vadd.f32 %v1790_v50, %v1738_v46  ;;  %v6091_v39 = vmul.f32 %v4829_v32, %v5941_v8  ;;  %v2532_v14 = vmax.f32 %v2484_v51, 0.0  ;;  %7846 = vst [vmem:[#allocation35_spill] sm:$0xff] %v6095_v52  ;;  %v3963_v8 = vpop.f32.mrb[93].mxu0 }
 0x1d9   : > { %v6083_v11 = vmul.f32 %v7845_v4, %v1042_v48  ;;  %v2533_v41 = vmax.f32 %v2485_v60, 0.0  ;;  %v6099_v48 = vmul.f32 %v4809_v22, %v6074_v6  ;;  %v6103_v9 = vmul.f32 %v4820_v16, %v6074_v6  ;;  %v6115_v46 = vpop.f32.mrb[94].mxu0 }
 0x1da   : > { %v2580_v0 = vmin.f32 %v2532_v14, 6.0  ;;  %7849 = vst [vmem:[#allocation69_spill] sm:$0xff] %v6115_v46  ;;  %v6118_v1 = vmul.f32 %v4822_v15, %v1472_v59  ;;  %v2031_v56 = vadd.f32 %v5892_v58, %v1931_v24  ;;  %v2032_v19 = vadd.f32 %v5994_v18, %v1932_v45  ;;  %v3964_v4 = vpop.f32.mrb[95].mxu0 }
 0x1db   : > { %7847 = vst [vmem:[#allocation67_spill] sm:$0xff] %v6103_v9  ;;  %v6109_v25 = vmul.f32 %v4809_v22, %v6083_v11  ;;  %v6113_v60 = vmul.f32 %v4820_v16, %v6083_v11  ;;  %v2581_v51 = vmin.f32 %v2533_v41, 6.0  ;;  %v6123_v14 = vmul.f32 %v4822_v15, %v1471_v28 }
 0x1dc   : > { %v6126_v8 = vmul.f32 %v4829_v32, %v1581_v47  ;;  %v2183_v50 = vmul.f32 %v4826_v13, %v5622_v23  ;;  %v2184_v41 = vmul.f32 %v4826_v13, %v5626_v26  ;;  %v2131_v36 = vadd.f32 %v5976_v57, %v2031_v56 }
 0x1dd   : > { %7848 = vst [vmem:[#allocation44_spill] sm:$0xff] %v6113_v60  ;;  %v2620_v5 = vpack.c.bf16 %v2581_v51, %v2580_v0  ;;  %v2132_v58 = vadd.f32 %v6018_v29, %v2032_v19  ;;  %v2283_v18 = vmul.f32 %v4836_v33, %v1472_v59  ;;  %v2284_v24 = vmul.f32 %v4836_v33, %v1471_v28  ;;  %v7851_v0 = vld [vmem:[#allocation33_spill] sm:$0xff] }
 0x1de   : > { %v2383_v45 = vmul.f32 %v5912_v35, %v1581_v47  ;;  %v2384_v4 = vmul.f32 %v5912_v35, %v6055_v30  ;;  %v877_v23 = vadd.f32 %v5575_v43, %v5725_v53  ;;  %v2231_v49 = vadd.f32 %v2183_v50, %v2131_v36 }
 0x1df   : > { %4009 = vmatprep.mubr.bf16.mxu1 %v2620_v5  ;;  %v2232_v26 = vadd.f32 %v2184_v41, %v2132_v58  ;;  %v880_v57 = vadd.f32 %v5575_v43, %v5737_v7  ;;  %v7850_v29 = vrot.slane %v5853_v12, 1  ;;  %v7852_v59 = vrot.slane %v7851_v0, 1  ;;  %v6169_v58 = vpop.f32.mrb[96].mxu0 }
 0x1e0   : > { %v989_v47 = vmax.f32 %v877_v23, 0.0  ;;  %v7854_v56 = vrot.slane %v5730_v17, 1  ;;  %v7855_v36 = vrot.slane %v5853_v12, 2  ;;  %v7856_v5 = vrot.slane %v7851_v0, 2  ;;  %7859 = vst [vmem:[#allocation32_spill] sm:$0xff] %v6169_v58 }
 0x1e1   : > { %v1469_v28 = vsel %vm1443_vm1, %v7852_v59, %v7850_v29  ;;  %v7853_v51 = vmov %v7852_v59  ;;  %v7858_v19 = vrot.slane %v5730_v17, 2  ;;  %v2331_v23 = vadd.f32 %v2283_v18, %v2231_v49  ;;  %v7861_v49 = vld [vmem:[#allocation54_spill] sm:$0xff] }
 0x1e2   : > { %v1470_v53 = vsel %vm1443_vm1, %v7854_v56, %v7853_v51  ;;  %v6161_v7 = vsel %vm1552_vm2, %v7856_v5, %v7855_v36  ;;  %v7857_v50 = vmov %v7856_v5  ;;  %v2332_v29 = vadd.f32 %v2284_v24, %v2232_v26  ;;  %v3967_v56 = vpop.f32.mrb[97].mxu0 }
 0x1e3   : > { %v1579_v41 = vsel %vm1552_vm2, %v7858_v19, %v7857_v50  ;;  %v990_v59 = vmax.f32 %v880_v57, 0.0  ;;  %v1691_v51 = vmul.f32 %v4811_v21, %v1470_v53  ;;  %v6174_v46 = vmul.f32 %v4829_v32, %v6055_v30  ;;  %v6178_v60 = vpop.f32.mrb[98].mxu0  ;;  %v7863_v56 = vld [vmem:[#allocation60_spill] sm:$0xff] }
 0x1e4   : > { %v1043_v36 = vmin.f32 %v989_v47, 6.0  ;;  %v1692_v5 = vmul.f32 %v4811_v21, %v1469_v28  ;;  %v1791_v52 = vmul.f32 %v4813_v20, %v1579_v41  ;;  %7860 = vst [vmem:[#allocation36_spill] sm:$0xff] %v6178_v60  ;;  %v2431_v50 = vadd.f32 %v2383_v45, %v2331_v23  ;;  %v3968_v24 = vpop.f32.mrb[99].mxu0  ;;  %v7864_v47 = vld [vmem:[#allocation51_spill] sm:$0xff] }
 0x1e5   : > { %v2432_v19 = vadd.f32 %v2384_v4, %v2332_v29  ;;  %v1044_v58 = vmin.f32 %v990_v59, 6.0  ;;  %v1739_v18 = vadd.f32 %v1691_v51, %v7861_v49  ;;  %v7862_v26 = vunpack.i.h.bf16 %v7844_v40  ;;  %v7866_v4 = vld [vmem:[#allocation46_spill] sm:$0xff]  ;;  %v4374_v40 = vld [vmem:[%s7516_s7 + $0x20] sm:$0xff]  }
 0x1e6   : > { %v1740_v30 = vadd.f32 %v1692_v5, %v7863_v56  ;;  %v1933_v9 = vadd.f32 %v7864_v47, %v5864_v3  ;;  %v2486_v60 = vadd.f32 %v5981_v44, %v2431_v50  ;;  %v1792_v31 = vmul.f32 %v4813_v20, %v6161_v7  ;;  %4049 = vmatprep.subr.bf16.mxu1 %v4374_v40 }
 0x1e7   : > { %v6183_v57 = vmul.f32 %v7862_v26, %v1043_v36  ;;  %v2487_v45 = vadd.f32 %v5981_v44, %v2432_v19  ;;  %v6193_v23 = vmul.f32 %v7866_v4, %v1044_v58  ;;  %v6195_v29 = vadd.f32 %v1791_v52, %v1739_v18  ;;  %4050 = vmatpush3.bf16.msra.mxu1 %v4374_v40 }
 0x1e8   : > { %v2534_v51 = vmax.f32 %v2486_v60, 0.0  ;;  %v6222_v49 = vadd.f32 %v1792_v31, %v1740_v30  ;;  %v6224_v60 = vpop.f32.mrb[100].mxu0  ;;  %v6227_v26 = vmul.f32 %v4822_v15, %v1470_v53  ;;  %v2033_v56 = vadd.f32 %v6014_v2, %v1933_v9 }
 0x1e9   : > { %7867 = vst [vmem:[#allocation33_spill] sm:$0xff] %v6193_v23  ;;  %v6204_v37 = vmul.f32 %v4809_v22, %v6183_v57  ;;  %v2535_v58 = vmax.f32 %v2487_v45, 0.0  ;;  %v6210_v52 = vmul.f32 %v4820_v16, %v6183_v57  ;;  %v6216_v50 = vmul.f32 %v4809_v22, %v6193_v23  ;;  %7873 = vst [vmem:[#allocation76_spill] sm:$0xff] %v6224_v60  ;;  %v3971_v47 = vpop.f32.mrb[101].mxu0 }
 0x1ea   : > { %v6220_v19 = vmul.f32 %v4820_v16, %v6193_v23  ;;  %7872 = vst [vmem:[#allocation46_spill] sm:$0xff] %v6222_v49  ;;  %v2582_v18 = vmin.f32 %v2534_v51, 6.0  ;;  %v6231_v45 = vmul.f32 %v4822_v15, %v1469_v28  ;;  %v2034_v4 = vadd.f32 %v6118_v1, %v1934_v63  ;;  %v6239_v40 = vpop.f32.mrb[102].mxu0  ;;  %v7891_v49 = vld [vmem:[#allocation48_spill] sm:$0xff] }
 0x1eb   : > { %7868 = vst [vmem:[#allocation54_spill] sm:$0xff] %v6204_v37  ;;  %7869 = vst [vmem:[#allocation60_spill] sm:$0xff] %v6210_v52  ;;  %v2583_v24 = vmin.f32 %v2535_v58, 6.0  ;;  %v6235_v5 = vmul.f32 %v4829_v32, %v1579_v41  ;;  %v2185_v30 = vmul.f32 %v4826_v13, %v5730_v17  ;;  %v2133_v51 = vadd.f32 %v6091_v39, %v2033_v56  ;;  %v3972_v58 = vpop.f32.mrb[103].mxu0  ;;  %v7878_v56 = vld [vmem:[#allocation66_spill] sm:$0xff]  ;;  %v7886_v52 = vld [vmem:[#allocation55_spill] sm:$0xff] }
 0x1ec   : > { %7870 = vst [vmem:[#allocation51_spill] sm:$0xff] %v6216_v50  ;;  %7871 = vst [vmem:[#allocation59_spill] sm:$0xff] %v6220_v19  ;;  %v2186_v2 = vmul.f32 %v4826_v13, %v7851_v0  ;;  %v2285_v9 = vmul.f32 %v4836_v33, %v1470_v53  ;;  %v2134_v47 = vadd.f32 %v6126_v8, %v2034_v4  ;;  %v7877_v53 = vrot.slane %v5963_v55, 1 }
 0x1ed   : > { %7874 = vst [vmem:[#allocation77_spill] sm:$0xff] %v6239_v40  ;;  %v2621_v31 = vpack.c.bf16 %v2583_v24, %v2582_v18  ;;  %v2286_v63 = vmul.f32 %v4836_v33, %v1469_v28  ;;  %v2385_v1 = vmul.f32 %v5912_v35, %v1579_v41  ;;  %v2386_v17 = vmul.f32 %v5912_v35, %v6161_v7  ;;  %v7875_v18 = vld [vmem:[#allocation72_spill] sm:$0xff]  ;;  %v7876_v24 = vld [vmem:[#allocation75_spill] sm:$0xff] }
 0x1ee   : > { %v2233_v36 = vadd.f32 %v2185_v30, %v2133_v51  ;;  %v885_v39 = vadd.f32 %v5575_v43, %v7875_v18  ;;  %v888_v0 = vadd.f32 %v5575_v43, %v7876_v24  ;;  %v7879_v58 = vrot.slane %v7878_v56, 1 }
 0x1ef   : > { %4010 = vmatmul.mubr.bf16.gmra.mrb[16].mxu1 %v2621_v31  ;;  %v2234_v28 = vadd.f32 %v2186_v2, %v2134_v47  ;;  %v7881_v4 = vrot.slane %v5853_v12, 1  ;;  %v7882_v31 = vrot.slane %v5963_v55, 2  ;;  %v7883_v51 = vrot.slane %v7878_v56, 2 }
 0x1f0   : > { %v1467_v8 = vsel %vm1443_vm1, %v7879_v58, %v7877_v53  ;;  %v7880_v41 = vmov %v7879_v58  ;;  %v7885_v53 = vrot.slane %v5853_v12, 2  ;;  %v2333_v47 = vadd.f32 %v2285_v9, %v2233_v36  ;;  %v7888_v9 = vld [vmem:[#allocation61_spill] sm:$0xff] }
 0x1f1   : > { %v1468_v30 = vsel %vm1443_vm1, %v7881_v4, %v7880_v41  ;;  %v6272_v18 = vsel %vm1552_vm2, %v7883_v51, %v7882_v31  ;;  %v7884_v24 = vmov %v7883_v51  ;;  %v991_v58 = vmax.f32 %v885_v39, 0.0 }
 0x1f2   : > { %v1577_v2 = vsel %vm1552_vm2, %v7885_v53, %v7884_v24  ;;  %v992_v3 = vmax.f32 %v888_v0, 0.0  ;;  %v1693_v41 = vmul.f32 %v4811_v21, %v1468_v30  ;;  %v2334_v4 = vadd.f32 %v2286_v63, %v2234_v28  ;;  %v7887_v24 = vld [vmem:[#allocation34_spill] sm:$0xff]  ;;  %v7889_v63 = vld [vmem:[#allocation57_spill] sm:$0xff] }
 0x1f3   : > { %v1694_v59 = vmul.f32 %v4811_v21, %v1467_v8  ;;  %v1793_v40 = vmul.f32 %v4813_v20, %v1577_v2  ;;  %v1794_v31 = vmul.f32 %v4813_v20, %v6272_v18  ;;  %v2433_v51 = vadd.f32 %v2385_v1, %v2333_v47  ;;  %v7890_v53 = vld [vmem:[#allocation38_spill] sm:$0xff] }
 0x1f4   : > { %v1045_v60 = vmin.f32 %v991_v58, 6.0  ;;  %v1046_v19 = vmin.f32 %v992_v3, 6.0  ;;  %v1741_v50 = vadd.f32 %v1693_v41, %v7886_v52  ;;  %v2434_v37 = vadd.f32 %v2386_v17, %v2334_v4 }
 0x1f5   : > { %v1742_v36 = vadd.f32 %v1694_v59, %v7887_v24  ;;  %v1935_v39 = vadd.f32 %v7888_v9, %v5968_v10  ;;  %v1936_v0 = vadd.f32 %v7889_v63, %v5985_v42  ;;  %v2488_v28 = vadd.f32 %v5981_v44, %v2433_v51  ;;  %v4375_v24 = vld [vmem:[%s7516_s7 + $0x28] sm:$0xff]  }
 0x1f6   : > { %v6293_v23 = vmul.f32 %v7890_v53, %v1045_v60  ;;  %v7892_v1 = vunpack.i.l.bf16 %v7891_v49  ;;  %v6299_v3 = vadd.f32 %v1793_v40, %v1741_v50  ;;  %v6303_v59 = vmul.f32 %v4829_v32, %v6161_v7  ;;  %4051 = vmatprep.subr.bf16.mxu1 %v4375_v24  ;;  %v7897_v40 = vld [vmem:[#allocation65_spill] sm:$0xff] }
 0x1f7   : > { %v2489_v10 = vadd.f32 %v5981_v44, %v2434_v37  ;;  %v6306_v52 = vadd.f32 %v1794_v31, %v1742_v36  ;;  %v6309_v42 = vmul.f32 %v4822_v15, %v1468_v30  ;;  %v2536_v17 = vmax.f32 %v2488_v28, 0.0  ;;  %v6334_v36 = vpop.f32.mrb[104].mxu0  ;;  %4052 = vmatpush3.bf16.msra.mxu1 %v4375_v24 }
 0x1f8   : > { %v6297_v47 = vmul.f32 %v7892_v1, %v1046_v19  ;;  %v6314_v19 = vmul.f32 %v4822_v15, %v1467_v8  ;;  %v6318_v7 = vmul.f32 %v4809_v22, %v6293_v23  ;;  %v6322_v37 = vmul.f32 %v4820_v16, %v6293_v23  ;;  %7894 = vst [vmem:[#allocation75_spill] sm:$0xff] %v6334_v36  ;;  %v3975_v1 = vpop.f32.mrb[105].mxu0 }
 0x1f9   : > { %v2537_v50 = vmax.f32 %v2489_v10, 0.0  ;;  %v2584_v41 = vmin.f32 %v2536_v17, 6.0  ;;  %v2035_v51 = vadd.f32 %v6123_v14, %v1935_v39  ;;  %v2036_v28 = vadd.f32 %v6227_v26, %v1936_v0 }
 0x1fa   : > { %7893 = vst [vmem:[#allocation72_spill] sm:$0xff] %v6322_v37  ;;  %v6328_v31 = vmul.f32 %v4809_v22, %v6297_v47  ;;  %v6338_v63 = vmul.f32 %v4820_v16, %v6297_v47  ;;  %v6342_v53 = vmul.f32 %v4829_v32, %v1577_v2  ;;  %v2187_v14 = vmul.f32 %v4826_v13, %v5853_v12  ;;  %v7929_v37 = vld [vmem:[#allocation53_spill] sm:$0xff] }
 0x1fb   : > { %v2585_v9 = vmin.f32 %v2537_v50, 6.0  ;;  %v2135_v10 = vadd.f32 %v6174_v46, %v2035_v51  ;;  %v2188_v39 = vmul.f32 %v4826_v13, %v7878_v56  ;;  %v2287_v17 = vmul.f32 %v4836_v33, %v1468_v30  ;;  %v6350_v50 = vpop.f32.mrb[106].mxu0  ;;  %v7898_v30 = vld [vmem:[#allocation68_spill] sm:$0xff] }
 0x1fc   : > { %7895 = vst [vmem:[#allocation66_spill] sm:$0xff] %v6338_v63  ;;  %7896 = vst [vmem:[#allocation55_spill] sm:$0xff] %v6350_v50  ;;  %v2136_v26 = vadd.f32 %v6235_v5, %v2036_v28  ;;  %v2288_v0 = vmul.f32 %v4836_v33, %v1467_v8  ;;  %v2387_v1 = vmul.f32 %v5912_v35, %v1577_v2  ;;  %v3976_v46 = vpop.f32.mrb[107].mxu0  ;;  %v7899_v5 = vrot.slane %v6074_v6, 1  ;;  %v7928_v63 = vld [vmem:[#allocation46_spill] sm:$0xff] }
 0x1fd   : > { %v2622_v4 = vpack.c.bf16 %v2585_v9, %v2584_v41  ;;  %v2235_v51 = vadd.f32 %v2187_v14, %v2135_v10  ;;  %v2388_v12 = vmul.f32 %v5912_v35, %v6272_v18  ;;  %v893_v56 = vadd.f32 %v5575_v43, %v7897_v40 }
 0x1fe   : > { %v896_v58 = vadd.f32 %v5575_v43, %v7898_v30  ;;  %v2236_v41 = vadd.f32 %v2188_v39, %v2136_v26  ;;  %v7900_v8 = vrot.slane %v5966_v62, 1  ;;  %v7902_v9 = vrot.slane %v5963_v55, 1 }
 0x1ff   : > { %4013 = vmatprep.mubr.bf16.mxu1 %v2622_v4  ;;  %v7903_v40 = vrot.slane %v6074_v6, 2  ;;  %v7904_v43 = vrot.slane %v5966_v62, 2  ;;  %v2335_v10 = vadd.f32 %v2287_v17, %v2235_v51  ;;  %v993_v14 = vmax.f32 %v893_v56, 0.0 }
 0x200   : > { %v1465_v2 = vsel %vm1443_vm1, %v7900_v8, %v7899_v5  ;;  %v7901_v24 = vmov %v7900_v8  ;;  %v994_v39 = vmax.f32 %v896_v58, 0.0  ;;  %v7906_v46 = vrot.slane %v5963_v55, 2 }
 0x201   : > { %v1466_v28 = vsel %vm1443_vm1, %v7902_v9, %v7901_v24  ;;  %v6379_v4 = vsel %vm1552_vm2, %v7904_v43, %v7903_v40  ;;  %v7905_v26 = vmov %v7904_v43  ;;  %v2336_v5 = vadd.f32 %v2288_v0, %v2236_v41 }
 0x202   : > { %v1575_v30 = vsel %vm1552_vm2, %v7906_v46, %v7905_v26  ;;  %v1695_v8 = vmul.f32 %v4811_v21, %v1466_v28  ;;  %v1696_v24 = vmul.f32 %v4811_v21, %v1465_v2  ;;  %v2435_v60 = vadd.f32 %v2387_v1, %v2335_v10  ;;  %v7907_v26 = vld [vmem:[#allocation39_spill] sm:$0xff]  ;;  %v7909_v1 = vld [vmem:[#allocation40_spill] sm:$0xff] }
 0x203   : > { %v1795_v9 = vmul.f32 %v4813_v20, %v1575_v30  ;;  %v1047_v40 = vmin.f32 %v993_v14, 6.0  ;;  %v1048_v43 = vmin.f32 %v994_v39, 6.0  ;;  %v1796_v58 = vmul.f32 %v4813_v20, %v6379_v4  ;;  %v7910_v14 = vld [vmem:[#allocation62_spill] sm:$0xff] }
 0x204   : > { %v2436_v17 = vadd.f32 %v2388_v12, %v2336_v5  ;;  %v1743_v51 = vadd.f32 %v1695_v8, %v5991_v54  ;;  %v1744_v56 = vadd.f32 %v1696_v24, %v6006_v38  ;;  %v1937_v0 = vadd.f32 %v7907_v26, %v6085_v34 }
 0x205   : > { %v2490_v41 = vadd.f32 %v5981_v44, %v2435_v60  ;;  %v7908_v46 = vunpack.i.h.bf16 %v7891_v49  ;;  %v6402_v10 = vmul.f32 %v7909_v1, %v1048_v43  ;;  %v1938_v39 = vadd.f32 %v7910_v14, %v6087_v61 }
 0x206   : > { %v6408_v54 = vmul.f32 %v4829_v32, %v6272_v18  ;;  %v2491_v38 = vadd.f32 %v5981_v44, %v2436_v17  ;;  %v6411_v12 = vadd.f32 %v1795_v9, %v1743_v51  ;;  %v6413_v34 = vadd.f32 %v1796_v58, %v1744_v56 }
 0x207   : > { %v6399_v50 = vmul.f32 %v7908_v46, %v1047_v40  ;;  %v2538_v60 = vmax.f32 %v2490_v41, 0.0  ;;  %v6418_v8 = vmul.f32 %v4822_v15, %v1466_v28  ;;  %v6432_v58 = vmul.f32 %v4809_v22, %v6402_v10 }
 0x208   : > { %v2539_v24 = vmax.f32 %v2491_v38, 0.0  ;;  %v6436_v17 = vmul.f32 %v4820_v16, %v6402_v10  ;;  %v6439_v56 = vmul.f32 %v4822_v15, %v1465_v2  ;;  %v2037_v26 = vadd.f32 %v6231_v45, %v1937_v0 }
 0x209   : > { %v6422_v61 = vmul.f32 %v4809_v22, %v6399_v50  ;;  %v6426_v18 = vmul.f32 %v4820_v16, %v6399_v50  ;;  %v2586_v40 = vmin.f32 %v2538_v60, 6.0  ;;  %7912 = vst [vmem:[#allocation61_spill] sm:$0xff] %v6432_v58  ;;  %v2038_v41 = vadd.f32 %v6309_v42, %v1938_v39  ;;  %v7915_v39 = vld [vmem:[#allocation63_spill] sm:$0xff] }
 0x20a   : > { %7913 = vst [vmem:[#allocation57_spill] sm:$0xff] %v6436_v17  ;;  %v2587_v51 = vmin.f32 %v2539_v24, 6.0  ;;  %v6444_v46 = vmul.f32 %v4829_v32, %v1575_v30  ;;  %v2189_v1 = vmul.f32 %v4826_v13, %v5963_v55  ;;  %v2190_v14 = vmul.f32 %v4826_v13, %v5966_v62  ;;  %v6460_v55 = vld [vmem:[%s7511_s2] ss:$0 sm:$0xff]  ;;  %v7914_v62 = vld [vmem:[#allocation56_spill] sm:$0xff] }
 0x20b   : > { %7911 = vst [vmem:[#allocation34_spill] sm:$0xff] %v6426_v18  ;;  %v2289_v38 = vmul.f32 %v4836_v33, %v1466_v28  ;;  %v2137_v24 = vadd.f32 %v6303_v59, %v2037_v26  ;;  %v2138_v43 = vadd.f32 %v6342_v53, %v2038_v41  ;;  %v2290_v45 = vmul.f32 %v4836_v33, %v1465_v2 }
 0x20c   : > { %v2623_v60 = vpack.c.bf16 %v2587_v51, %v2586_v40  ;;  %v2389_v42 = vmul.f32 %v5912_v35, %v1575_v30  ;;  %v2390_v0 = vmul.f32 %v5912_v35, %v6379_v4  ;;  %v901_v28 = vadd.f32 %v6460_v55, %v7914_v62 }
 0x20d   : > { %v904_v59 = vadd.f32 %v6460_v55, %v7915_v39  ;;  %v2237_v53 = vadd.f32 %v2189_v1, %v2137_v24  ;;  %v2238_v40 = vadd.f32 %v2190_v14, %v2138_v43  ;;  %v7916_v2 = vrot.slane %v6183_v57, 1 }
 0x20e   : > { %4014 = vmatmul.mubr.bf16.gmra.mrb[20].mxu1 %v2623_v60  ;;  %v7917_v30 = vrot.slane %v6083_v11, 1  ;;  %v7919_v41 = vrot.slane %v6074_v6, 1  ;;  %v4376_v60 = vld [vmem:[%s7516_s7 + $0x30] sm:$0xff]   ;;  %v995_v1 = vmax.f32 %v901_v28, 0.0  ;;  %v7920_v14 = vrot.slane %v6183_v57, 2 }
 0x20f   : > { %v996_v43 = vmax.f32 %v904_v59, 0.0  ;;  %v7921_v24 = vrot.slane %v6083_v11, 2  ;;  %v2338_v9 = vadd.f32 %v2290_v45, %v2238_v40  ;;  %4053 = vmatprep.subr.bf16.mxu1 %v4376_v60  ;;  %v7924_v45 = vld [vmem:[#allocation37_spill] sm:$0xff]  ;;  %v7925_v40 = vld [vmem:[#allocation43_spill] sm:$0xff]  ;;  %v1940_v58 = vadd.f32 %v7929_v37, %v7928_v63 }
 0x210   : > { %v1463_v51 = vsel %vm1443_vm1, %v7917_v30, %v7916_v2  ;;  %v7918_v26 = vmov %v7917_v30  ;;  %v7923_v30 = vrot.slane %v6074_v6, 2  ;;  %v1049_v5 = vmin.f32 %v995_v1, 6.0  ;;  %4054 = vmatpush3.bf16.msra.mxu1 %v4376_v60  ;;  %v7927_v1 = vld [vmem:[#allocation41_spill] sm:$0xff] }
 0x211   : > { %v1464_v62 = vsel %vm1443_vm1, %v7919_v41, %v7918_v26  ;;  %v6487_v39 = vsel %vm1552_vm2, %v7921_v24, %v7920_v14  ;;  %v7922_v2 = vmov %v7921_v24  ;;  %v2337_v41 = vadd.f32 %v2289_v38, %v2237_v53 }
 0x212   : > { %v1573_v26 = vsel %vm1552_vm2, %v7923_v30, %v7922_v2  ;;  %v1697_v28 = vmul.f32 %v4811_v21, %v1464_v62  ;;  %v1698_v59 = vmul.f32 %v4811_v21, %v1463_v51  ;;  %v1050_v49 = vmin.f32 %v996_v43, 6.0 }
 0x213   : > { %v1797_v36 = vmul.f32 %v4813_v20, %v1573_v26  ;;  %v1798_v14 = vmul.f32 %v4813_v20, %v6487_v39  ;;  %v2437_v24 = vadd.f32 %v2389_v42, %v2337_v41  ;;  %v2438_v17 = vadd.f32 %v2390_v0, %v2338_v9  ;;  %v4377_v9 = vld [vmem:[%s7516_s7 + $0x38] sm:$0xff]  }
 0x214   : > { %v1745_v18 = vadd.f32 %v1697_v28, %v6099_v48  ;;  %v1746_v38 = vadd.f32 %v1698_v59, %v6109_v25  ;;  %v6503_v53 = vmul.f32 %v7924_v45, %v1049_v5  ;;  %v7926_v2 = vunpack.i.l.bf16 %v7925_v40  ;;  %4055 = vmatprep.subr.bf16.mxu1 %v4377_v9 }
 0x215   : > { %v1939_v43 = vadd.f32 %v7927_v1, %v6195_v29  ;;  %v2492_v48 = vadd.f32 %v5981_v44, %v2437_v24  ;;  %v2493_v25 = vadd.f32 %v5981_v44, %v2438_v17  ;;  %4056 = vmatpush3.bf16.msra.mxu1 %v4377_v9  ;;  %v6547_v28 = vmul.f32 %v4822_v15, %v1464_v62 }
 0x216   : > { %v6507_v30 = vmul.f32 %v7926_v2, %v1050_v49  ;;  %v6518_v5 = vadd.f32 %v1797_v36, %v1745_v18  ;;  %v6520_v42 = vadd.f32 %v1798_v14, %v1746_v38  ;;  %v6524_v49 = vmul.f32 %v4829_v32, %v6379_v4 }
 0x217   : > { %v6530_v63 = vmul.f32 %v4809_v22, %v6503_v53  ;;  %v2540_v0 = vmax.f32 %v2492_v48, 0.0  ;;  %v2541_v60 = vmax.f32 %v2493_v25, 0.0  ;;  %v6534_v36 = vmul.f32 %v4820_v16, %v6503_v53 }
 0x218   : > { %v6540_v17 = vmul.f32 %v4809_v22, %v6507_v30  ;;  %v6544_v41 = vmul.f32 %v4820_v16, %v6507_v30  ;;  %v2039_v24 = vadd.f32 %v6314_v19, %v1939_v43  ;;  %v2040_v38 = vadd.f32 %v6418_v8, %v1940_v58 }
 0x219   : > { %7930 = vst [vmem:[#allocation38_spill] sm:$0xff] %v6534_v36  ;;  %v2588_v59 = vmin.f32 %v2540_v0, 6.0  ;;  %v2589_v14 = vmin.f32 %v2541_v60, 6.0  ;;  %v6552_v45 = vmul.f32 %v4822_v15, %v1463_v51  ;;  %v6555_v2 = vmul.f32 %v4829_v32, %v1573_v26  ;;  %v7933_v60 = vld [vmem:[#allocation70_spill] sm:$0xff] }
 0x21a   : > { %7931 = vst [vmem:[#allocation48_spill] sm:$0xff] %v6540_v17  ;;  %7932 = vst [vmem:[#allocation65_spill] sm:$0xff] %v6544_v41  ;;  %v2191_v1 = vmul.f32 %v4826_v13, %v6074_v6  ;;  %v2192_v9 = vmul.f32 %v4826_v13, %v6083_v11  ;;  %v2139_v25 = vadd.f32 %v6408_v54, %v2039_v24  ;;  %v7944_v36 = vld [vmem:[#allocation54_spill] sm:$0xff] }
 0x21b   : > { %v2624_v48 = vpack.c.bf16 %v2589_v14, %v2588_v59  ;;  %v2140_v0 = vadd.f32 %v6444_v46, %v2040_v38  ;;  %v2291_v19 = vmul.f32 %v4836_v33, %v1464_v62  ;;  %v2292_v8 = vmul.f32 %v4836_v33, %v1463_v51  ;;  %v7934_v59 = vld [vmem:[#allocation71_spill] sm:$0xff]  ;;  %v7936_v14 = vld [vmem:[#allocation33_spill] sm:$0xff] }
 0x21c   : > { %v2391_v58 = vmul.f32 %v5912_v35, %v1573_v26  ;;  %v2392_v43 = vmul.f32 %v5912_v35, %v6487_v39  ;;  %v909_v6 = vadd.f32 %v6460_v55, %v7933_v60  ;;  %v2239_v4 = vadd.f32 %v2191_v1, %v2139_v25 }
 0x21d   : > { %4017 = vmatprep.mubr.bf16.mxu1 %v2624_v48  ;;  %v2240_v11 = vadd.f32 %v2192_v9, %v2140_v0  ;;  %v912_v54 = vadd.f32 %v6460_v55, %v7934_v59  ;;  %v7935_v46 = vrot.slane %v6293_v23, 1  ;;  %v7937_v62 = vrot.slane %v7936_v14, 1 }
 0x21e   : > { %v997_v26 = vmax.f32 %v909_v6, 0.0  ;;  %v7939_v38 = vrot.slane %v6183_v57, 1  ;;  %v7940_v1 = vrot.slane %v6293_v23, 2  ;;  %v7941_v9 = vrot.slane %v7936_v14, 2 }
 0x21f   : > { %v1461_v51 = vsel %vm1443_vm1, %v7937_v62, %v7935_v46  ;;  %v7938_v24 = vmov %v7937_v62  ;;  %v7943_v60 = vrot.slane %v6183_v57, 2  ;;  %v2339_v59 = vadd.f32 %v2291_v19, %v2239_v4 }
 0x220   : > { %v1462_v48 = vsel %vm1443_vm1, %v7939_v38, %v7938_v24  ;;  %v6590_v25 = vsel %vm1552_vm2, %v7941_v9, %v7940_v1  ;;  %v7942_v0 = vmov %v7941_v9  ;;  %v2340_v46 = vadd.f32 %v2292_v8, %v2240_v11  ;;  %v7946_v8 = vld [vmem:[#allocation51_spill] sm:$0xff] }
 0x221   : > { %v1571_v6 = vsel %vm1552_vm2, %v7943_v60, %v7942_v0  ;;  %v998_v62 = vmax.f32 %v912_v54, 0.0  ;;  %v1699_v24 = vmul.f32 %v4811_v21, %v1462_v48  ;;  %v6601_v38 = vmul.f32 %v4829_v32, %v6487_v39  ;;  %v7947_v54 = vld [vmem:[#allocation50_spill] sm:$0xff] }
 0x222   : > { %v1051_v18 = vmin.f32 %v997_v26, 6.0  ;;  %v1700_v1 = vmul.f32 %v4811_v21, %v1461_v51  ;;  %v1799_v9 = vmul.f32 %v4813_v20, %v1571_v6  ;;  %v2439_v37 = vadd.f32 %v2391_v58, %v2339_v59  ;;  %v7948_v26 = vld [vmem:[#allocation67_spill] sm:$0xff] }
 0x223   : > { %v2440_v29 = vadd.f32 %v2392_v43, %v2340_v46  ;;  %v1052_v41 = vmin.f32 %v998_v62, 6.0  ;;  %v1747_v17 = vadd.f32 %v1699_v24, %v7944_v36  ;;  %v7945_v4 = vunpack.i.h.bf16 %v7925_v40  ;;  %v7949_v43 = vld [vmem:[#allocation52_spill] sm:$0xff] }
 0x224   : > { %v1748_v11 = vadd.f32 %v1700_v1, %v7946_v8  ;;  %v1941_v39 = vadd.f32 %v7947_v54, %v6299_v3  ;;  %v1942_v0 = vadd.f32 %v7948_v26, %v6306_v52  ;;  %v2494_v60 = vadd.f32 %v5981_v44, %v2439_v37 }
 0x225   : > { %v6608_v19 = vmul.f32 %v7945_v4, %v1051_v18  ;;  %v2495_v58 = vadd.f32 %v5981_v44, %v2440_v29  ;;  %v6618_v59 = vmul.f32 %v7949_v43, %v1052_v41  ;;  %v6620_v36 = vadd.f32 %v1799_v9, %v1747_v17 }
 0x226   : > { %v1800_v3 = vmul.f32 %v4813_v20, %v6590_v25  ;;  %v2542_v52 = vmax.f32 %v2494_v60, 0.0  ;;  %v1996_v8 = vmul.f32 %v4822_v15, %v1462_v48  ;;  %v2041_v54 = vadd.f32 %v6439_v56, %v1941_v39 }
 0x227   : > { %v6626_v46 = vmul.f32 %v4809_v22, %v6608_v19  ;;  %v2543_v37 = vmax.f32 %v2495_v58, 0.0  ;;  %v6632_v29 = vmul.f32 %v4820_v16, %v6608_v19  ;;  %v6638_v62 = vmul.f32 %v4809_v22, %v6618_v59 }
 0x228   : > { %v6642_v24 = vmul.f32 %v4820_v16, %v6618_v59  ;;  %v6644_v1 = vadd.f32 %v1800_v3, %v1748_v11  ;;  %v2590_v9 = vmin.f32 %v2542_v52, 6.0  ;;  %v6649_v26 = vmul.f32 %v4822_v15, %v1461_v51 }
 0x229   : > { %7950 = vst [vmem:[#allocation68_spill] sm:$0xff] %v6626_v46  ;;  %7951 = vst [vmem:[#allocation39_spill] sm:$0xff] %v6632_v29  ;;  %v2591_v4 = vmin.f32 %v2543_v37, 6.0  ;;  %v2042_v60 = vadd.f32 %v6547_v28, %v1942_v0  ;;  %v6653_v58 = vmul.f32 %v4829_v32, %v1571_v6  ;;  %v2193_v43 = vmul.f32 %v4826_v13, %v6183_v57  ;;  %v7954_v57 = vld [vmem:[#allocation58_spill] sm:$0xff] }
 0x22a   : > { %7952 = vst [vmem:[#allocation40_spill] sm:$0xff] %v6638_v62  ;;  %7953 = vst [vmem:[#allocation62_spill] sm:$0xff] %v6642_v24  ;;  %v2141_v11 = vadd.f32 %v6524_v49, %v2041_v54  ;;  %v2194_v3 = vmul.f32 %v4826_v13, %v7936_v14  ;;  %v2293_v52 = vmul.f32 %v4836_v33, %v1462_v48  ;;  %v7955_v49 = vld [vmem:[#allocation64_spill] sm:$0xff]  ;;  %v7956_v14 = vrot.slane %v6399_v50, 1  ;;  %v7967_v46 = vld [vmem:[#allocation74_spill] sm:$0xff] }
 0x22b   : > { %v2625_v41 = vpack.c.bf16 %v2591_v4, %v2590_v9  ;;  %v2142_v56 = vadd.f32 %v6555_v2, %v2042_v60  ;;  %v2294_v39 = vmul.f32 %v4836_v33, %v1461_v51  ;;  %v2393_v28 = vmul.f32 %v5912_v35, %v1571_v6 }
 0x22c   : > { %v2394_v0 = vmul.f32 %v5912_v35, %v6590_v25  ;;  %v2241_v37 = vadd.f32 %v2193_v43, %v2141_v11  ;;  %v917_v9 = vadd.f32 %v6460_v55, %v7954_v57  ;;  %v920_v4 = vadd.f32 %v6460_v55, %v7955_v49 }
 0x22d   : > { %4018 = vmatmul.mubr.bf16.gmra.mrb[24].mxu1 %v2625_v41  ;;  %v7957_v48 = vrot.slane %v6297_v47, 1  ;;  %v2242_v51 = vadd.f32 %v2194_v3, %v2142_v56  ;;  %v7959_v54 = vrot.slane %v6293_v23, 1  ;;  %v7960_v60 = vrot.slane %v6399_v50, 2 }
 0x22e   : > { %v7961_v43 = vrot.slane %v6297_v47, 2  ;;  %v7963_v49 = vrot.slane %v6293_v23, 2  ;;  %v2341_v56 = vadd.f32 %v2293_v52, %v2241_v37  ;;  %v7964_v37 = vld [vmem:[#allocation44_spill] sm:$0xff] }
 0x22f   : > { %v1459_v2 = vsel %vm1443_vm1, %v7957_v48, %v7956_v14  ;;  %v7958_v6 = vmov %v7957_v48  ;;  %v999_v14 = vmax.f32 %v917_v9, 0.0  ;;  %v1000_v48 = vmax.f32 %v920_v4, 0.0 }
 0x230   : > { %v1460_v41 = vsel %vm1443_vm1, %v7959_v54, %v7958_v6  ;;  %v6688_v11 = vsel %vm1552_vm2, %v7961_v43, %v7960_v60  ;;  %v7962_v57 = vmov %v7961_v43  ;;  %v2342_v54 = vadd.f32 %v2294_v39, %v2242_v51  ;;  %v7965_v39 = vld [vmem:[#allocation60_spill] sm:$0xff] }
 0x231   : > { %v1569_v3 = vsel %vm1552_vm2, %v7963_v49, %v7962_v57  ;;  %v1701_v6 = vmul.f32 %v4811_v21, %v1460_v41  ;;  %v1702_v17 = vmul.f32 %v4811_v21, %v1459_v2  ;;  %v1802_v60 = vmul.f32 %v4813_v20, %v6688_v11  ;;  %v7966_v57 = vld [vmem:[#allocation45_spill] sm:$0xff] }
 0x232   : > { %v1801_v18 = vmul.f32 %v4813_v20, %v1569_v3  ;;  %v2441_v43 = vadd.f32 %v2393_v28, %v2341_v56  ;;  %v1053_v40 = vmin.f32 %v999_v14, 6.0  ;;  %v1054_v24 = vmin.f32 %v1000_v48, 6.0 }
 0x233   : > { %v1749_v29 = vadd.f32 %v1701_v6, %v6318_v7  ;;  %v2442_v62 = vadd.f32 %v2394_v0, %v2342_v54  ;;  %v1750_v52 = vadd.f32 %v1702_v17, %v6328_v31  ;;  %v1943_v9 = vadd.f32 %v7964_v37, %v6411_v12 }
 0x234   : > { %v1944_v4 = vadd.f32 %v7965_v39, %v6413_v34  ;;  %v2496_v51 = vadd.f32 %v5981_v44, %v2441_v43  ;;  %v6709_v49 = vmul.f32 %v7966_v57, %v1053_v40  ;;  %v7968_v28 = vunpack.i.l.bf16 %v7967_v46 }
 0x235   : > { %v6715_v14 = vadd.f32 %v1801_v18, %v1749_v29  ;;  %v6719_v7 = vmul.f32 %v4829_v32, %v6590_v25  ;;  %v2497_v31 = vadd.f32 %v5981_v44, %v2442_v62  ;;  %v6722_v12 = vadd.f32 %v1802_v60, %v1750_v52 }
 0x236   : > { %v6713_v56 = vmul.f32 %v7968_v28, %v1054_v24  ;;  %v6725_v34 = vmul.f32 %v4822_v15, %v1460_v41  ;;  %v2544_v17 = vmax.f32 %v2496_v51, 0.0  ;;  %v6730_v24 = vmul.f32 %v4822_v15, %v1459_v2 }
 0x237   : > { %v2545_v18 = vmax.f32 %v2497_v31, 0.0  ;;  %v6734_v25 = vmul.f32 %v4809_v22, %v6709_v49  ;;  %v6738_v29 = vmul.f32 %v4820_v16, %v6709_v49  ;;  %v2043_v60 = vadd.f32 %v6552_v45, %v1943_v9 }
 0x238   : > { %v2592_v48 = vmin.f32 %v2544_v17, 6.0  ;;  %v6744_v54 = vmul.f32 %v4809_v22, %v6713_v56  ;;  %v6749_v52 = vmul.f32 %v4820_v16, %v6713_v56  ;;  %v2044_v37 = vadd.f32 %v1996_v8, %v1944_v4 }
 0x239   : > { %v2593_v43 = vmin.f32 %v2545_v18, 6.0  ;;  %v6752_v39 = vmul.f32 %v4829_v32, %v1569_v3  ;;  %v2143_v51 = vadd.f32 %v6601_v38, %v2043_v60  ;;  %v2195_v57 = vmul.f32 %v4826_v13, %v6293_v23  ;;  %v7970_v38 = vld [vmem:[#allocation35_spill] sm:$0xff]  ;;  %v7971_v23 = vld [vmem:[#allocation69_spill] sm:$0xff] }
 0x23a   : > { %7969 = vst [vmem:[#allocation56_spill] sm:$0xff] %v6749_v52  ;;  %v2196_v28 = vmul.f32 %v4826_v13, %v6297_v47  ;;  %v2295_v31 = vmul.f32 %v4836_v33, %v1460_v41  ;;  %v2144_v9 = vadd.f32 %v6653_v58, %v2044_v37  ;;  %v2296_v17 = vmul.f32 %v4836_v33, %v1459_v2 }
 0x23b   : > { %v2626_v45 = vpack.c.bf16 %v2593_v43, %v2592_v48  ;;  %v2395_v8 = vmul.f32 %v5912_v35, %v1569_v3  ;;  %v2243_v4 = vadd.f32 %v2195_v57, %v2143_v51  ;;  %v2396_v18 = vmul.f32 %v5912_v35, %v6688_v11 }
 0x23c   : > { %v925_v60 = vadd.f32 %v6460_v55, %v7970_v38  ;;  %v928_v0 = vadd.f32 %v6460_v55, %v7971_v23  ;;  %v2244_v47 = vadd.f32 %v2196_v28, %v2144_v9  ;;  %v7972_v41 = vrot.slane %v6503_v53, 1 }
 0x23d   : > { %4021 = vmatprep.mubr.bf16.mxu1 %v2626_v45  ;;  %v7973_v58 = vrot.slane %v6402_v10, 1  ;;  %v7975_v48 = vrot.slane %v6399_v50, 1  ;;  %v7976_v43 = vrot.slane %v6503_v53, 2  ;;  %v7977_v37 = vrot.slane %v6402_v10, 2 }
 0x23e   : > { %v2343_v57 = vadd.f32 %v2295_v31, %v2243_v4  ;;  %v1001_v28 = vmax.f32 %v925_v60, 0.0  ;;  %v1002_v45 = vmax.f32 %v928_v0, 0.0  ;;  %v7979_v38 = vrot.slane %v6399_v50, 2  ;;  %v7980_v60 = vld [vmem:[#allocation61_spill] sm:$0xff] }
 0x23f   : > { %v1457_v2 = vsel %vm1443_vm1, %v7973_v58, %v7972_v41  ;;  %v7974_v3 = vmov %v7973_v58  ;;  %v6787_v51 = vsel %vm1552_vm2, %v7977_v37, %v7976_v43  ;;  %v7978_v9 = vmov %v7977_v37 }
 0x240   : > { %v1458_v35 = vsel %vm1443_vm1, %v7975_v48, %v7974_v3  ;;  %v1567_v23 = vsel %vm1552_vm2, %v7979_v38, %v7978_v9  ;;  %v2344_v41 = vadd.f32 %v2296_v17, %v2244_v47  ;;  %v1704_v3 = vmul.f32 %v4811_v21, %v1457_v2  ;;  %v7981_v9 = vld [vmem:[#allocation59_spill] sm:$0xff] }
 0x241   : > { %v1703_v58 = vmul.f32 %v4811_v21, %v1458_v35  ;;  %v1803_v48 = vmul.f32 %v4813_v20, %v1567_v23  ;;  %v2443_v40 = vadd.f32 %v2395_v8, %v2343_v57  ;;  %v1055_v43 = vmin.f32 %v1001_v28, 6.0  ;;  %v7984_v8 = vld [vmem:[#allocation47_spill] sm:$0xff]  ;;  %v7986_v28 = vld [vmem:[#allocation72_spill] sm:$0xff] }
 0x242   : > { %v1056_v37 = vmin.f32 %v1002_v45, 6.0  ;;  %v1804_v0 = vmul.f32 %v4813_v20, %v6787_v51  ;;  %v2444_v31 = vadd.f32 %v2396_v18, %v2344_v41  ;;  %v1752_v6 = vadd.f32 %v1704_v3, %v7980_v60 }
 0x243   : > { %v1751_v4 = vadd.f32 %v1703_v58, %v6422_v61  ;;  %v1945_v17 = vadd.f32 %v7981_v9, %v6518_v5  ;;  %v2498_v47 = vadd.f32 %v5981_v44, %v2443_v40  ;;  %v7982_v38 = vunpack.i.h.bf16 %v7967_v46 }
 0x244   : > { %v6810_v57 = vmul.f32 %v7984_v8, %v1056_v37  ;;  %v1946_v45 = vadd.f32 %v7986_v28, %v6520_v42  ;;  %v6816_v61 = vmul.f32 %v4829_v32, %v6688_v11  ;;  %v2499_v18 = vadd.f32 %v5981_v44, %v2444_v31 }
 0x245   : > { %v6807_v62 = vmul.f32 %v7982_v38, %v1055_v43  ;;  %v6819_v41 = vadd.f32 %v1803_v48, %v1751_v4  ;;  %v6821_v5 = vadd.f32 %v1804_v0, %v1752_v6  ;;  %v2546_v40 = vmax.f32 %v2498_v47, 0.0 }
 0x246   : > { %7985 = vst [vmem:[#allocation37_spill] sm:$0xff] %v6810_v57  ;;  %v6826_v3 = vmul.f32 %v4822_v15, %v1458_v35  ;;  %v2547_v43 = vmax.f32 %v2499_v18, 0.0  ;;  %v7606_v11 = vrot.slane %v6810_v57, 1  ;;  %v7605_v44 = vrot.slane %v6810_v57, 2 }
 0x247   : > { %7983 = vst [vmem:[#allocation63_spill] sm:$0xff] %v6807_v62  ;;  %v1433_v46 = vrot.slane %v6807_v62, 1  ;;  %v1544_v58 = vrot.slane %v6807_v62, 2  ;;  %v1659_v42 = vmul.f32 %v4809_v22, %v6807_v62  ;;  %v2594_v48 = vmin.f32 %v2546_v40, 6.0 }
 0x248   : > { %v7987_v6 = vrot.slane %v6713_v56, 1  ;;  %v7988_v0 = vrot.slane %v6713_v56, 2  ;;  %v6846_v4 = vmul.f32 %v4820_v16, %v6807_v62  ;;  %v2595_v60 = vmin.f32 %v2547_v43, 6.0 }
 0x249   : > { %v6852_v9 = vsel %vm1443_vm1, %v1433_v46, %v7606_v11  ;;  %v6858_v47 = vsel %vm1552_vm2, %v1544_v58, %v7605_v44  ;;  %v6862_v38 = vmul.f32 %v4809_v22, %v6810_v57  ;;  %v6866_v8 = vmul.f32 %v4820_v16, %v6810_v57 }
 0x24a   : > { %v6836_v37 = vsel %vm1443_vm1, %v7987_v6, %v1433_v46  ;;  %v6842_v31 = vsel %vm1552_vm2, %v7988_v0, %v1544_v58  ;;  %7989 = vst [vmem:[#allocation43_spill] sm:$0xff] %v6846_v4  ;;  %7990 = vst [vmem:[#allocation41_spill] sm:$0xff] %v6852_v9  ;;  %v6869_v28 = vmul.f32 %v4822_v15, %v1457_v2  ;;  %v8000_v52 = vrot.slane %v6507_v30, 2 }
 0x24b   : > { %7991 = vst [vmem:[#allocation46_spill] sm:$0xff] %v6858_v47  ;;  %7992 = vst [vmem:[#allocation53_spill] sm:$0xff] %v6866_v8  ;;  %v2045_v18 = vadd.f32 %v6649_v26, %v1945_v17  ;;  %v2046_v40 = vadd.f32 %v6725_v34, %v1946_v45  ;;  %v2627_v46 = vpack.c.bf16 %v2595_v60, %v2594_v48  ;;  %v6887_v34 = vld [vmem:[%s7512_s3 + $0x8] ss:$0 sm:$0xff] }
 0x24c   : > { %v6874_v43 = vmul.f32 %v4829_v32, %v1567_v23  ;;  %v2197_v58 = vmul.f32 %v4826_v13, %v6399_v50  ;;  %v2198_v22 = vmul.f32 %v4826_v13, %v6402_v10  ;;  %v2297_v44 = vmul.f32 %v4836_v33, %v1458_v35  ;;  %v7993_v10 = vld [vmem:[#allocation32_spill] sm:$0xff] }
 0x24d   : > { %v2145_v6 = vadd.f32 %v6719_v7, %v2045_v18  ;;  %v2146_v0 = vadd.f32 %v6752_v39, %v2046_v40  ;;  %v2298_v26 = vmul.f32 %v4836_v33, %v1457_v2  ;;  %4022 = vmatmul.mubr.bf16.gmra.mrb[28].mxu1 %v2627_v46  ;;  %v2397_v17 = vmul.f32 %v6887_v34, %v1567_v23  ;;  %v7994_v48 = vld [vmem:[#allocation36_spill] sm:$0xff] }
 0x24e   : > { %v2398_v50 = vmul.f32 %v6887_v34, %v6787_v51  ;;  %v933_v7 = vadd.f32 %v6460_v55, %v7993_v10  ;;  %v1710_v39 = vmul.f32 %v4811_v21, %v6836_v37  ;;  %v1810_v2 = vmul.f32 %v4813_v20, %v6842_v31 }
 0x24f   : > { %v2245_v35 = vadd.f32 %v2197_v58, %v2145_v6  ;;  %v2246_v45 = vadd.f32 %v2198_v22, %v2146_v0  ;;  %v936_v60 = vadd.f32 %v6460_v55, %v7994_v48  ;;  %v1711_v40 = vmul.f32 %v4811_v21, %v6852_v9 }
 0x250   : > { %v1003_v18 = vmax.f32 %v933_v7, 0.0  ;;  %v1758_v23 = vadd.f32 %v1710_v39, %v6744_v54  ;;  %v1811_v46 = vmul.f32 %v4813_v20, %v6858_v47  ;;  %v7995_v58 = vrot.slane %v6608_v19, 1 }
 0x251   : > { %v2345_v10 = vadd.f32 %v2297_v44, %v2245_v35  ;;  %v2346_v11 = vadd.f32 %v2298_v26, %v2246_v45  ;;  %v1004_v8 = vmax.f32 %v936_v60, 0.0  ;;  %v7996_v22 = vrot.slane %v6507_v30, 1  ;;  %v1306_v44 = vpop.permute.xlu1 %1305 }
 0x252   : > { %v1057_v0 = vmin.f32 %v1003_v18, 6.0  ;;  %v1858_v7 = vadd.f32 %v1810_v2, %v1758_v23  ;;  %v1759_v48 = vadd.f32 %v1711_v40, %v1659_v42  ;;  %v7998_v39 = vrot.slane %v6503_v53, 1 }
 0x253   : > { %v1455_v6 = vsel %vm1443_vm1, %v7996_v22, %v7995_v58  ;;  %v7997_v54 = vmov %v7996_v22  ;;  %v2445_v26 = vadd.f32 %v2397_v17, %v2345_v10  ;;  %v2446_v35 = vadd.f32 %v2398_v50, %v2346_v11 }
 0x254   : > { %v1456_v4 = vsel %vm1443_vm1, %v7998_v39, %v7997_v54  ;;  %v1058_v45 = vmin.f32 %v1004_v8, 6.0  ;;  %v7999_v60 = vrot.slane %v6608_v19, 2  ;;  %v6927_v42 = vmul.f32 %v4829_v32, %v6787_v51  ;;  %v6938_v8 = vld [vmem:[%s7513_s4] ss:$0 sm:$0xff]  ;;  %v8003_v51 = vld [vmem:[#allocation49_spill] sm:$0xff] }
 0x255   : > { %v1381_v2 = vmul.f32 %v1306_v44, %v1057_v0  ;;  %v1859_v23 = vadd.f32 %v1811_v46, %v1759_v48  ;;  %v8001_v40 = vmov %v8000_v52  ;;  %v8002_v17 = vrot.slane %v6503_v53, 2 }
 0x256   : > { %v6923_v18 = vsel %vm1552_vm2, %v8000_v52, %v7999_v60  ;;  %v2500_v52 = vadd.f32 %v6938_v8, %v2445_v26  ;;  %v2501_v50 = vadd.f32 %v6938_v8, %v2446_v35  ;;  %v8004_v10 = vunpack.i.l.bf16 %v8003_v51 }
 0x257   : > { %v1565_v11 = vsel %vm1552_vm2, %v8002_v17, %v8001_v40  ;;  %v1705_v46 = vmul.f32 %v4811_v21, %v1456_v4  ;;  %v1435_v22 = vrot.slane %v1381_v2, 1  ;;  %v1546_v0 = vrot.slane %v1381_v2, 2 }
 0x258   : > { %v6944_v58 = vmul.f32 %v8004_v10, %v1058_v45  ;;  %v1910_v48 = vmul.f32 %v4820_v16, %v1381_v2  ;;  %v1706_v54 = vmul.f32 %v4811_v21, %v1455_v6  ;;  %v2548_v39 = vmax.f32 %v2500_v52, 0.0 }
 0x259   : > { %v2549_v44 = vmax.f32 %v2501_v50, 0.0  ;;  %v6950_v60 = vmul.f32 %v4826_v13, %v1381_v2  ;;  %v8006_v35 = vrot.slane %v6810_v57, 1  ;;  %v8008_v40 = vrot.slane %v6810_v57, 2 }
 0x25a   : > { %v1958_v10 = vadd.f32 %v1910_v48, %v1858_v7  ;;  %v1911_v52 = vmul.f32 %v4820_v16, %v6944_v58  ;;  %v2596_v2 = vmin.f32 %v2548_v39, 6.0  ;;  %v8011_v47 = vrot.slane %v6944_v58, 1 }
 0x25b   : > { %8005 = vst [vmem:[#allocation70_spill] sm:$0xff] %v6950_v60  ;;  %v6957_v45 = vsel %vm1443_vm1, %v8006_v35, %v1435_v22  ;;  %v6963_v17 = vsel %vm1552_vm2, %v8008_v40, %v1546_v0  ;;  %v2597_v50 = vmin.f32 %v2549_v44, 6.0  ;;  %v1753_v48 = vadd.f32 %v1705_v46, %v6530_v63  ;;  %v8013_v44 = vld [vmem:[#allocation48_spill] sm:$0xff] }
 0x25c   : > { %8007 = vst [vmem:[#allocation71_spill] sm:$0xff] %v6957_v45  ;;  %8009 = vst [vmem:[#allocation33_spill] sm:$0xff] %v6963_v17  ;;  %v1712_v26 = vmul.f32 %v4811_v21, %v6957_v45  ;;  %v6972_v35 = vmul.f32 %v4822_v15, %v6957_v45  ;;  %v6978_v40 = vsel %vm1443_vm1, %v1435_v22, %v8011_v47  ;;  %v8015_v45 = vld [vmem:[#allocation66_spill] sm:$0xff] }
 0x25d   : > { %8012 = vst [vmem:[#allocation51_spill] sm:$0xff] %v6978_v40  ;;  %v6980_v7 = vadd.f32 %v1911_v52, %v1859_v23  ;;  %v2628_v39 = vpack.c.bf16 %v2597_v50, %v2596_v2  ;;  %v1754_v9 = vadd.f32 %v1706_v54, %v8013_v44  ;;  %v1805_v57 = vmul.f32 %v4813_v20, %v1565_v11  ;;  %v8016_v23 = vld [vmem:[#allocation34_spill] sm:$0xff] }
 0x25e   : > { %8010 = vst [vmem:[#allocation54_spill] sm:$0xff] %v6972_v35  ;;  %v1806_v60 = vmul.f32 %v4813_v20, %v6923_v18  ;;  %v6989_v35 = vmul.f32 %v4826_v13, %v6944_v58  ;;  %v1947_v47 = vadd.f32 %v8015_v45, %v6620_v36  ;;  %v1948_v22 = vadd.f32 %v8016_v23, %v6644_v1 }
 0x25f   : > { %v6996_v63 = vmul.f32 %v4822_v15, %v1456_v4  ;;  %4025 = vmatprep.mubr.bf16.mxu1 %v2628_v39  ;;  %v6998_v46 = vadd.f32 %v1805_v57, %v1753_v48  ;;  %v7003_v52 = vmul.f32 %v4822_v15, %v1455_v6  ;;  %v7006_v2 = vmul.f32 %v4829_v32, %v1565_v11 }
 0x260   : > { %8014 = vst [vmem:[#allocation50_spill] sm:$0xff] %v6989_v35  ;;  %v7000_v54 = vadd.f32 %v1806_v60, %v1754_v9  ;;  %v2047_v50 = vadd.f32 %v6730_v24, %v1947_v47  ;;  %v2048_v36 = vadd.f32 %v6826_v3, %v1948_v22  ;;  %v2199_v1 = vmul.f32 %v4826_v13, %v6503_v53  ;;  %v8017_v3 = vld [vmem:[#allocation76_spill] sm:$0xff] }
 0x261   : > { %v2200_v45 = vmul.f32 %v4826_v13, %v6507_v30  ;;  %v2299_v57 = vmul.f32 %v4836_v33, %v1456_v4  ;;  %v2300_v9 = vmul.f32 %v4836_v33, %v1455_v6  ;;  %v2399_v60 = vmul.f32 %v6887_v34, %v1565_v11  ;;  %v8018_v4 = vld [vmem:[#allocation77_spill] sm:$0xff] }
 0x262   : > { %v2400_v48 = vmul.f32 %v6887_v34, %v6923_v18  ;;  %v2147_v39 = vadd.f32 %v6816_v61, %v2047_v50  ;;  %v2148_v24 = vadd.f32 %v6874_v43, %v2048_v36  ;;  %v941_v44 = vadd.f32 %v6460_v55, %v8017_v3 }
 0x263   : > { %v1760_v53 = vadd.f32 %v1712_v26, %v6862_v38  ;;  %v1812_v30 = vmul.f32 %v4813_v20, %v6963_v17  ;;  %v944_v6 = vadd.f32 %v6460_v55, %v8018_v4  ;;  %v8019_v11 = vrot.slane %v6944_v58, 2 }
 0x264   : > { %v2010_v61 = vmul.f32 %v4822_v15, %v6978_v40  ;;  %v2247_v43 = vadd.f32 %v2199_v1, %v2147_v39  ;;  %v2248_v23 = vadd.f32 %v2200_v45, %v2148_v24  ;;  %v1005_v22 = vmax.f32 %v941_v44, 0.0  ;;  %v8033_v40 = vld [vmem:[#allocation57_spill] sm:$0xff] }
 0x265   : > { %v7032_v47 = vsel %vm1552_vm2, %v1546_v0, %v8019_v11  ;;  %v1860_v26 = vadd.f32 %v1812_v30, %v1760_v53  ;;  %v1006_v50 = vmax.f32 %v944_v6, 0.0  ;;  %v8021_v3 = vrot.slane %v6709_v49, 1 }
 0x266   : > { %8020 = vst [vmem:[#allocation67_spill] sm:$0xff] %v7032_v47  ;;  %v2110_v38 = vmul.f32 %v4829_v32, %v7032_v47  ;;  %v2058_v36 = vadd.f32 %v2010_v61, %v1958_v10  ;;  %v8022_v4 = vrot.slane %v6618_v59, 1  ;;  %v2347_v11 = vadd.f32 %v2299_v57, %v2247_v43  ;;  %v1321_v61 = vpop.permute.xlu1 %1320 }
 0x267   : > { %v2348_v35 = vadd.f32 %v2300_v9, %v2248_v23  ;;  %v1059_v17 = vmin.f32 %v1005_v22, 6.0  ;;  %v8024_v45 = vrot.slane %v6608_v19, 1  ;;  %v1060_v24 = vmin.f32 %v1006_v50, 6.0 }
 0x268   : > { %v1453_v0 = vsel %vm1443_vm1, %v8022_v4, %v8021_v3  ;;  %v8023_v1 = vmov %v8022_v4  ;;  %v2158_v44 = vadd.f32 %v2110_v38, %v2058_v36  ;;  %v8025_v10 = vrot.slane %v6709_v49, 2 }
 0x269   : > { %v1454_v39 = vsel %vm1443_vm1, %v8024_v45, %v8023_v1  ;;  %v8026_v53 = vrot.slane %v6618_v59, 2  ;;  %v8028_v9 = vrot.slane %v6608_v19, 2  ;;  %v7066_v43 = vmul.f32 %v4829_v32, %v6923_v18 }
 0x26a   : > { %v2447_v23 = vadd.f32 %v2399_v60, %v2347_v11  ;;  %v2448_v22 = vadd.f32 %v2400_v48, %v2348_v35  ;;  %v8029_v38 = vunpack.i.h.bf16 %v8003_v51  ;;  %v7070_v36 = vmul.f32 %v1321_v61, %v1060_v24 }
 0x26b   : > { %v7056_v30 = vsel %vm1552_vm2, %v8026_v53, %v8025_v10  ;;  %v8027_v57 = vmov %v8026_v53  ;;  %v1707_v3 = vmul.f32 %v4811_v21, %v1454_v39  ;;  %v1708_v4 = vmul.f32 %v4811_v21, %v1453_v0 }
 0x26c   : > { %v1563_v6 = vsel %vm1552_vm2, %v8028_v9, %v8027_v57  ;;  %v1383_v50 = vmul.f32 %v8029_v38, %v1059_v17  ;;  %v2502_v45 = vadd.f32 %v6938_v8, %v2447_v23  ;;  %v2503_v10 = vadd.f32 %v6938_v8, %v2448_v22  ;;  %v8031_v22 = vld [vmem:[#allocation68_spill] sm:$0xff] }
 0x26d   : > { %v1807_v1 = vmul.f32 %v4813_v20, %v1563_v6  ;;  %v1808_v18 = vmul.f32 %v4813_v20, %v7056_v30  ;;  %v7615_v17 = vrot.slane %v7070_v36, 1  ;;  %v7618_v60 = vrot.slane %v7070_v36, 2 }
 0x26e   : > { %v1437_v53 = vrot.slane %v1383_v50, 1  ;;  %v1548_v35 = vrot.slane %v1383_v50, 2  ;;  %v1912_v51 = vmul.f32 %v4820_v16, %v1383_v50  ;;  %v2550_v48 = vmax.f32 %v2502_v45, 0.0 }
 0x26f   : > { %v2551_v11 = vmax.f32 %v2503_v10, 0.0  ;;  %v8030_v24 = vrot.slane %v6944_v58, 1  ;;  %v2210_v9 = vmul.f32 %v4826_v13, %v7070_v36  ;;  %v1755_v38 = vadd.f32 %v1707_v3, %v8031_v22 }
 0x270   : > { %v1960_v61 = vadd.f32 %v1912_v51, %v1860_v26  ;;  %v7094_v16 = vsel %vm1443_vm1, %v1437_v53, %v7615_v17  ;;  %v7100_v23 = vsel %vm1552_vm2, %v1548_v35, %v7618_v60  ;;  %v2598_v45 = vmin.f32 %v2550_v48, 6.0  ;;  %v8034_v48 = vld [vmem:[#allocation38_spill] sm:$0xff] }
 0x271   : > { %v7086_v57 = vsel %vm1443_vm1, %v8030_v24, %v1437_v53  ;;  %v2599_v10 = vmin.f32 %v2551_v11, 6.0  ;;  %v7104_v24 = vmul.f32 %v4826_v13, %v1383_v50  ;;  %v2012_v26 = vmul.f32 %v4822_v15, %v7094_v16  ;;  %v8032_v53 = vld [vmem:[#allocation40_spill] sm:$0xff] }
 0x272   : > { %v7108_v51 = vadd.f32 %v2210_v9, %v2158_v44  ;;  %v1756_v17 = vadd.f32 %v1708_v4, %v8032_v53  ;;  %v7111_v47 = vadd.f32 %v1807_v1, %v1755_v38  ;;  %v1949_v60 = vadd.f32 %v8033_v40, %v6715_v14 }
 0x273   : > { %v2629_v62 = vpack.c.bf16 %v2599_v10, %v2598_v45  ;;  %v2112_v3 = vmul.f32 %v4829_v32, %v7100_v23  ;;  %v1950_v50 = vadd.f32 %v8034_v48, %v6722_v12  ;;  %v7120_v11 = vmul.f32 %v4822_v15, %v1454_v39 }
 0x274   : > { %v7122_v22 = vadd.f32 %v1808_v18, %v1756_v17  ;;  %v7125_v44 = vmul.f32 %v4822_v15, %v1453_v0  ;;  %v2049_v4 = vadd.f32 %v6869_v28, %v1949_v60  ;;  %v7129_v1 = vmul.f32 %v4829_v32, %v1563_v6 }
 0x275   : > { %4026 = vmatmul.mubr.bf16.gmra.mrb[32].mxu1 %v2629_v62  ;;  %v2050_v14 = vadd.f32 %v6996_v63, %v1950_v50  ;;  %v2201_v40 = vmul.f32 %v4826_v13, %v6608_v19  ;;  %v2202_v12 = vmul.f32 %v4826_v13, %v6618_v59  ;;  %v2301_v18 = vmul.f32 %v4836_v33, %v1454_v39  ;;  %v8035_v63 = vld [vmem:[#allocation75_spill] sm:$0xff] }
 0x276   : > { %v2149_v17 = vadd.f32 %v6927_v42, %v2049_v4  ;;  %v2302_v9 = vmul.f32 %v4836_v33, %v1453_v0  ;;  %v2401_v28 = vmul.f32 %v6887_v34, %v1563_v6  ;;  %v2402_v60 = vmul.f32 %v6887_v34, %v7056_v30  ;;  %v8037_v6 = vld [vmem:[#allocation55_spill] sm:$0xff] }
 0x277   : > { %v2150_v62 = vadd.f32 %v7006_v2, %v2050_v14  ;;  %v949_v38 = vadd.f32 %v6460_v55, %v8035_v63  ;;  %v8036_v19 = vrot.slane %v6944_v58, 2  ;;  %v2011_v42 = vmul.f32 %v4822_v15, %v7086_v57 }
 0x278   : > { %v2249_v0 = vadd.f32 %v2201_v40, %v2149_v17  ;;  %v952_v45 = vadd.f32 %v6460_v55, %v8037_v6  ;;  %v2060_v2 = vadd.f32 %v2012_v26, %v1960_v61  ;;  %v8038_v58 = vrot.slane %v6713_v56, 1 }
 0x279   : > { %v7149_v59 = vsel %vm1552_vm2, %v8036_v19, %v1548_v35  ;;  %v2250_v10 = vadd.f32 %v2202_v12, %v2150_v62  ;;  %v1007_v53 = vmax.f32 %v949_v38, 0.0  ;;  %v2059_v48 = vadd.f32 %v2011_v42, %v6980_v7 }
 0x27a   : > { %v2111_v39 = vmul.f32 %v4829_v32, %v7149_v59  ;;  %v8039_v35 = vrot.slane %v6709_v49, 1  ;;  %v2349_v4 = vadd.f32 %v2301_v18, %v2249_v0  ;;  %v1008_v14 = vmax.f32 %v952_v45, 0.0  ;;  %v8042_v18 = vld [vmem:[#allocation65_spill] sm:$0xff] }
 0x27b   : > { %v2160_v40 = vadd.f32 %v2112_v3, %v2060_v2  ;;  %v8040_v17 = vrot.slane %v6713_v56, 2  ;;  %v8041_v63 = vrot.slane %v6709_v49, 2  ;;  %v2350_v61 = vadd.f32 %v2302_v9, %v2250_v10  ;;  %v8043_v0 = vld [vmem:[#allocation73_spill] sm:$0xff]  ;;  %v8045_v9 = vld [vmem:[#allocation39_spill] sm:$0xff] }
 0x27c   : > { %v1452_v50 = vsel %vm1443_vm1, %v8039_v35, %v8038_v58  ;;  %v1061_v26 = vmin.f32 %v1007_v53, 6.0  ;;  %v2159_v7 = vadd.f32 %v2111_v39, %v2059_v48  ;;  %v2105_v62 = vmul.f32 %v4829_v32, %v7056_v30 }
 0x27d   : > { %v1561_v55 = vsel %vm1552_vm2, %v8041_v63, %v8040_v17  ;;  %v1709_v12 = vmul.f32 %v4811_v21, %v1452_v50  ;;  %v2449_v38 = vadd.f32 %v2401_v28, %v2349_v4  ;;  %v1062_v19 = vmin.f32 %v1008_v14, 6.0 }
 0x27e   : > { %v1951_v3 = vadd.f32 %v8042_v18, %v6819_v41  ;;  %v2450_v42 = vadd.f32 %v2402_v60, %v2350_v61  ;;  %v8044_v6 = vunpack.i.l.bf16 %v8043_v0  ;;  %v1952_v39 = vadd.f32 %v8045_v9, %v6821_v5  ;;  %v8048_v18 = vld [vmem:[#allocation42_spill] sm:$0xff] }
 0x27f   : > { %v1757_v2 = vadd.f32 %v1709_v12, %v6734_v25  ;;  %v2504_v21 = vadd.f32 %v6938_v8, %v2449_v38  ;;  %v8046_v10 = vunpack.i.h.bf16 %v8043_v0  ;;  %v1809_v28 = vmul.f32 %v4813_v20, %v1561_v55 }
 0x280   : > { %v7177_v45 = vmul.f32 %v8044_v6, %v1061_v26  ;;  %v2051_v41 = vadd.f32 %v7003_v52, %v1951_v3  ;;  %v2505_v60 = vadd.f32 %v6938_v8, %v2450_v42  ;;  %v2006_v48 = vmul.f32 %v4822_v15, %v1452_v50 }
 0x281   : > { %v7185_v30 = vmul.f32 %v8046_v10, %v1062_v19  ;;  %v2552_v5 = vmax.f32 %v2504_v21, 0.0  ;;  %v8047_v52 = vrot.slane %v7070_v36, 1  ;;  %v7206_v63 = vadd.f32 %v1809_v28, %v1757_v2 }
 0x282   : > { %v1439_v53 = vrot.slane %v7177_v45, 1  ;;  %v2211_v25 = vmul.f32 %v4826_v13, %v7177_v45  ;;  %v1550_v58 = vrot.slane %v7177_v45, 2  ;;  %v2553_v20 = vmax.f32 %v2505_v60, 0.0  ;;  %v8051_v60 = vld [vmem:[#allocation63_spill] sm:$0xff] }
 0x283   : > { %v1440_v35 = vrot.slane %v7185_v30, 1  ;;  %v2212_v4 = vmul.f32 %v4826_v13, %v7185_v30  ;;  %v2600_v61 = vmin.f32 %v2552_v5, 6.0  ;;  %v1551_v12 = vrot.slane %v7185_v30, 2  ;;  %v8053_v5 = vld [vmem:[#allocation41_spill] sm:$0xff] }
 0x284   : > { %v7202_v14 = vsel %vm1443_vm1, %v8047_v52, %v1439_v53  ;;  %v7204_v17 = vadd.f32 %v2211_v25, %v2159_v7  ;;  %v2601_v19 = vmin.f32 %v2553_v20, 6.0  ;;  %v8049_v3 = vrot.slane %v8048_v18, 1  ;;  %v8054_v52 = vld [vmem:[#allocation71_spill] sm:$0xff] }
 0x285   : > { %v7210_v26 = vsel %vm1443_vm1, %v1439_v53, %v1440_v35  ;;  %v7213_v38 = vadd.f32 %v2212_v4, %v2160_v40  ;;  %v2052_v7 = vadd.f32 %v7120_v11, %v1952_v39  ;;  %v2151_v0 = vadd.f32 %v7066_v43, %v2051_v41  ;;  %v8050_v41 = vld [vmem:[#allocation62_spill] sm:$0xff]  ;;  %v8052_v53 = vld [vmem:[#allocation37_spill] sm:$0xff] }
 0x286   : > { %v7219_v42 = vsel %vm1443_vm1, %v1440_v35, %v8049_v3  ;;  %v2106_v6 = vmul.f32 %v4829_v32, %v1561_v55  ;;  %v2203_v2 = vmul.f32 %v4826_v13, %v6709_v49  ;;  %v2204_v40 = vmul.f32 %v4826_v13, %v6713_v56 }
 0x287   : > { %v2303_v9 = vmul.f32 %v4836_v33, %v1452_v50  ;;  %v2630_v21 = vpack.c.bf16 %v2601_v19, %v2600_v61  ;;  %v2152_v10 = vadd.f32 %v7129_v1, %v2052_v7  ;;  %v2304_v28 = vmul.f32 %v4836_v33, %v6836_v37  ;;  %v8056_v19 = vld [vmem:[#allocation56_spill] sm:$0xff]  ;;  %v8057_v7 = vld [vmem:[#allocation43_spill] sm:$0xff] }
 0x288   : > { %v2403_v11 = vmul.f32 %v6887_v34, %v1561_v55  ;;  %v2251_v39 = vadd.f32 %v2203_v2, %v2151_v0  ;;  %v2404_v43 = vmul.f32 %v6887_v34, %v6842_v31  ;;  %v1953_v49 = vadd.f32 %v8050_v41, %v6998_v46 }
 0x289   : > { %v1954_v56 = vadd.f32 %v6738_v29, %v7000_v54  ;;  %4029 = vmatprep.mubr.bf16.mxu1 %v2630_v21  ;;  %v2252_v50 = vadd.f32 %v2204_v40, %v2152_v10  ;;  %v2205_v1 = vmul.f32 %v4826_v13, %v8051_v60  ;;  %v2206_v25 = vmul.f32 %v4826_v13, %v8052_v53  ;;  %v8055_v29 = vld [vmem:[#allocation46_spill] sm:$0xff]  ;;  %v8060_v53 = vld [vmem:[#allocation67_spill] sm:$0xff] }
 0x28a   : > { %v2305_v55 = vmul.f32 %v4836_v33, %v8053_v5  ;;  %v2351_v35 = vadd.f32 %v2303_v9, %v2251_v39  ;;  %v2053_v4 = vadd.f32 %v7125_v44, %v1953_v49  ;;  %v2306_v46 = vmul.f32 %v4836_v33, %v8054_v52  ;;  %v8058_v9 = vld [vmem:[#allocation33_spill] sm:$0xff] }
 0x28b   : > { %v2054_v20 = vadd.f32 %v2006_v48, %v1954_v56  ;;  %v2352_v61 = vadd.f32 %v2304_v28, %v2252_v50  ;;  %v2405_v54 = vmul.f32 %v6887_v34, %v8055_v29  ;;  %v1955_v3 = vadd.f32 %v8056_v19, %v7111_v47 }
 0x28c   : > { %v1956_v13 = vadd.f32 %v8057_v7, %v7122_v22  ;;  %v2451_v0 = vadd.f32 %v2403_v11, %v2351_v35  ;;  %v2153_v2 = vadd.f32 %v2105_v62, %v2053_v4  ;;  %v2007_v44 = vmul.f32 %v4822_v15, %v6836_v37 }
 0x28d   : > { %v2154_v40 = vadd.f32 %v2106_v6, %v2054_v20  ;;  %v2452_v48 = vadd.f32 %v2404_v43, %v2352_v61  ;;  %v2406_v21 = vmul.f32 %v6887_v34, %v8058_v9  ;;  %v2008_v10 = vmul.f32 %v4822_v15, %v8053_v5  ;;  %v8059_v43 = vld [vmem:[#allocation51_spill] sm:$0xff]  ;;  %v8061_v20 = vld [vmem:[#allocation70_spill] sm:$0xff] }
 0x28e   : > { %v2107_v28 = vmul.f32 %v4829_v32, %v6842_v31  ;;  %v2506_v47 = vadd.f32 %v6938_v8, %v2451_v0  ;;  %v2253_v39 = vadd.f32 %v2205_v1, %v2153_v2  ;;  %v2055_v11 = vadd.f32 %v2007_v44, %v1955_v3  ;;  %v8065_v44 = vld [vmem:[#allocation54_spill] sm:$0xff] }
 0x28f   : > { %v2254_v22 = vadd.f32 %v2206_v25, %v2154_v40  ;;  %v2507_v62 = vadd.f32 %v6938_v8, %v2452_v48  ;;  %v2056_v6 = vadd.f32 %v2008_v10, %v1956_v13  ;;  %v2108_v37 = vmul.f32 %v4829_v32, %v8055_v29  ;;  %v8062_v29 = vld [vmem:[#allocation50_spill] sm:$0xff] }
 0x290   : > { %v2307_v41 = vmul.f32 %v4836_v33, %v8059_v43  ;;  %v2554_v49 = vmax.f32 %v2506_v47, 0.0  ;;  %v2353_v56 = vadd.f32 %v2305_v55, %v2253_v39  ;;  %v2155_v50 = vadd.f32 %v2107_v28, %v2055_v11 }
 0x291   : > { %v2354_v15 = vadd.f32 %v2306_v46, %v2254_v22  ;;  %v2555_v60 = vmax.f32 %v2507_v62, 0.0  ;;  %v2156_v31 = vadd.f32 %v2108_v37, %v2056_v6  ;;  %v2308_v1 = vmul.f32 %v4836_v33, %v7086_v57  ;;  %v8064_v57 = vld [vmem:[#allocation53_spill] sm:$0xff] }
 0x292   : > { %v2407_v25 = vmul.f32 %v6887_v34, %v8060_v53  ;;  %v2602_v5 = vmin.f32 %v2554_v49, 6.0  ;;  %v2453_v35 = vadd.f32 %v2405_v54, %v2353_v56  ;;  %v2255_v52 = vadd.f32 %v8061_v20, %v2155_v50 }
 0x293   : > { %v2454_v4 = vadd.f32 %v2406_v21, %v2354_v15  ;;  %v2603_v61 = vmin.f32 %v2555_v60, 6.0  ;;  %v2256_v19 = vadd.f32 %v8062_v29, %v2156_v31  ;;  %v8063_v55 = vrot.slane %v7070_v36, 2 }
 0x294   : > { %v1957_v3 = vadd.f32 %v8064_v57, %v7206_v63  ;;  %v2508_v7 = vadd.f32 %v6938_v8, %v2453_v35  ;;  %v2355_v13 = vadd.f32 %v2307_v41, %v2255_v52  ;;  %v2408_v0 = vmul.f32 %v6887_v34, %v7149_v59 }
 0x295   : > { %v1554_v46 = vsel %vm1552_vm2, %v8063_v55, %v1550_v58  ;;  %v2509_v54 = vadd.f32 %v6938_v8, %v2454_v4  ;;  %v2631_v2 = vpack.c.bf16 %v2603_v61, %v2602_v5  ;;  %v2356_v40 = vadd.f32 %v2308_v1, %v2256_v19  ;;  %v8068_v4 = vld [vmem:[#allocation8_spill] sm:$0xff] }
 0x296   : > { %v2057_v48 = vadd.f32 %v8065_v44, %v1957_v3  ;;  %v2109_v36 = vmul.f32 %v4829_v32, %v8058_v9  ;;  %v2556_v21 = vmax.f32 %v2508_v7, 0.0  ;;  %v2455_v28 = vadd.f32 %v2407_v25, %v2355_v13  ;;  %v8069_v3 = vld [vmem:[#allocation9_spill] sm:$0xff] }
 0x297   : > { %v2557_v10 = vmax.f32 %v2509_v54, 0.0  ;;  %v2310_v63 = vmul.f32 %v4836_v33, %v7202_v14  ;;  %4030 = vmatmul.mubr.bf16.gmra.mrb[36].mxu1 %v2631_v2  ;;  %v2456_v47 = vadd.f32 %v2408_v0, %v2356_v40  ;;  %v2309_v22 = vmul.f32 %v4836_v33, %v7094_v16  ;;  %v8070_v40 = vld [vmem:[#allocation10_spill] sm:$0xff] }
 0x298   : > { %v2157_v39 = vadd.f32 %v2109_v36, %v2057_v48  ;;  %v2410_v59 = vmul.f32 %v6887_v34, %v1554_v46  ;;  %v2604_v11 = vmin.f32 %v2556_v21, 6.0  ;;  %v2510_v6 = vadd.f32 %v6938_v8, %v2455_v28 }
 0x299   : > { %v2605_v62 = vmin.f32 %v2557_v10, 6.0  ;;  %v2358_v32 = vadd.f32 %v2310_v63, %v7108_v51  ;;  %v2511_v9 = vadd.f32 %v6938_v8, %v2456_v47  ;;  %v1553_v14 = vsel %vm1552_vm2, %v1550_v58, %v1551_v12 }
 0x29a   : > { %v2257_v37 = vadd.f32 %v7104_v24, %v2157_v39  ;;  %v8066_v16 = vrot.slane %v8048_v18, 2  ;;  %v2558_v51 = vmax.f32 %v2510_v6, 0.0  ;;  %v2311_v24 = vmul.f32 %v4836_v33, %v7210_v26 }
 0x29b   : > { %v2632_v41 = vpack.c.bf16 %v2605_v62, %v2604_v11  ;;  %v2458_v49 = vadd.f32 %v2410_v59, %v2358_v32  ;;  %v2559_v56 = vmax.f32 %v2511_v9, 0.0  ;;  %v2409_v45 = vmul.f32 %v6887_v34, %v7100_v23  ;;  %v8067_v23 = vld [vmem:[#allocation7_spill] sm:$0xff] }
 0x29c   : > { %v1606_v43 = vsel %vm1552_vm2, %v1551_v12, %v8066_v16  ;;  %v2357_v15 = vadd.f32 %v2309_v22, %v2257_v37  ;;  %v2312_v58 = vmul.f32 %v4836_v33, %v7219_v42  ;;  %v2606_v18 = vmin.f32 %v2558_v51, 6.0  ;;  %v8071_v62 = vld [vmem:[#allocation11_spill] sm:$0xff]  ;;  %v8072_v37 = vld [vmem:[#allocation12_spill] sm:$0xff] }
 0x29d   : > { %4033 = vmatprep.mubr.bf16.mxu1 %v2632_v41  ;;  %v2513_v30 = vadd.f32 %v6938_v8, %v2458_v49  ;;  %v2359_v27 = vadd.f32 %v2311_v24, %v7204_v17  ;;  %v2411_v12 = vmul.f32 %v6887_v34, %v1553_v14  ;;  %v2607_v50 = vmin.f32 %v2559_v56, 6.0 }
 0x29e   : > { %v2457_v60 = vadd.f32 %v2409_v45, %v2357_v15  ;;  %v2360_v26 = vadd.f32 %v2312_v58, %v7213_v38  ;;  %v2412_v31 = vmul.f32 %v6887_v34, %v1606_v43  ;;  %v2957_v25 = vshrl.u32 %v8067_v23, 16  ;;  %v8073_v45 = vld [vmem:[#allocation13_spill] sm:$0xff] }
 0x29f   : > { %v2561_v1 = vmax.f32 %v2513_v30, 0.0  ;;  %v2459_v53 = vadd.f32 %v2411_v12, %v2359_v27  ;;  %v2960_v33 = vshll.u32 %v8067_v23, 16  ;;  %v2633_v42 = vpack.c.bf16 %v2607_v50, %v2606_v18  ;;  %v8074_v27 = vld [vmem:[#allocation14_spill] sm:$0xff] }
 0x2a0   : > { %v2512_v5 = vadd.f32 %v6938_v8, %v2457_v60  ;;  %v2460_v35 = vadd.f32 %v2412_v31, %v2360_v26  ;;  %v2965_v17 = vshrl.u32 %v8068_v4, 16  ;;  %v2959_v61 = vrot.slane %v2957_v25, 4 }
 0x2a1   : > { %v2609_v20 = vmin.f32 %v2561_v1, 6.0  ;;  %v2514_v52 = vadd.f32 %v6938_v8, %v2459_v53  ;;  %v2962_v29 = vrot.slane %v2960_v33, 5  ;;  %4034 = vmatmul.mubr.bf16.gmra.mrb[40].mxu1 %v2633_v42  ;;  %v2968_v55 = vshll.u32 %v8068_v4, 16  ;;  %v8075_v33 = vld [vmem:[#allocation15_spill] sm:$0xff]  ;;  %v8076_v4 = vld [vmem:[#allocation16_spill] sm:$0xff] }
 0x2a2   : > { %v2560_v38 = vmax.f32 %v2512_v5, 0.0  ;;  %v2515_v34 = vadd.f32 %v6938_v8, %v2460_v35  ;;  %v2967_v19 = vrot.slane %v2965_v17, 4  ;;  %v2974_v7 = vshrl.u32 %v8069_v3, 16 }
 0x2a3   : > { %v2562_v46 = vmax.f32 %v2514_v52, 0.0  ;;  %v2963_v57 = vor.u32 %v2962_v29, %v2959_v61  ;;  %v2977_v54 = vshll.u32 %v8069_v3, 16  ;;  %v2970_v2 = vrot.slane %v2968_v55, 5 }
 0x2a4   : > { %v2608_v13 = vmin.f32 %v2560_v38, 6.0  ;;  %v2563_v0 = vmax.f32 %v2515_v34, 0.0  ;;  %v2983_v44 = vshrl.u32 %v8070_v40, 16  ;;  %v2986_v36 = vshll.u32 %v8070_v40, 16 }
 0x2a5   : > { %v2610_v48 = vmin.f32 %v2562_v46, 6.0  ;;  %v2971_v10 = vor.u32 %v2970_v2, %v2967_v19  ;;  %v2976_v28 = vrot.slane %v2974_v7, 4  ;;  %v2979_v63 = vrot.slane %v2977_v54, 5  ;;  %v8077_v46 = vld [vmem:[#allocation17_spill] sm:$0xff]  ;;  %v8078_v54 = vld [vmem:[#allocation18_spill] sm:$0xff] }
 0x2a6   : > { %v2634_v21 = vpack.c.bf16 %v2609_v20, %v2608_v13  ;;  %v2611_v8 = vmin.f32 %v2563_v0, 6.0  ;;  %v2985_v22 = vrot.slane %v2983_v44, 4  ;;  %v2988_v59 = vrot.slane %v2986_v36, 5 }
 0x2a7   : > { %v2972_v39 = vsel %vm2955_vm3, %v2963_v57, %v2971_v10  ;;  %v2980_v11 = vor.u32 %v2979_v63, %v2976_v28  ;;  %v2992_v6 = vshrl.u32 %v8071_v62, 16  ;;  %v2995_v32 = vshll.u32 %v8071_v62, 16 }
 0x2a8   : > { %4037 = vmatprep.mubr.bf16.mxu1 %v2634_v21  ;;  %v2635_v47 = vpack.c.bf16 %v2611_v8, %v2610_v48  ;;  %v2989_v9 = vor.u32 %v2988_v59, %v2985_v22  ;;  %v3001_v14 = vshrl.u32 %v8072_v37, 16  ;;  %v3004_v16 = vshll.u32 %v8072_v37, 16 }
 0x2a9   : > { %v2981_v43 = vsel %vm2955_vm3, %v2971_v10, %v2980_v11  ;;  %v2994_v41 = vrot.slane %v2992_v6, 4  ;;  %v2997_v51 = vrot.slane %v2995_v32, 5  ;;  %v3010_v58 = vshrl.u32 %v8073_v45, 16  ;;  %v8079_v10 = vld [vmem:[#allocation19_spill] sm:$0xff] }
 0x2aa   : > { %4038 = vmatmul.mubr.bf16.gmra.mrb[44].mxu1 %v2635_v47  ;;  %v2990_v49 = vsel %vm2955_vm3, %v2980_v11, %v2989_v9  ;;  %v3003_v24 = vrot.slane %v3001_v14, 4  ;;  %v3006_v56 = vrot.slane %v3004_v16, 5  ;;  %v3013_v18 = vshll.u32 %v8073_v45, 16  ;;  %v8081_v16 = vld [vmem:[#allocation21_spill] sm:$0xff] }
 0x2ab   : > { %4057 = vmatprep.mubr.bf16.mxu1 %v2972_v39  ;;  %v2998_v15 = vor.u32 %v2997_v51, %v2994_v41  ;;  %v3019_v12 = vshrl.u32 %v8074_v27, 16  ;;  %v3022_v50 = vshll.u32 %v8074_v27, 16  ;;  %v3012_v26 = vrot.slane %v3010_v58, 4  ;;  %v8080_v39 = vld [vmem:[#allocation20_spill] sm:$0xff] }
 0x2ac   : > { %v3007_v30 = vor.u32 %v3006_v56, %v3003_v24  ;;  %v3015_v31 = vrot.slane %v3013_v18, 5  ;;  %v3028_v42 = vshrl.u32 %v8075_v33, 16  ;;  %v3031_v5 = vshll.u32 %v8075_v33, 16 }
 0x2ad   : > { %v2999_v60 = vsel %vm2955_vm3, %v2989_v9, %v2998_v15  ;;  %v3021_v53 = vrot.slane %v3019_v12, 4  ;;  %v3024_v23 = vrot.slane %v3022_v50, 5  ;;  %v3037_v17 = vshrl.u32 %v8076_v4, 16  ;;  %v8083_v50 = vld [vmem:[#allocation23_spill] sm:$0xff] }
 0x2ae   : > { %v3008_v1 = vsel %vm2955_vm3, %v2998_v15, %v3007_v30  ;;  %v3016_v25 = vor.u32 %v3015_v31, %v3012_v26  ;;  %v3040_v20 = vshll.u32 %v8076_v4, 16  ;;  %v3030_v61 = vrot.slane %v3028_v42, 4 }
 0x2af   : > { %v3025_v35 = vor.u32 %v3024_v23, %v3021_v53  ;;  %v3033_v29 = vrot.slane %v3031_v5, 5  ;;  %v3039_v34 = vrot.slane %v3037_v17, 4  ;;  %v3046_v57 = vshrl.u32 %v8077_v46, 16 }
 0x2b0   : > { %v3017_v52 = vsel %vm2955_vm3, %v3007_v30, %v3016_v25  ;;  %v3042_v19 = vrot.slane %v3040_v20, 5  ;;  %v3049_v3 = vshll.u32 %v8077_v46, 16  ;;  %v3055_v13 = vshrl.u32 %v8078_v54, 16  ;;  %v8085_v20 = vld [vmem:[#allocation25_spill] sm:$0xff] }
 0x2b1   : > { %v3026_v38 = vsel %vm2955_vm3, %v3016_v25, %v3025_v35  ;;  %v3034_v55 = vor.u32 %v3033_v29, %v3030_v61  ;;  %v3058_v0 = vshll.u32 %v8078_v54, 16  ;;  %v3048_v40 = vrot.slane %v3046_v57, 4 }
 0x2b2   : > { %4058 = vmatmul.mubr.bf16.vlgmr.msra.gmra.mrb[0].mxu1 %v2981_v43  ;;  %v3043_v7 = vor.u32 %v3042_v19, %v3039_v34  ;;  %v3051_v44 = vrot.slane %v3049_v3, 5  ;;  %v3057_v36 = vrot.slane %v3055_v13, 4  ;;  %v3064_v28 = vshrl.u32 %v8079_v10, 16 }
 0x2b3   : > { %4061 = vmatprep.mubr.bf16.mxu1 %v2990_v49  ;;  %v3035_v2 = vsel %vm2955_vm3, %v3025_v35, %v3034_v55  ;;  %v3060_v21 = vrot.slane %v3058_v0, 5  ;;  %v3067_v63 = vshll.u32 %v8079_v10, 16  ;;  %v3073_v22 = vshrl.u32 %v8080_v39, 16  ;;  %v8082_v49 = vld [vmem:[#allocation22_spill] sm:$0xff]  ;;  %v8087_v0 = vld [vmem:[#allocation27_spill] sm:$0xff] }
 0x2b4   : > { %v3044_v48 = vsel %vm2955_vm3, %v3034_v55, %v3043_v7  ;;  %v3052_v8 = vor.u32 %v3051_v44, %v3048_v40  ;;  %v3076_v59 = vshll.u32 %v8080_v39, 16  ;;  %v3066_v62 = vrot.slane %v3064_v28, 4 }
 0x2b5   : > { %v3061_v47 = vor.u32 %v3060_v21, %v3057_v36  ;;  %v3069_v6 = vrot.slane %v3067_v63, 5  ;;  %v3075_v9 = vrot.slane %v3073_v22, 4  ;;  %v3082_v43 = vshrl.u32 %v8081_v16, 16 }
 0x2b6   : > { %v3053_v11 = vsel %vm2955_vm3, %v3043_v7, %v3052_v8  ;;  %v3078_v37 = vrot.slane %v3076_v59, 5  ;;  %v3085_v41 = vshll.u32 %v8081_v16, 16  ;;  %v3091_v24 = vshrl.u32 %v8082_v49, 16  ;;  %v8089_v59 = vld [vmem:[#allocation29_spill] sm:$0xff] }
 0x2b7   : > { %v3062_v32 = vsel %vm2955_vm3, %v3052_v8, %v3061_v47  ;;  %v3070_v14 = vor.u32 %v3069_v6, %v3066_v62  ;;  %v3094_v56 = vshll.u32 %v8082_v49, 16  ;;  %v3084_v45 = vrot.slane %v3082_v43, 4 }
 0x2b8   : > { %v3079_v51 = vor.u32 %v3078_v37, %v3075_v9  ;;  %v3087_v58 = vrot.slane %v3085_v41, 5  ;;  %v3093_v30 = vrot.slane %v3091_v24, 4  ;;  %v3103_v26 = vshll.u32 %v8083_v50, 16 }
 0x2b9   : > { %v3071_v15 = vsel %vm2955_vm3, %v3061_v47, %v3070_v14  ;;  %v3096_v27 = vrot.slane %v3094_v56, 5  ;;  %v3121_v61 = vshll.u32 %v8085_v20, 16  ;;  %v3139_v40 = vshll.u32 %v8087_v0, 16  ;;  %v8091_v56 = vld [vmem:[#allocation31_spill] sm:$0xff] }
 0x2ba   : > { %4062 = vmatmul.mubr.bf16.gmra.mrb[4].mxu1 %v2999_v60  ;;  %v3080_v18 = vsel %vm2955_vm3, %v3070_v14, %v3079_v51  ;;  %v3088_v12 = vor.u32 %v3087_v58, %v3084_v45  ;;  %v3100_v60 = vshrl.u32 %v8083_v50, 16  ;;  %v3105_v42 = vrot.slane %v3103_v26, 5  ;;  %v3729_v26 = vld [vmem:[%s7515_s6] ss:$0 sm:$0xff] }
 0x2bb   : > { %4065 = vmatprep.mubr.bf16.mxu1 %v3008_v1  ;;  %v3097_v31 = vor.u32 %v3096_v27, %v3093_v30  ;;  %v8084_v1 = vld [vmem:[#allocation24_spill] sm:$0xff]  ;;  %v3123_v57 = vrot.slane %v3121_v61, 5  ;;  %v3141_v28 = vrot.slane %v3139_v40, 5  ;;  %v3157_v62 = vshll.u32 %v8089_v59, 16 }
 0x2bc   : > { %v3109_v53 = vshrl.u32 %v8084_v1, 16  ;;  %v3112_v23 = vshll.u32 %v8084_v1, 16  ;;  %v3089_v25 = vsel %vm2955_vm3, %v3079_v51, %v3088_v12  ;;  %v3102_v33 = vrot.slane %v3100_v60, 4 }
 0x2bd   : > { %v3098_v5 = vsel %vm2955_vm3, %v3088_v12, %v3097_v31  ;;  %v3159_v43 = vrot.slane %v3157_v62, 5  ;;  %v3175_v45 = vshll.u32 %v8091_v56, 16 }
 0x2be   : > { %v3111_v35 = vrot.slane %v3109_v53, 4  ;;  %v3114_v4 = vrot.slane %v3112_v23, 5  ;;  %v3106_v17 = vor.u32 %v3105_v42, %v3102_v33 }
 0x2bf   : > { %v3177_v27 = vrot.slane %v3175_v45, 5 }
 0x2c0   : > { %v3115_v29 = vor.u32 %v3114_v4, %v3111_v35  ;;  %v3107_v55 = vsel %vm2955_vm3, %v3097_v31, %v3106_v17  ;;  %v3738_v31 = vld [vmem:[%s7517_s8] ss:$0 sm:$0xff] }
 0x2c1   : > { %v7404_v1 = vadd.f32 %v3738_v31, %v3729_v26 }
 0x2c2   : > { %4066 = vmatmul.mubr.bf16.gmra.mrb[8].mxu1 %v3017_v52  ;;  %v3118_v52 = vshrl.u32 %v8085_v20, 16  ;;  %v3116_v3 = vsel %vm2955_vm3, %v3106_v17, %v3115_v29 }
 0x2c3   : > { %4069 = vmatprep.mubr.bf16.mxu1 %v3026_v38  ;;  %v8086_v38 = vld [vmem:[#allocation26_spill] sm:$0xff] }
 0x2c4   : > { %v3127_v34 = vshrl.u32 %v8086_v38, 16  ;;  %v3130_v19 = vshll.u32 %v8086_v38, 16  ;;  %v3120_v46 = vrot.slane %v3118_v52, 4 }
 0x2c6   : > { %v3129_v7 = vrot.slane %v3127_v34, 4  ;;  %v3132_v54 = vrot.slane %v3130_v19, 5  ;;  %v3124_v13 = vor.u32 %v3123_v57, %v3120_v46 }
 0x2c8   : > { %v3133_v44 = vor.u32 %v3132_v54, %v3129_v7  ;;  %v3125_v8 = vsel %vm2955_vm3, %v3115_v29, %v3124_v13 }
 0x2ca   : > { %4070 = vmatmul.mubr.bf16.gmra.mrb[12].mxu1 %v3035_v2  ;;  %v3136_v2 = vshrl.u32 %v8087_v0, 16  ;;  %v3134_v63 = vsel %vm2955_vm3, %v3124_v13, %v3133_v44 }
 0x2cb   : > { %4073 = vmatprep.mubr.bf16.mxu1 %v3044_v48  ;;  %v8088_v48 = vld [vmem:[#allocation28_spill] sm:$0xff] }
 0x2cc   : > { %v3145_v36 = vshrl.u32 %v8088_v48, 16  ;;  %v3148_v21 = vshll.u32 %v8088_v48, 16  ;;  %v3138_v10 = vrot.slane %v3136_v2, 4 }
 0x2ce   : > { %v3147_v47 = vrot.slane %v3145_v36, 4  ;;  %v3150_v39 = vrot.slane %v3148_v21, 5  ;;  %v3142_v22 = vor.u32 %v3141_v28, %v3138_v10 }
 0x2d0   : > { %v3151_v6 = vor.u32 %v3150_v39, %v3147_v47  ;;  %v3143_v14 = vsel %vm2955_vm3, %v3133_v44, %v3142_v22 }
 0x2d2   : > { %4074 = vmatmul.mubr.bf16.gmra.mrb[16].mxu1 %v3053_v11  ;;  %v3154_v11 = vshrl.u32 %v8089_v59, 16  ;;  %v3152_v41 = vsel %vm2955_vm3, %v3142_v22, %v3151_v6 }
 0x2d3   : > { %4077 = vmatprep.mubr.bf16.mxu1 %v3062_v32  ;;  %v8090_v32 = vld [vmem:[#allocation30_spill] sm:$0xff] }
 0x2d4   : > { %v3163_v9 = vshrl.u32 %v8090_v32, 16  ;;  %v3166_v37 = vshll.u32 %v8090_v32, 16  ;;  %v3156_v16 = vrot.slane %v3154_v11, 4 }
 0x2d6   : > { %v3165_v51 = vrot.slane %v3163_v9, 4  ;;  %v3168_v49 = vrot.slane %v3166_v37, 5  ;;  %v3160_v24 = vor.u32 %v3159_v43, %v3156_v16 }
 0x2d8   : > { %v3169_v58 = vor.u32 %v3168_v49, %v3165_v51 }
 0x2da   : > { %4078 = vmatmul.mubr.bf16.gmra.mrb[20].mxu1 %v3071_v15  ;;  %v3172_v15 = vshrl.u32 %v8091_v56, 16  ;;  %v3170_v12 = vsel %vm2955_vm3, %v3160_v24, %v3169_v58 }
 0x2db   : > { %4081 = vmatprep.mubr.bf16.mxu1 %v3080_v18  ;;  %v3161_v18 = vsel %vm2955_vm3, %v3151_v6, %v3160_v24 }
 0x2dc   : > { %v3174_v30 = vrot.slane %v3172_v15, 4 }
 0x2de   : > { %v3178_v50 = vor.u32 %v3177_v27, %v3174_v30 }
 0x2e0   : > { %v3179_v60 = vsel %vm2955_vm3, %v3169_v58, %v3178_v50 }
 0x2e2   : > { %4082 = vmatmul.mubr.bf16.gmra.mrb[24].mxu1 %v3089_v25 }
 0x2e3   : > { %4085 = vmatprep.mubr.bf16.mxu1 %v3098_v5 }
 0x2ea   : > { %4086 = vmatmul.mubr.bf16.gmra.mrb[28].mxu1 %v3107_v55 }
 0x2eb   : > { %4089 = vmatprep.mubr.bf16.mxu1 %v3116_v3 }
 0x2f2   : > { %4090 = vmatmul.mubr.bf16.gmra.mrb[32].mxu1 %v3125_v8 }
 0x2f3   : > { %4093 = vmatprep.mubr.bf16.mxu1 %v3134_v63 }
 0x2fa   : > { %4094 = vmatmul.mubr.bf16.gmra.mrb[36].mxu1 %v3143_v14 }
 0x2fb   : > { %4097 = vmatprep.mubr.bf16.mxu1 %v3152_v41 }
 0x302   : > { %4098 = vmatmul.mubr.bf16.gmra.mrb[40].mxu1 %v3161_v18 }
 0x303   : > { %4101 = vmatprep.mubr.bf16.mxu1 %v3170_v12 }
 0x30a   : > { %4102 = vmatmul.mubr.bf16.gmra.mrb[44].mxu1 %v3179_v60 }
 0x385   : > { %v4059_v53 = vpop.f32.mrb[0].mxu1 }
 0x386   : > { %v4105_v23 = vadd.f32 %v4059_v53, %v3729_v26  ;;  %v3286_v25 = vpop.f32.mrb[1].mxu1 }
 0x387   : > { %v4107_v33 = vadd.f32 %v3729_v26, %v3286_v25  ;;  %v4060_v42 = vpop.f32.mrb[2].mxu1 }
 0x388   : > { %v4106_v5 = vadd.f32 %v4105_v23, %v3738_v31  ;;  %v4110_v35 = vadd.f32 %v7404_v1, %v4060_v42  ;;  %v3289_v4 = vpop.f32.mrb[3].mxu1 }
 0x389   : > { %v4108_v17 = vadd.f32 %v4107_v33, %v3738_v31  ;;  %v4112_v20 = vadd.f32 %v7404_v1, %v3289_v4 }
 0x38a   : > { %3527 = vst [vmem:[%s4499_s20 + $0x10] sm:$0xff] %v4106_v5  ;;  %3528 = vst [vmem:[%s4499_s20 + $0x18] sm:$0xff] %v4110_v35 }
 0x38b   : > { %3525 = vst [vmem:[%s4499_s20] sm:$0xff] %v4108_v17  ;;  %3526 = vst [vmem:[%s4499_s20 + $0x8] sm:$0xff] %v4112_v20 }
 0x38d   : > { %v4063_v52 = vpop.f32.mrb[4].mxu1 }
 0x38e   : > { %v4114_v61 = vadd.f32 %v7404_v1, %v4063_v52  ;;  %v3302_v29 = vpop.f32.mrb[5].mxu1 }
 0x38f   : > { %v4116_v38 = vadd.f32 %v7404_v1, %v3302_v29  ;;  %v4064_v34 = vpop.f32.mrb[6].mxu1 }
 0x390   : > { %3531 = vst [vmem:[%s4499_s20 + $0x30] sm:$0xff] %v4114_v61  ;;  %v4118_v19 = vadd.f32 %v7404_v1, %v4064_v34  ;;  %v3305_v55 = vpop.f32.mrb[7].mxu1 }
 0x391   : > { %3529 = vst [vmem:[%s4499_s20 + $0x20] sm:$0xff] %v4116_v38  ;;  %v4120_v46 = vadd.f32 %v7404_v1, %v3305_v55 }
 0x392   : > { %3532 = vst [vmem:[%s4499_s20 + $0x38] sm:$0xff] %v4118_v19 }
 0x393   : > { %3530 = vst [vmem:[%s4499_s20 + $0x28] sm:$0xff] %v4120_v46 }
 0x395   : > { %v4067_v57 = vpop.f32.mrb[8].mxu1 }
 0x396   : > { %v4122_v3 = vadd.f32 %v7404_v1, %v4067_v57  ;;  %v3318_v7 = vpop.f32.mrb[9].mxu1 }
 0x397   : > { %v4124_v54 = vadd.f32 %v7404_v1, %v3318_v7  ;;  %v4068_v13 = vpop.f32.mrb[10].mxu1 }
 0x398   : > { %3535 = vst [vmem:[%s4499_s20 + $0x50] sm:$0xff] %v4122_v3  ;;  %v4126_v0 = vadd.f32 %v7404_v1, %v4068_v13  ;;  %v3321_v2 = vpop.f32.mrb[11].mxu1 }
 0x399   : > { %3533 = vst [vmem:[%s4499_s20 + $0x40] sm:$0xff] %v4124_v54  ;;  %v4128_v40 = vadd.f32 %v7404_v1, %v3321_v2 }
 0x39a   : > { %3536 = vst [vmem:[%s4499_s20 + $0x58] sm:$0xff] %v4126_v0 }
 0x39b   : > { %3534 = vst [vmem:[%s4499_s20 + $0x48] sm:$0xff] %v4128_v40 }
 0x39d   : > { %v4071_v44 = vpop.f32.mrb[12].mxu1 }
 0x39e   : > { %v4130_v48 = vadd.f32 %v7404_v1, %v4071_v44  ;;  %v3334_v36 = vpop.f32.mrb[13].mxu1 }
 0x39f   : > { %v4132_v21 = vadd.f32 %v7404_v1, %v3334_v36  ;;  %v4072_v8 = vpop.f32.mrb[14].mxu1 }
 0x3a0   : > { %3539 = vst [vmem:[%s4499_s20 + $0x70] sm:$0xff] %v4130_v48  ;;  %v4134_v10 = vadd.f32 %v7404_v1, %v4072_v8  ;;  %v3337_v28 = vpop.f32.mrb[15].mxu1 }
 0x3a1   : > { %3537 = vst [vmem:[%s4499_s20 + $0x60] sm:$0xff] %v4132_v21  ;;  %v4136_v63 = vadd.f32 %v7404_v1, %v3337_v28 }
 0x3a2   : > { %3540 = vst [vmem:[%s4499_s20 + $0x78] sm:$0xff] %v4134_v10 }
 0x3a3   : > { %3538 = vst [vmem:[%s4499_s20 + $0x68] sm:$0xff] %v4136_v63 }
 0x3a5   : > { %v4075_v47 = vpop.f32.mrb[16].mxu1 }
 0x3a6   : > { %v4138_v39 = vadd.f32 %v7404_v1, %v4075_v47  ;;  %v3350_v22 = vpop.f32.mrb[17].mxu1 }
 0x3a7   : > { %v4140_v59 = vadd.f32 %v7404_v1, %v3350_v22  ;;  %v4076_v11 = vpop.f32.mrb[18].mxu1 }
 0x3a8   : > { %3543 = vst [vmem:[%s4499_s20 + $0x90] sm:$0xff] %v4138_v39  ;;  %v4142_v62 = vadd.f32 %v7404_v1, %v4076_v11  ;;  %v3353_v6 = vpop.f32.mrb[19].mxu1 }
 0x3a9   : > { %3541 = vst [vmem:[%s4499_s20 + $0x80] sm:$0xff] %v4140_v59  ;;  %v4144_v32 = vadd.f32 %v7404_v1, %v3353_v6 }
 0x3aa   : > { %3544 = vst [vmem:[%s4499_s20 + $0x98] sm:$0xff] %v4142_v62 }
 0x3ab   : > { %3542 = vst [vmem:[%s4499_s20 + $0x88] sm:$0xff] %v4144_v32 }
 0x3ad   : > { %v4079_v9 = vpop.f32.mrb[20].mxu1 }
 0x3ae   : > { %v4146_v37 = vadd.f32 %v7404_v1, %v4079_v9  ;;  %v3366_v14 = vpop.f32.mrb[21].mxu1 }
 0x3af   : > { %v4148_v16 = vadd.f32 %v7404_v1, %v3366_v14  ;;  %v4080_v43 = vpop.f32.mrb[22].mxu1 }
 0x3b0   : > { %3547 = vst [vmem:[%s4499_s20 + $0xb0] sm:$0xff] %v4146_v37  ;;  %v4150_v41 = vadd.f32 %v7404_v1, %v4080_v43  ;;  %v3369_v51 = vpop.f32.mrb[23].mxu1 }
 0x3b1   : > { %3545 = vst [vmem:[%s4499_s20 + $0xa0] sm:$0xff] %v4148_v16  ;;  %v4152_v49 = vadd.f32 %v7404_v1, %v3369_v51 }
 0x3b2   : > { %3548 = vst [vmem:[%s4499_s20 + $0xb8] sm:$0xff] %v4150_v41 }
 0x3b3   : > { %3546 = vst [vmem:[%s4499_s20 + $0xa8] sm:$0xff] %v4152_v49 }
 0x3b5   : > { %v4083_v24 = vpop.f32.mrb[24].mxu1 }
 0x3b6   : > { %v4154_v56 = vadd.f32 %v7404_v1, %v4083_v24  ;;  %v3382_v15 = vpop.f32.mrb[25].mxu1 }
 0x3b7   : > { %v4156_v45 = vadd.f32 %v7404_v1, %v3382_v15  ;;  %v4084_v58 = vpop.f32.mrb[26].mxu1 }
 0x3b8   : > { %3551 = vst [vmem:[%s4499_s20 + $0xd0] sm:$0xff] %v4154_v56  ;;  %v4158_v18 = vadd.f32 %v7404_v1, %v4084_v58  ;;  %v3385_v30 = vpop.f32.mrb[27].mxu1 }
 0x3b9   : > { %3549 = vst [vmem:[%s4499_s20 + $0xc0] sm:$0xff] %v4156_v45  ;;  %v4160_v27 = vadd.f32 %v7404_v1, %v3385_v30 }
 0x3ba   : > { %3552 = vst [vmem:[%s4499_s20 + $0xd8] sm:$0xff] %v4158_v18 }
 0x3bb   : > { %3550 = vst [vmem:[%s4499_s20 + $0xc8] sm:$0xff] %v4160_v27 }
 0x3bd   : > { %v4087_v12 = vpop.f32.mrb[28].mxu1 }
 0x3be   : > { %v4162_v50 = vadd.f32 %v7404_v1, %v4087_v12  ;;  %v3398_v60 = vpop.f32.mrb[29].mxu1 }
 0x3bf   : > { %v4164_v26 = vadd.f32 %v7404_v1, %v3398_v60  ;;  %v4088_v31 = vpop.f32.mrb[30].mxu1 }
 0x3c0   : > { %3555 = vst [vmem:[%s4499_s20 + $0xf0] sm:$0xff] %v4162_v50  ;;  %v4166_v53 = vadd.f32 %v7404_v1, %v4088_v31  ;;  %v3401_v23 = vpop.f32.mrb[31].mxu1 }
 0x3c1   : > { %3553 = vst [vmem:[%s4499_s20 + $0xe0] sm:$0xff] %v4164_v26  ;;  %v4168_v25 = vadd.f32 %v7404_v1, %v3401_v23 }
 0x3c2   : > { %3556 = vst [vmem:[%s4499_s20 + $0xf8] sm:$0xff] %v4166_v53 }
 0x3c3   : > { %3554 = vst [vmem:[%s4499_s20 + $0xe8] sm:$0xff] %v4168_v25 }
 0x3c5   : > { %v4091_v33 = vpop.f32.mrb[32].mxu1 }
 0x3c6   : > { %v4170_v42 = vadd.f32 %v7404_v1, %v4091_v33  ;;  %v3414_v5 = vpop.f32.mrb[33].mxu1 }
 0x3c7   : > { %v4172_v35 = vadd.f32 %v7404_v1, %v3414_v5  ;;  %v4092_v4 = vpop.f32.mrb[34].mxu1 }
 0x3c8   : > { %3559 = vst [vmem:[%s4499_s20 + $0x110] sm:$0xff] %v4170_v42  ;;  %v4174_v17 = vadd.f32 %v7404_v1, %v4092_v4  ;;  %v3417_v20 = vpop.f32.mrb[35].mxu1 }
 0x3c9   : > { %3557 = vst [vmem:[%s4499_s20 + $0x100] sm:$0xff] %v4172_v35  ;;  %v4176_v52 = vadd.f32 %v7404_v1, %v3417_v20 }
 0x3ca   : > { %3560 = vst [vmem:[%s4499_s20 + $0x118] sm:$0xff] %v4174_v17 }
 0x3cb   : > { %3558 = vst [vmem:[%s4499_s20 + $0x108] sm:$0xff] %v4176_v52 }
 0x3cd   : > { %v4095_v61 = vpop.f32.mrb[36].mxu1 }
 0x3ce   : > { %v4178_v29 = vadd.f32 %v7404_v1, %v4095_v61  ;;  %v3430_v38 = vpop.f32.mrb[37].mxu1 }
 0x3cf   : > { %v4180_v34 = vadd.f32 %v7404_v1, %v3430_v38  ;;  %v4096_v19 = vpop.f32.mrb[38].mxu1 }
 0x3d0   : > { %3563 = vst [vmem:[%s4499_s20 + $0x130] sm:$0xff] %v4178_v29  ;;  %v4182_v55 = vadd.f32 %v7404_v1, %v4096_v19  ;;  %v3433_v46 = vpop.f32.mrb[39].mxu1 }
 0x3d1   : > { %3561 = vst [vmem:[%s4499_s20 + $0x120] sm:$0xff] %v4180_v34  ;;  %v4184_v57 = vadd.f32 %v7404_v1, %v3433_v46 }
 0x3d2   : > { %3564 = vst [vmem:[%s4499_s20 + $0x138] sm:$0xff] %v4182_v55 }
 0x3d3   : > { %3562 = vst [vmem:[%s4499_s20 + $0x128] sm:$0xff] %v4184_v57 }
 0x3d5   : > { %v4099_v3 = vpop.f32.mrb[40].mxu1 }
 0x3d6   : > { %v4186_v7 = vadd.f32 %v7404_v1, %v4099_v3  ;;  %v3446_v54 = vpop.f32.mrb[41].mxu1 }
 0x3d7   : > { %v4188_v13 = vadd.f32 %v7404_v1, %v3446_v54  ;;  %v4100_v0 = vpop.f32.mrb[42].mxu1 }
 0x3d8   : > { %3567 = vst [vmem:[%s4499_s20 + $0x150] sm:$0xff] %v4186_v7  ;;  %v4190_v2 = vadd.f32 %v7404_v1, %v4100_v0  ;;  %v3449_v40 = vpop.f32.mrb[43].mxu1 }
 0x3d9   : > { %3565 = vst [vmem:[%s4499_s20 + $0x140] sm:$0xff] %v4188_v13  ;;  %v4192_v44 = vadd.f32 %v7404_v1, %v3449_v40 }
 0x3da   : > { %3568 = vst [vmem:[%s4499_s20 + $0x158] sm:$0xff] %v4190_v2 }
 0x3db   : > { %3566 = vst [vmem:[%s4499_s20 + $0x148] sm:$0xff] %v4192_v44 }
 0x3dd   : > { %v4103_v48 = vpop.f32.mrb[44].mxu1 }
 0x3de   : > { %v4194_v36 = vadd.f32 %v7404_v1, %v4103_v48  ;;  %v3462_v21 = vpop.f32.mrb[45].mxu1 }
 0x3df   : > { %v4196_v8 = vadd.f32 %v7404_v1, %v3462_v21  ;;  %v4104_v10 = vpop.f32.mrb[46].mxu1 }
 0x3e0   : > { %3571 = vst [vmem:[%s4499_s20 + $0x170] sm:$0xff] %v4194_v36  ;;  %v4198_v28 = vadd.f32 %v7404_v1, %v4104_v10  ;;  %v3465_v63 = vpop.f32.mrb[47].mxu1 }
 0x3e1   : > { %3569 = vst [vmem:[%s4499_s20 + $0x160] sm:$0xff] %v4196_v8  ;;  %v4200_v47 = vadd.f32 %v7404_v1, %v3465_v63 }
 0x3e2   : > { %3572 = vst [vmem:[%s4499_s20 + $0x178] sm:$0xff] %v4198_v28 }
 0x3e3   : > { %3570 = vst [vmem:[%s4499_s20 + $0x168] sm:$0xff] %v4200_v47 }
 0x3e4 PF: > { %s19_s11 = sadd.s32 1, %s4408_s11   ;;  %s8092_s30 = smov %s4404_s10 }
 0x3e5   : > { %p16_p5 = scmp.ge.s32.totalorder %s19_s11, 4   ;;  %s8093_s10 = smov %s8095_s12 }
 0x3e7   :  { %18 = sbr.rel (!%p16_p5) target bundleno = 2 (0x2), region = 178 }
 0x3ee   :  { %3603 = vsyncmov [#allocation3] }
 0x3f1   :  { %s3604_s25 = vpop.sfrf %3603 }
 0x3f2   :  { %p3749_p6 = scmp.ne.s32.totalorder %s3604_s25, 0 }
 0x3f4   :  { %3608 = shalt.err (%p3749_p6)  }
 0x3f5   :  { %3610 = vsyncmov [#allocation3 + $0x1] }
 0x3f8   :  { %s3611_s26 = vpop.sfrf %3610 }
 0x3f9   :  { %p3750_p7 = scmp.ne.s32.totalorder %s3611_s26, 0 }
 0x3fb   :  { %3615 = shalt.err (%p3750_p7)  }

</bundles_post_ra>
